<compile_context>
chip_gen: v5e
topology: v5e:2x2
jax: 0.10.0
libtpu: 0.0.40
codegen_flags: <defaults>
</compile_context>

<pallas_src>
from functools import partial

import jax
import jax.numpy as jnp
from jax.experimental import pallas as pl
from jax.experimental.pallas import tpu as pltpu


# ------------------------------ Pallas kernel ------------------------------ #

def _fused_conv_bn_lrelu_kernel(x_ref, w_ref, g_ref, b_ref, out_ref, colsum_ref, *,
                                kh, kw, stride, oh, ow, band_rows, dup_rows,
                                eps, slope, chunk_rows):
    """One grid step = one (sample, band-of-output-rows) conv tile.

    x_ref      : (rows_in, Wp, C)   bf16  halo band of the padded NHWC sample
    w_ref      : (KH*KW*C, OCp)     bf16  fused-contraction conv weights
    g_ref      : (1, OCp)           f32   BatchNorm gamma (padded)
    b_ref      : (1, OCp)           f32   BatchNorm beta  (padded)
    out_ref    : (M, OCp)           f32   VMEM-resident output (written to HBM once)
    colsum_ref : (1, OCp)           f32   running per-channel sum (for BN mean)
    """
    n = pl.program_id(0)
    band = pl.program_id(1)
    last_n = pl.num_programs(0) - 1
    last_b = pl.num_programs(1) - 1

    ocp = out_ref.shape[1]
    m_total = out_ref.shape[0]
    band_m = band_rows * ow

    @pl.when((n == 0) & (band == 0))
    def _():
        colsum_ref[...] = jnp.zeros_like(colsum_ref)

    # ---- Conv: build im2col slab (band_m, KH*KW*C) in VMEM, ONE MXU matmul ----
    xb = x_ref[...]                                      # (rows_in, Wp, C) bf16
    cols = []
    for i in range(kh):
        for j in range(kw):
            win = xb[i:i + (band_rows - 1) * stride + 1:stride,
                     j:j + (ow - 1) * stride + 1:stride, :]
            cols.append(win.reshape(band_m, win.shape[-1]))
    slab = jnp.concatenate(cols, axis=-1)                # (band_m, KH*KW*C)
    acc = jnp.dot(slab, w_ref[...], preferred_element_type=jnp.float32)
    # Conv bias intentionally omitted: it cancels exactly through the training-mode
    # BatchNorm mean subtraction below.

    # ---- Store the band into the VMEM-resident (M, OCp) output (single store) ----
    start_row = jnp.minimum(band * band_rows, oh - band_rows)  # last band shifts up
    row0 = n * (oh * ow) + start_row * ow
    if dup_rows == 0:
        row0 = pl.multiple_of(row0, band_m)
    out_ref[pl.ds(row0, band_m), :] = acc

    # ---- Per-channel column sums accumulated under the conv pipeline ----
    if dup_rows == 0:
        colsum_ref[...] += jnp.sum(acc, axis=0, keepdims=True)
    else:
        # The shifted last band recomputes dup_rows*ow rows already counted by the
        # previous band; mask them out of the statistics (values overwritten with
        # identical results in out_ref, so the output itself is unaffected).
        skip = jnp.where(band == last_b, dup_rows * ow, 0)
        ridx = jax.lax.broadcasted_iota(jnp.int32, (band_m, 1), 0)
        colsum_ref[...] += jnp.sum(jnp.where(ridx >= skip, acc, 0.0),
                                   axis=0, keepdims=True)

    # ---- Epilogue (last grid step): chunked BatchNorm (batch stats, biased
    # two-pass variance) + LeakyReLU, in place over the resident output ----
    @pl.when((n == last_n) & (band == last_b))
    def _():
        inv_m = 1.0 / m_total
        mean = colsum_ref[...] * inv_m                   # (1, OCp)

        nchunks = m_total // chunk_rows
        rem = m_total % chunk_rows
        aligned = (chunk_rows % 8 == 0)

        def _chunk_start(i):
            r0 = i * chunk_rows
            return pl.multiple_of(r0, 8) if aligned else r0

        # Pass 1 (chunked): centered sum of squares.
        def ssq_body(i, ssq):
            c = out_ref[pl.ds(_chunk_start(i), chunk_rows), :] - mean
            return ssq + jnp.sum(c * c, axis=0, keepdims=True)
        ssq = jax.lax.fori_loop(0, nchunks, ssq_body,
                                jnp.zeros((1, ocp), jnp.float32))
        if rem:
            c = out_ref[pl.ds(nchunks * chunk_rows, rem), :] - mean
            ssq = ssq + jnp.sum(c * c, axis=0, keepdims=True)

        var = ssq * inv_m
        scale = g_ref[...] * jax.lax.rsqrt(var + eps)
        shift = b_ref[...] - mean * scale

        # Pass 2 (chunked): normalize + affine + LeakyReLU, written back in place.
        def bn_chunk(r0, rows):
            z = out_ref[pl.ds(r0, rows), :] * scale + shift
            out_ref[pl.ds(r0, rows), :] = jnp.where(z >= 0, z, slope * z)

        def bn_body(i, carry):
            bn_chunk(_chunk_start(i), chunk_rows)
            return carry
        jax.lax.fori_loop(0, nchunks, bn_body, 0)
        if rem:
            bn_chunk(nchunks * chunk_rows, rem)


# ------------------------------- JAX wrapper -------------------------------- #

def conv_bn_lrelu(x, weight, bias, gamma, beta, *, stride, padding,
                  eps=1e-5, slope=0.01, band_rows=None):
    del bias  # cancels exactly through training-mode BatchNorm (mean subtraction)

    N, C, H, W = x.shape
    OC, IC, KH, KW = weight.shape
    assert IC == C
    OH = (H + 2 * padding - KH) // stride + 1
    OW = (W + 2 * padding - KW) // stride + 1
    Hp, Wp = H + 2 * padding, W + 2 * padding
    M = N * OH * OW
    OCp = ((OC + 127) // 128) * 128
    KC = KH * KW * C

    # Band of output rows per grid step: as large as possible while the matmul M-dim
    # stays around <=1024 rows (amortizes per-grid-step overhead, feeds the MXU).
    if band_rows is None:
        band_rows = max(1, min(OH, 1024 // max(OW, 1)))
    band_rows = max(1, min(band_rows, OH))
    num_bands = -(-OH // band_rows)                 # ceil-div; last band shifts up
    dup_rows = num_bands * band_rows - OH           # rows recomputed by the last band
    band_m = band_rows * OW
    rows_in = (band_rows - 1) * stride + KH         # padded-input rows per band (halo)

    # Preprocess: NCHW -> NHWC, bf16 (half the input DMA bytes), spatial zero-pad,
    # then overlapping halo bands (N, num_bands, rows_in, Wp, C) so each grid step
    # only fetches the rows it needs.
    # TODO(synk): accept NHWC/bf16 input and fold the zero-pad into the kernel
    # (masked border loads) to collapse these wrapper-side HBM passes.
    xp = jnp.transpose(x, (0, 2, 3, 1)).astype(jnp.bfloat16)
    xp = jnp.pad(xp, ((0, 0), (padding, padding), (padding, padding), (0, 0)))
    starts = [min(b * band_rows, OH - band_rows) for b in range(num_bands)]
    xb = jnp.stack([xp[:, s * stride:s * stride + rows_in] for s in starts], axis=1)

    # OIHW -> (KH*KW*C, OCp): single fused-contraction weight matrix, OC padded to
    # 128 lanes (lane-dense matmul / unmasked stores).
    # TODO(synk): on v6e/v7x with OC > 128, tile OCp in 256-wide blocks (extra grid
    # axis) to feed both halves of the 256x256 MXU.
    w2 = jnp.transpose(weight, (2, 3, 1, 0)).reshape(KC, OC)
    w2 = jnp.pad(w2, ((0, 0), (0, OCp - OC))).astype(jnp.bfloat16)

    g2 = jnp.pad(gamma.astype(jnp.float32), (0, OCp - OC)).reshape(1, OCp)
    b2 = jnp.pad(beta.astype(jnp.float32), (0, OCp - OC)).reshape(1, OCp)

    chunk_rows = min(M, 512)

    # Generation-aware VMEM budget (the conv output stays VMEM-resident until the
    # epilogue).
    try:
        vmem_cap = pltpu.get_tpu_info().vmem_capacity_bytes
    except Exception:  # pragma: no cover - conservative fallback
        vmem_cap = 64 * 1024 * 1024
    vmem_budget = int(0.65 * vmem_cap)

    resident_bytes = (
        M * OCp * 4                      # resident f32 conv output (revisited block)
        + 2 * rows_in * Wp * C * 2       # double-buffered bf16 halo band
        + 2 * KC * OCp * 2               # double-buffered bf16 weights
        + 2 * 2 * OCp * 4                # double-buffered gamma / beta
        + OCp * 4                        # column-sum scratch
        + band_m * max(KC, 128) * 2      # im2col slab (lane-padded) per band
        + band_m * OCp * 4               # f32 matmul result before its single store
        + 2 * chunk_rows * OCp * 4)      # epilogue chunk temporaries
    # TODO(synk): for conv outputs exceeding the budget, fall back to a two-pass grid
    # (conv + per-block partial sum/sum-sq with the band axis marked "parallel" so the
    # second v7x TensorCore helps, then a tiny BN+LeakyReLU kernel) instead of asserting.
    assert resident_bytes <= vmem_budget, (resident_bytes, vmem_budget)

    kernel = partial(_fused_conv_bn_lrelu_kernel, kh=KH, kw=KW, stride=stride,
                     oh=OH, ow=OW, band_rows=band_rows, dup_rows=dup_rows,
                     eps=eps, slope=slope, chunk_rows=chunk_rows)

    out = pl.pallas_call(
        kernel,
        out_shape=jax.ShapeDtypeStruct((M, OCp), jnp.float32),
        grid_spec=pltpu.PrefetchScalarGridSpec(
            num_scalar_prefetch=0,
            grid=(N, num_bands),
            in_specs=[
                # Per-band halo block of the padded input (one prefetch per step).
                pl.BlockSpec((None, None, rows_in, Wp, C),
                             lambda n, b: (n, b, 0, 0, 0)),
                # TODO(synk): pipeline_mode=pl.Buffered(1) on these loop-invariant
                # operands would drop their second VMEM buffer.
                pl.BlockSpec((KC, OCp), lambda n, b: (0, 0)),
                pl.BlockSpec((1, OCp), lambda n, b: (0, 0)),
                pl.BlockSpec((1, OCp), lambda n, b: (0, 0)),
            ],
            out_specs=pl.BlockSpec((M, OCp), lambda n, b: (0, 0)),
            scratch_shapes=[pltpu.VMEM((1, OCp), jnp.float32)]),
        # Output is revisited (VMEM-resident) across both grid axes -> "arbitrary".
        # TODO(synk): shard OCp across v7x's 2 TensorCores when OC >= 256 (per-channel
        # BN stats need no cross-core reduction).
        compiler_params=pltpu.CompilerParams(
            dimension_semantics=("arbitrary", "arbitrary"),
            vmem_limit_bytes=vmem_budget),
    )(xb, w2, g2, b2)

    # TODO(synk): emit bf16 / NHWC directly when the consumer allows it (halves the
    # HBM write-back and removes this transpose); kept f32 NCHW to match the module.
    y = out[:, :OC].reshape(N, OH, OW, OC)
    return jnp.transpose(y, (0, 3, 1, 2))


# ----------------------------- Pure-JAX reference --------------------------- #

def reference(x, weight, bias, gamma, beta, *, stride, padding, eps=1e-5, slope=0.01):
    out = jax.lax.conv_general_dilated(
        x, weight, window_strides=(stride, stride),
        padding=[(padding, padding), (padding, padding)],
        dimension_numbers=("NCHW", "OIHW", "NCHW"))
    out = out + bias.reshape(1, -1, 1, 1)
    mean = out.mean(axis=(0, 2, 3), keepdims=True)
    var = ((out - mean) ** 2).mean(axis=(0, 2, 3), keepdims=True)  # biased, like BN training
    xhat = (out - mean) * jax.lax.rsqrt(var + eps)
    y = xhat * gamma.reshape(1, -1, 1, 1) + beta.reshape(1, -1, 1, 1)
    return jnp.where(y >= 0, y, slope * y)


# ----------------------------------- main ------------------------------------ #

if __name__ == "__main__":
    # ConvBN(in_channels=4, out_channels=8, kernel_size=3, stride=1, padding=1)
    N, C, H, W = 2, 4, 16, 16
    OC, KH, KW = 8, 3, 3
    stride, padding = 1, 1

    key = jax.random.PRNGKey(0)
    kx, kw_, kb = jax.random.split(key, 3)

    x = jax.random.normal(kx, (N, C, H, W), dtype=jnp.float32)
    fan_in = C * KH * KW
    weight = jax.random.uniform(kw_, (OC, C, KH, KW), dtype=jnp.float32,
                                minval=-1.0, maxval=1.0) / jnp.sqrt(fan_in)
    bias = jax.random.uniform(kb, (OC,), dtype=jnp.float32,
                              minval=-1.0, maxval=1.0) / jnp.sqrt(fan_in)
    gamma = jnp.ones((OC,), dtype=jnp.float32)   # PyTorch BatchNorm2d default init
    beta = jnp.zeros((OC,), dtype=jnp.float32)

    out = conv_bn_lrelu(x, weight, bias, gamma, beta, stride=stride, padding=padding)
    out = jax.block_until_ready(out)
    assert out.shape == (N, OC, H, W), out.shape

    # Tight check: reference computed from the same bf16-quantized conv operands
    # (kernel multiplies bf16 operands with f32 accumulation on the MXU).
    xq = x.astype(jnp.bfloat16).astype(jnp.float32)
    wq = weight.astype(jnp.bfloat16).astype(jnp.float32)
    ref_q = reference(xq, wq, bias, gamma, beta, stride=stride, padding=padding)
    assert jnp.allclose(out, ref_q, rtol=1e-3, atol=1e-3), \
        float(jnp.max(jnp.abs(out - ref_q)))

    # Loose check: full-f32 reference (tolerance reflects bf16 MXU operands).
    ref = reference(x, weight, bias, gamma, beta, stride=stride, padding=padding)
    assert jnp.allclose(out, ref, rtol=5e-2, atol=5e-2), \
        float(jnp.max(jnp.abs(out - ref)))

    print("KERNEL_OK")
</pallas_src>

<mosaic_0001>
module attributes {stable_mosaic.version = 11 : i64} {
  func.func @_fused_conv_bn_lrelu_kernel(%arg0: i32, %arg1: i32, %arg2: memref<1x1x18x18x4xbf16, #tpu.memory_space<vmem>>, %arg3: memref<36x128xbf16, #tpu.memory_space<vmem>>, %arg4: memref<1x128xf32, #tpu.memory_space<vmem>>, %arg5: memref<1x128xf32, #tpu.memory_space<vmem>>, %arg6: memref<512x128xf32, #tpu.memory_space<vmem>>, %arg7: memref<1x128xf32, #tpu.memory_space<vmem>>) attributes {dimension_semantics = [#tpu.dimension_semantics<arbitrary>, #tpu.dimension_semantics<arbitrary>], iteration_bounds = array<i64: 2, 1>, scalar_prefetch = 0 : i64, scratch_operands = 1 : i64, tpu.core_type = #tpu.core_type<tc>, window_params = [{transform_indices = @transform_0, window_bounds = array<i64: 1, 1, 18, 18, 4>}, {pipeline_mode = #tpu.pipeline_mode<synchronous>, transform_indices = @transform_1, window_bounds = array<i64: 36, 128>}, {pipeline_mode = #tpu.pipeline_mode<synchronous>, transform_indices = @transform_2, window_bounds = array<i64: 1, 128>}, {pipeline_mode = #tpu.pipeline_mode<synchronous>, transform_indices = @transform_3, window_bounds = array<i64: 1, 128>}, {pipeline_mode = #tpu.pipeline_mode<synchronous>, transform_indices = @transform_4, window_bounds = array<i64: 512, 128>}]} {
    %c0_i32 = arith.constant 0 : i32
    %0 = arith.cmpi eq, %arg0, %c0_i32 : i32
    %c0_i32_0 = arith.constant 0 : i32
    %1 = arith.cmpi eq, %arg1, %c0_i32_0 : i32
    %2 = arith.andi %0, %1 : i1
    %3 = arith.extui %2 : i1 to i32
    %c0_i32_1 = arith.constant 0 : i32
    %4 = arith.cmpi ne, %3, %c0_i32_1 : i32
    scf.if %4 {
      %cst_18 = arith.constant 0.000000e+00 : f32
      %46 = vector.broadcast %cst_18 : f32 to vector<1x128xf32>
      %c0_19 = arith.constant 0 : index
      %c0_20 = arith.constant 0 : index
      %47 = vector.load %arg7[%c0_19, %c0_20] : memref<1x128xf32, #tpu.memory_space<vmem>>, vector<1x128xf32>
      tpu.vector_store %arg7[%c0_19, %c0_20], %46 {strides = array<i32>} : memref<1x128xf32, #tpu.memory_space<vmem>>, vector<1x128xf32>,
    } else {
    }
    %c0 = arith.constant 0 : index
    %c0_2 = arith.constant 0 : index
    %c0_3 = arith.constant 0 : index
    %c0_4 = arith.constant 0 : index
    %c0_5 = arith.constant 0 : index
    %5 = vector.load %arg2[%c0, %c0_2, %c0_3, %c0_4, %c0_5] : memref<1x1x18x18x4xbf16, #tpu.memory_space<vmem>>, vector<1x1x18x18x4xbf16>
    %6 = vector.shape_cast %5 : vector<1x1x18x18x4xbf16> to vector<18x18x4xbf16>
    %7 = vector.extract_strided_slice %6 {offsets = [0, 0, 0], sizes = [16, 16, 4], strides = [1, 1, 1]} : vector<18x18x4xbf16> to vector<16x16x4xbf16>
    %8 = vector.shape_cast %7 : vector<16x16x4xbf16> to vector<256x4xbf16>
    %9 = vector.extract_strided_slice %6 {offsets = [0, 1, 0], sizes = [16, 16, 4], strides = [1, 1, 1]} : vector<18x18x4xbf16> to vector<16x16x4xbf16>
    %10 = vector.shape_cast %9 : vector<16x16x4xbf16> to vector<256x4xbf16>
    %11 = vector.extract_strided_slice %6 {offsets = [0, 2, 0], sizes = [16, 16, 4], strides = [1, 1, 1]} : vector<18x18x4xbf16> to vector<16x16x4xbf16>
    %12 = vector.shape_cast %11 : vector<16x16x4xbf16> to vector<256x4xbf16>
    %13 = vector.extract_strided_slice %6 {offsets = [1, 0, 0], sizes = [16, 16, 4], strides = [1, 1, 1]} : vector<18x18x4xbf16> to vector<16x16x4xbf16>
    %14 = vector.shape_cast %13 : vector<16x16x4xbf16> to vector<256x4xbf16>
    %15 = vector.extract_strided_slice %6 {offsets = [1, 1, 0], sizes = [16, 16, 4], strides = [1, 1, 1]} : vector<18x18x4xbf16> to vector<16x16x4xbf16>
    %16 = vector.shape_cast %15 : vector<16x16x4xbf16> to vector<256x4xbf16>
    %17 = vector.extract_strided_slice %6 {offsets = [1, 2, 0], sizes = [16, 16, 4], strides = [1, 1, 1]} : vector<18x18x4xbf16> to vector<16x16x4xbf16>
    %18 = vector.shape_cast %17 : vector<16x16x4xbf16> to vector<256x4xbf16>
    %19 = vector.extract_strided_slice %6 {offsets = [2, 0, 0], sizes = [16, 16, 4], strides = [1, 1, 1]} : vector<18x18x4xbf16> to vector<16x16x4xbf16>
    %20 = vector.shape_cast %19 : vector<16x16x4xbf16> to vector<256x4xbf16>
    %21 = vector.extract_strided_slice %6 {offsets = [2, 1, 0], sizes = [16, 16, 4], strides = [1, 1, 1]} : vector<18x18x4xbf16> to vector<16x16x4xbf16>
    %22 = vector.shape_cast %21 : vector<16x16x4xbf16> to vector<256x4xbf16>
    %23 = vector.extract_strided_slice %6 {offsets = [2, 2, 0], sizes = [16, 16, 4], strides = [1, 1, 1]} : vector<18x18x4xbf16> to vector<16x16x4xbf16>
    %24 = vector.shape_cast %23 : vector<16x16x4xbf16> to vector<256x4xbf16>
    %25 = tpu.concatenate %8, %10, %12, %14, %16, %18, %20, %22, %24 in 1 : vector<256x4xbf16>, vector<256x4xbf16>, vector<256x4xbf16>, vector<256x4xbf16>, vector<256x4xbf16>, vector<256x4xbf16>, vector<256x4xbf16>, vector<256x4xbf16>, vector<256x4xbf16> -> vector<256x36xbf16>
    %c0_6 = arith.constant 0 : index
    %c0_7 = arith.constant 0 : index
    %26 = vector.load %arg3[%c0_6, %c0_7] : memref<36x128xbf16, #tpu.memory_space<vmem>>, vector<36x128xbf16>
    %cst = arith.constant dense<0.000000e+00> : vector<256x128xf32>
    %27 = tpu.matmul %25, %26, %cst {dimension_numbers = #tpu.dot_dimension_numbers<[1], [0], [0], [1], [0, 0, 1, 1], [], []>} : vector<256x36xbf16>, vector<36x128xbf16>, vector<256x128xf32> -> vector<256x128xf32>
    %c16_i32 = arith.constant 16 : i32
    %28 = arith.muli %arg1, %c16_i32 : i32
    %c0_i32_8 = arith.constant 0 : i32
    %29 = arith.minsi %28, %c0_i32_8 : i32
    %c256_i32 = arith.constant 256 : i32
    %30 = arith.muli %arg0, %c256_i32 : i32
    %c16_i32_9 = arith.constant 16 : i32
    %31 = arith.muli %29, %c16_i32_9 : i32
    %32 = arith.addi %30, %31 : i32
    %33 = tpu.assume_multiple %32, 256 : i32
    %34 = arith.index_cast %33 : i32 to index
    %c0_10 = arith.constant 0 : index
    %35 = vector.load %arg6[%34, %c0_10] : memref<512x128xf32, #tpu.memory_space<vmem>>, vector<256x128xf32>
    tpu.vector_store %arg6[%34, %c0_10], %27 {strides = array<i32>} : memref<512x128xf32, #tpu.memory_space<vmem>>, vector<256x128xf32>,
    %c0_11 = arith.constant 0 : index
    %c0_12 = arith.constant 0 : index
    %36 = vector.load %arg7[%c0_11, %c0_12] : memref<1x128xf32, #tpu.memory_space<vmem>>, vector<1x128xf32>
    %cst_13 = arith.constant dense<0.000000e+00> : vector<128xf32>
    %37 = vector.multi_reduction <add>, %27, %cst_13 [0] : vector<256x128xf32> to vector<128xf32>
    %38 = vector.shape_cast %37 : vector<128xf32> to vector<1x128xf32>
    %39 = arith.addf %36, %38 : vector<1x128xf32>
    %c0_14 = arith.constant 0 : index
    %c0_15 = arith.constant 0 : index
    %40 = vector.load %arg7[%c0_14, %c0_15] : memref<1x128xf32, #tpu.memory_space<vmem>>, vector<1x128xf32>
    tpu.vector_store %arg7[%c0_14, %c0_15], %39 {strides = array<i32>} : memref<1x128xf32, #tpu.memory_space<vmem>>, vector<1x128xf32>,
    %c1_i32 = arith.constant 1 : i32
    %41 = arith.cmpi eq, %arg0, %c1_i32 : i32
    %c0_i32_16 = arith.constant 0 : i32
    %42 = arith.cmpi eq, %arg1, %c0_i32_16 : i32
    %43 = arith.andi %41, %42 : i1
    %44 = arith.extui %43 : i1 to i32
    %c0_i32_17 = arith.constant 0 : i32
    %45 = arith.cmpi ne, %44, %c0_i32_17 : i32
    scf.if %45 {
      %c0_18 = arith.constant 0 : index
      %c0_19 = arith.constant 0 : index
      %46 = vector.load %arg7[%c0_18, %c0_19] : memref<1x128xf32, #tpu.memory_space<vmem>>, vector<1x128xf32>
      %cst_20 = arith.constant 0.001953125 : f32
      %47 = vector.broadcast %cst_20 : f32 to vector<1x128xf32>
      %48 = arith.mulf %46, %47 : vector<1x128xf32>
      %cst_21 = arith.constant 0.000000e+00 : f32
      %49 = vector.broadcast %cst_21 : f32 to vector<1x128xf32>
      %c0_i32_22 = arith.constant 0 : i32
      %c512_i32 = arith.constant 512 : i32
      %50 = arith.muli %c0_i32_22, %c512_i32 : i32
      %51 = tpu.assume_multiple %50, 8 : i32
      %52 = arith.index_cast %51 : i32 to index
      %c0_23 = arith.constant 0 : index
      %53 = vector.load %arg6[%52, %c0_23] : memref<512x128xf32, #tpu.memory_space<vmem>>, vector<512x128xf32>
      %54 = vector.broadcast %48 : vector<1x128xf32> to vector<512x128xf32>
      %55 = arith.subf %53, %54 : vector<512x128xf32>
      %56 = arith.mulf %55, %55 : vector<512x128xf32>
      %cst_24 = arith.constant dense<0.000000e+00> : vector<128xf32>
      %57 = vector.multi_reduction <add>, %56, %cst_24 [0] : vector<512x128xf32> to vector<128xf32>
      %58 = vector.shape_cast %57 : vector<128xf32> to vector<1x128xf32>
      %59 = arith.addf %49, %58 : vector<1x128xf32>
      %c1_i32_25 = arith.constant 1 : i32
      %cst_26 = arith.constant 0.001953125 : f32
      %60 = vector.broadcast %cst_26 : f32 to vector<1x128xf32>
      %61 = arith.mulf %59, %60 : vector<1x128xf32>
      %c0_27 = arith.constant 0 : index
      %c0_28 = arith.constant 0 : index
      %62 = vector.load %arg4[%c0_27, %c0_28] : memref<1x128xf32, #tpu.memory_space<vmem>>, vector<1x128xf32>
      %cst_29 = arith.constant 9.99999974E-6 : f32
      %63 = vector.broadcast %cst_29 : f32 to vector<1x128xf32>
      %64 = arith.addf %61, %63 : vector<1x128xf32>
      %65 = math.rsqrt %64 : vector<1x128xf32>
      %66 = arith.mulf %62, %65 : vector<1x128xf32>
      %c0_30 = arith.constant 0 : index
      %c0_31 = arith.constant 0 : index
      %67 = vector.load %arg5[%c0_30, %c0_31] : memref<1x128xf32, #tpu.memory_space<vmem>>, vector<1x128xf32>
      %68 = arith.mulf %48, %66 : vector<1x128xf32>
      %69 = arith.subf %67, %68 : vector<1x128xf32>
      %c0_i32_32 = arith.constant 0 : i32
      %c512_i32_33 = arith.constant 512 : i32
      %70 = arith.muli %c0_i32_32, %c512_i32_33 : i32
      %71 = tpu.assume_multiple %70, 8 : i32
      %72 = arith.index_cast %71 : i32 to index
      %c0_34 = arith.constant 0 : index
      %73 = vector.load %arg6[%72, %c0_34] : memref<512x128xf32, #tpu.memory_space<vmem>>, vector<512x128xf32>
      %74 = vector.broadcast %66 : vector<1x128xf32> to vector<512x128xf32>
      %75 = arith.mulf %73, %74 : vector<512x128xf32>
      %76 = vector.broadcast %69 : vector<1x128xf32> to vector<512x128xf32>
      %77 = arith.addf %75, %76 : vector<512x128xf32>
      %cst_35 = arith.constant 0.000000e+00 : f32
      %78 = vector.broadcast %cst_35 : f32 to vector<512x128xf32>
      %79 = arith.cmpf oge, %77, %78 : vector<512x128xf32>
      %cst_36 = arith.constant 0.00999999977 : f32
      %80 = vector.broadcast %cst_36 : f32 to vector<512x128xf32>
      %81 = arith.mulf %80, %77 : vector<512x128xf32>
      %82 = arith.select %79, %77, %81 : vector<512x128xi1>, vector<512x128xf32>
      %83 = arith.index_cast %71 : i32 to index
      %c0_37 = arith.constant 0 : index
      %84 = vector.load %arg6[%83, %c0_37] : memref<512x128xf32, #tpu.memory_space<vmem>>, vector<512x128xf32>
      tpu.vector_store %arg6[%83, %c0_37], %82 {strides = array<i32>} : memref<512x128xf32, #tpu.memory_space<vmem>>, vector<512x128xf32>,
      %c1_i32_38 = arith.constant 1 : i32
    } else {
    }
    return
  }
  func.func @transform_0(%arg0: i32, %arg1: i32) -> (i32, i32, i32, i32, i32) {
    %c0_i32 = arith.constant 0 : i32
    %c0_i32_0 = arith.constant 0 : i32
    %c0_i32_1 = arith.constant 0 : i32
    %c0_i32_2 = arith.constant 0 : i32
    return %arg0, %arg1, %c0_i32, %c0_i32_0, %c0_i32_1 : i32, i32, i32, i32, i32
  }
  func.func @transform_1(%arg0: i32, %arg1: i32) -> (i32, i32) {
    %c0_i32 = arith.constant 0 : i32
    %c0_i32_0 = arith.constant 0 : i32
    %c0_i32_1 = arith.constant 0 : i32
    return %c0_i32, %c0_i32_0 : i32, i32
  }
  func.func @transform_2(%arg0: i32, %arg1: i32) -> (i32, i32) {
    %c0_i32 = arith.constant 0 : i32
    %c0_i32_0 = arith.constant 0 : i32
    %c0_i32_1 = arith.constant 0 : i32
    return %c0_i32, %c0_i32_0 : i32, i32
  }
  func.func @transform_3(%arg0: i32, %arg1: i32) -> (i32, i32) {
    %c0_i32 = arith.constant 0 : i32
    %c0_i32_0 = arith.constant 0 : i32
    %c0_i32_1 = arith.constant 0 : i32
    return %c0_i32, %c0_i32_0 : i32, i32
  }
  func.func @transform_4(%arg0: i32, %arg1: i32) -> (i32, i32) {
    %c0_i32 = arith.constant 0 : i32
    %c0_i32_0 = arith.constant 0 : i32
    %c0_i32_1 = arith.constant 0 : i32
    return %c0_i32, %c0_i32_0 : i32, i32
  }
}

</mosaic_0001>

<bundles_post_ra>
// kernel: tpu_custom_call.1
= control target key start
LH: loop header
LB: loop body
LE: loop exit
PB: predicated region body
PF: predicated region fallthrough
CT: control target
= control target key end

     0   :  { %9 = vsyncpa [#allocation4], 0  ;;  %s2857_s15 = smov 0   ;;  %s2859_s16 = smov 0   ;;  %s4462_s0 = inlined_call_operand.vmem [shape: bf16[2,1,18,18,4], index: 0, kind: input, shape index: {}]   ;;  %s4463_s1 = inlined_call_operand.vmem [shape: bf16[36,128], index: 1, kind: input, shape index: {}]   ;;  %s4464_s2 = inlined_call_operand.vmem [shape: f32[1,128], index: 2, kind: input, shape index: {}]   ;;  %s4465_s3 = inlined_call_operand.vmem [shape: f32[1,128], index: 3, kind: input, shape index: {}]   ;;  %s4466_s4 = inlined_call_operand.hbm [shape: f32[512,128], index: 4, kind: output, shape index: {}]  }
   0x1   :  { %s2861_s17 = smov 0  }
   0x2 LB: > { %s2564_s18 = sadd.s32 4294967295, %s2819_s17   ;;  %s27_s19 = sadd.s32 1, %s2815_s16  ;;  %s2819_s17 = sphi %s2861_s17, %s15_s17   ;;  %s2815_s16 = sphi %s2859_s16, %s4608_s16   ;;  %s2811_s15 = sphi %s2857_s15, %s4607_s15  }
   0x3   : > { %p29_p0 = scmp.ge.s32.totalorder %s27_s19, 2  ;;  %p2567_p1 = scmp.ge.s32.totalorder %s2819_s17, 1 }
   0x4   : > { %p176_p2 = scmp.lt.s32.totalorder %s2819_s17, 3 }
   0x5   : > { %s4610_s19 = smov (%p29_p0, %s27_s19), 0 }
   0x6   : > { %p177_p3 = pnand %p2567_p1, %p176_p2 }
   0x8   : > { %180 = sbr.rel (%p177_p3) target bundleno = 953 (0x3b9), region = 36 }
   0xd   : > { %p201_p4 = scmp.lt.s32.totalorder %s2811_s15, 1  ;;  %p211_p5 = scmp.eq.s32.totalorder %s2811_s15, 0 }
   0xe   : > { %v2821_v0 = vmov (%p211_p5), 0.0  }
   0xf   : > { %s202_s20 = scalar_select %p201_p4, %s2811_s15, 1  ;;  %217 = vst [vmem:[#allocation2] sm:$0x1] (%p211_p5), %v2821_v0 }
  0x10   : > { %216 = sbr.rel (!%p211_p5) target bundleno = 21 (0x15), region = 40 }
  0x11   : > { %s2721_s21 = smul.u32 216, %s202_s20 }
  0x13   : > { %s2884_s24 = scalar_lea.vmem %s4462_s0, %s2721_s21 }
  0x15 PF: > { %v2887_v1 = vld [vmem:[%s2884_s24 + $0x30] sm:$0xf]  ;;  %v2890_v2 = vld [vmem:[%s2884_s24 + $0x34] sm:$0xf]  ;;  %v2893_v3 = vld [vmem:[%s2884_s24 + $0x38] sm:$0x1] }
  0x16   : > { %vm272_vm0 = vsmask.f32 3328  ;;  %vm273_vm1 = vsmask.f32 7440  ;;  %v372_v4 = vshrl.u32 %v2887_v1, 16  ;;  %v375_v5 = vshll.u32 %v2887_v1, 16 }
  0x17   : > { %v381_v6 = vshll.u32 %v2890_v2, 16  ;;  %v385_v7 = vshrl.u32 %v2890_v2, 16  ;;  %v391_v8 = vshll.u32 %v2893_v3, 16  ;;  %v2901_v9 = vld [vmem:[%s2884_s24 + $0x18] sm:$0xf]  ;;  %vm2918_vm2 = vmor %vm272_vm0, %vm273_vm1  ;;  %s2822_s25 = smov 4  }
  0x18   : > { %v374_v10 = vrot.slane %v372_v4, 4  ;;  %v377_v11 = vrot.slane %v375_v5, 5  ;;  %v2904_v12 = vld [vmem:[%s2884_s24 + $0x1c] sm:$0xf]  ;;  %v2907_v13 = vld [vmem:[%s2884_s24 + $0x20] sm:$0x1] }
  0x19   : > { %v383_v14 = vrot.slane %v381_v6, 5  ;;  %v387_v15 = vrot.slane %v385_v7, 4  ;;  %v393_v16 = vrot.slane %v391_v8, 5  ;;  %v324_v17 = vshrl.u32 %v2901_v9, 16  ;;  %v2911_v18 = vld [vmem:[%s2884_s24] sm:$0xf] }
  0x1a   : > { %v378_v19 = vor.u32 %v377_v11, %v374_v10  ;;  %v327_v20 = vshll.u32 %v2901_v9, 16  ;;  %v333_v21 = vshll.u32 %v2904_v12, 16  ;;  %v337_v22 = vshrl.u32 %v2904_v12, 16  ;;  %v2924_v27 = vld [vmem:[%s2884_s24 + $0x4] sm:$0xf]  ;;  %s2823_s26 = smov 8  }
  0x1b   : > { %v388_v24 = vor.u32 %v387_v15, %v383_v14  ;;  %v326_v25 = vrot.slane %v324_v17, 4  ;;  %v343_v26 = vshll.u32 %v2907_v13, 16  ;;  %v276_v28 = vshrl.u32 %v2911_v18, 16  ;;  %v2931_v40 = vld [vmem:[%s2884_s24 + $0x8] sm:$0x1]  ;;  %s2824_s27 = smov 16  }
  0x1c   : > { %v379_v29 = vrot.slane %v378_v19, 4  ;;  %v329_v30 = vrot.slane %v327_v20, 5  ;;  %v335_v31 = vrot.slane %v333_v21, 5  ;;  %v339_v32 = vrot.slane %v337_v22, 4  ;;  %v2935_v42 = vld [vmem:[%s2884_s24 + $0x3c] sm:$0xf] }
  0x1d   : > { %v389_v33 = vrot.slane %v388_v24, 4  ;;  %v345_v34 = vrot.slane %v343_v26, 5  ;;  %v278_v35 = vrot.slane %v276_v28, 4  ;;  %v279_v36 = vshll.u32 %v2911_v18, 16  ;;  %v2942_v54 = vld [vmem:[%s2884_s24 + $0x40] sm:$0xf] }
  0x1e   : > { %v384_v37 = vsel %vm2918_vm2, %v379_v29, %v383_v14  ;;  %v330_v38 = vor.u32 %v329_v30, %v326_v25  ;;  %v340_v39 = vor.u32 %v339_v32, %v335_v31  ;;  %v285_v41 = vshll.u32 %v2924_v27, 16  ;;  %v2953_v0 = vld [vmem:[%s2884_s24 + $0x44] sm:$0x1]  ;;  %v2975_v25 = vld [vmem:[%s2884_s24 + $0x2c] sm:$0x1]  ;;  %s2825_s28 = smov 12  }
  0x1f   : > { %v394_v43 = vsel %vm2918_vm2, %v389_v33, %v393_v16  ;;  %v946_v44 = vunpack.c.l.b16 %v384_v37  ;;  %v281_v45 = vrot.slane %v279_v36, 5  ;;  %v289_v46 = vshrl.u32 %v2924_v27, 16  ;;  %v2959_v8 = vld [vmem:[%s2884_s24 + $0x24] sm:$0xf]  ;;  %v2967_v16 = vld [vmem:[%s2884_s24 + $0x28] sm:$0xf] }
  0x20   : > { %v947_v47 = vunpack.c.l.b16 %v394_v43  ;;  %v331_v48 = vrot.slane %v330_v38, 4  ;;  %v341_v49 = vrot.slane %v340_v39, 4  ;;  %v287_v50 = vrot.slane %v285_v41, 5  ;;  %v2981_v33 = vld [vmem:[%s2884_s24 + $0xc] sm:$0xf]  ;;  %s2826_s29 = smov 28  }
  0x21   : > { %v282_v51 = vor.u32 %v281_v45, %v278_v35  ;;  %v291_v52 = vrot.slane %v289_v46, 4  ;;  %v295_v53 = vshll.u32 %v2931_v40, 16  ;;  %v396_v55 = vshrl.u32 %v2935_v42, 16  ;;  %v2985_v38 = vld [vmem:[%s2884_s24 + $0x10] sm:$0xf]  ;;  %s2827_s30 = smov 24  }
  0x22   : > { %v2945_v56 = vpack.c.b16 %v947_v47, %v946_v44  ;;  %v336_v57 = vsel %vm2918_vm2, %v331_v48, %v335_v31  ;;  %v346_v58 = vsel %vm2918_vm2, %v341_v49, %v345_v34  ;;  %v399_v59 = vshll.u32 %v2935_v42, 16  ;;  %s2828_s5 = smov 20   ;;  %s2829_s6 = smov 32  }
  0x23   : > { %v942_v60 = vunpack.c.l.b16 %v336_v57  ;;  %v943_v61 = vunpack.c.l.b16 %v346_v58  ;;  %v283_v62 = vrot.slane %v282_v51, 4  ;;  %v292_v63 = vor.u32 %v291_v52, %v287_v50  ;;  %s2684_s13 = sshll.u32 %s2811_s15, 8  ;;  %p1813_p6 = scmp.eq.s32.totalorder %s2811_s15, 1 }
  0x24   : > { %4521 = vst [vmem:[#allocation6_spill] sm:$0xff] %v2945_v56  ;;  %994 = vrot.lane.b32.xlu2 %v2945_v56, %s2822_s25  ;;  %v297_v4 = vrot.slane %v295_v53, 5  ;;  %v398_v5 = vrot.slane %v396_v55, 4  ;;  %v401_v6 = vrot.slane %v399_v59, 5  ;;  %v405_v7 = vshll.u32 %v2942_v54, 16  ;;  %s3861_s14 = scalar_lea.vmem [#allocation3], %s2684_s13 }
  0x25   : > { %v2961_v10 = vpack.c.b16 %v943_v61, %v942_v60  ;;  %v288_v11 = vsel %vm2918_vm2, %v283_v62, %v287_v50  ;;  %v293_v14 = vrot.slane %v292_v63, 4  ;;  %v409_v15 = vshrl.u32 %v2942_v54, 16  ;;  %v2992_v50 = vld [vmem:[%s2884_s24 + $0x14] sm:$0x1]  ;;  %v3001_v60 = vld [vmem:[%s2884_s24 + $0x60] sm:$0xf] }
  0x26   : > { %v938_v17 = vunpack.c.l.b16 %v288_v11  ;;  %v402_v19 = vor.u32 %v401_v6, %v398_v5  ;;  %v407_v20 = vrot.slane %v405_v7, 5  ;;  %v415_v21 = vshll.u32 %v2953_v0, 16 }
  0x27   : > { %4522 = vst [vmem:[#allocation7_spill] sm:$0xff] %v2961_v10  ;;  %990 = vrot.lane.b32.xlu1 %v2961_v10, %s2822_s25  ;;  %v298_v22 = vsel %vm2918_vm2, %v293_v14, %v297_v4  ;;  %v411_v24 = vrot.slane %v409_v15, 4  ;;  %v348_v26 = vshrl.u32 %v2959_v8, 16  ;;  %v351_v28 = vshll.u32 %v2959_v8, 16  ;;  %v3007_v14 = vld [vmem:[%s2884_s24 + $0x64] sm:$0xf] }
  0x28   : > { %v939_v29 = vunpack.c.l.b16 %v298_v22  ;;  %v403_v30 = vrot.slane %v402_v19, 4  ;;  %v417_v31 = vrot.slane %v415_v21, 5  ;;  %v357_v32 = vshll.u32 %v2967_v16, 16  ;;  %v3170_v10 = vld [vmem:[%s2884_s24 + $0xa4] sm:$0x1] }
  0x29   : > { %v412_v34 = vor.u32 %v411_v24, %v407_v20  ;;  %v350_v35 = vrot.slane %v348_v26, 4  ;;  %v353_v36 = vrot.slane %v351_v28, 5  ;;  %v361_v37 = vshrl.u32 %v2967_v16, 16 }
  0x2a   : > { %v970_v39 = vpack.c.b16 %v939_v29, %v938_v17  ;;  %v408_v41 = vsel %vm2918_vm2, %v403_v30, %v407_v20  ;;  %v359_v43 = vrot.slane %v357_v32, 5  ;;  %v367_v44 = vshll.u32 %v2975_v25, 16  ;;  %v3012_v20 = vld [vmem:[%s2884_s24 + $0x68] sm:$0x1]  ;;  %v3019_v29 = vld [vmem:[%s2884_s24 + $0x54] sm:$0xf] }
  0x2b   : > { %v413_v45 = vrot.slane %v412_v34, 4  ;;  %v948_v46 = vunpack.c.l.b16 %v408_v41  ;;  %v354_v47 = vor.u32 %v353_v36, %v350_v35  ;;  %v363_v48 = vrot.slane %v361_v37, 4 }
  0x2c   : > { %986 = vrot.lane.b32.xlu0 %v970_v39, %s2822_s25  ;;  %v369_v49 = vrot.slane %v367_v44, 5  ;;  %v300_v51 = vshrl.u32 %v2981_v33, 16  ;;  %v303_v52 = vshll.u32 %v2981_v33, 16  ;;  %v309_v53 = vshll.u32 %v2985_v38, 16 }
  0x2d   : > { %v418_v55 = vsel %vm2918_vm2, %v413_v45, %v417_v31  ;;  %v355_v57 = vrot.slane %v354_v47, 4  ;;  %v364_v58 = vor.u32 %v363_v48, %v359_v43  ;;  %v313_v59 = vshrl.u32 %v2985_v38, 16  ;;  %v3031_v45 = vld [vmem:[%s2884_s24 + $0x58] sm:$0xf] }
  0x2e   : > { %v949_v61 = vunpack.c.l.b16 %v418_v55  ;;  %v302_v62 = vrot.slane %v300_v51, 4  ;;  %v305_v63 = vrot.slane %v303_v52, 5  ;;  %v311_v4 = vrot.slane %v309_v53, 5  ;;  %v3037_v52 = vld [vmem:[%s2884_s24 + $0x5c] sm:$0x1] }
  0x2f   : > { %v360_v5 = vsel %vm2918_vm2, %v355_v57, %v359_v43  ;;  %v365_v6 = vrot.slane %v364_v58, 4  ;;  %v315_v7 = vrot.slane %v313_v59, 4  ;;  %v319_v11 = vshll.u32 %v2992_v50, 16  ;;  %v3040_v53 = vld [vmem:[%s2884_s24 + $0x48] sm:$0xf] }
  0x30   : > { %v3009_v15 = vpack.c.b16 %v949_v61, %v948_v46  ;;  %v944_v17 = vunpack.c.l.b16 %v360_v5  ;;  %v306_v19 = vor.u32 %v305_v63, %v302_v62  ;;  %v468_v21 = vshrl.u32 %v3001_v60, 16 }
  0x31   : > { %v370_v22 = vsel %vm2918_vm2, %v365_v6, %v369_v49  ;;  %v316_v24 = vor.u32 %v315_v7, %v311_v4  ;;  %v321_v26 = vrot.slane %v319_v11, 5  ;;  %v471_v28 = vshll.u32 %v3001_v60, 16  ;;  %v3051_v11 = vld [vmem:[%s2884_s24 + $0x4c] sm:$0xf] }
  0x32   : > { %4523 = vst [vmem:[#allocation8_spill] sm:$0xff] %v3009_v15  ;;  %996 = vrot.lane.b32.xlu2 %v3009_v15, %s2822_s25  ;;  %v945_v30 = vunpack.c.l.b16 %v370_v22  ;;  %v307_v31 = vrot.slane %v306_v19, 4  ;;  %v470_v32 = vrot.slane %v468_v21, 4  ;;  %v477_v34 = vshll.u32 %v3007_v14, 16 }
  0x33   : > { %v317_v35 = vrot.slane %v316_v24, 4  ;;  %v473_v36 = vrot.slane %v471_v28, 5  ;;  %v481_v37 = vshrl.u32 %v3007_v14, 16  ;;  %v487_v39 = vshll.u32 %v3012_v20, 16 }
  0x34   : > { %v3026_v41 = vpack.c.b16 %v945_v30, %v944_v17  ;;  %v312_v43 = vsel %vm2918_vm2, %v307_v31, %v311_v4  ;;  %v479_v44 = vrot.slane %v477_v34, 5  ;;  %v444_v46 = vshrl.u32 %v3019_v29, 16  ;;  %v3062_v34 = vld [vmem:[%s2884_s24 + $0x84] sm:$0xf] }
  0x35   : > { %v322_v47 = vsel %vm2918_vm2, %v317_v35, %v321_v26  ;;  %v940_v48 = vunpack.c.l.b16 %v312_v43  ;;  %v474_v49 = vor.u32 %v473_v36, %v470_v32  ;;  %v483_v51 = vrot.slane %v481_v37, 4  ;;  %v3057_v26 = vld [vmem:[%s2884_s24 + $0x50] sm:$0x1] }
  0x36   : > { %4524 = vst [vmem:[#allocation9_spill] sm:$0xff] %v3026_v41  ;;  %992 = vrot.lane.b32.xlu1 %v3026_v41, %s2822_s25  ;;  %v941_v55 = vunpack.c.l.b16 %v322_v47  ;;  %v489_v57 = vrot.slane %v487_v39, 5  ;;  %v446_v58 = vrot.slane %v444_v46, 4  ;;  %v447_v59 = vshll.u32 %v3019_v29, 16 }
  0x37   : > { %v475_v61 = vrot.slane %v474_v49, 4  ;;  %v484_v62 = vor.u32 %v483_v51, %v479_v44  ;;  %v453_v63 = vshll.u32 %v3031_v45, 16  ;;  %v457_v4 = vshrl.u32 %v3031_v45, 16 }
  0x38   : > { %v3047_v5 = vpack.c.b16 %v941_v55, %v940_v48  ;;  %v449_v6 = vrot.slane %v447_v59, 5  ;;  %v463_v7 = vshll.u32 %v3037_v52, 16  ;;  %v420_v17 = vshrl.u32 %v3040_v53, 16  ;;  %v3071_v55 = vld [vmem:[%s2884_s24 + $0x88] sm:$0xf] }
  0x39   : > { %v480_v19 = vsel %vm2918_vm2, %v475_v61, %v479_v44  ;;  %v485_v21 = vrot.slane %v484_v62, 4  ;;  %v455_v22 = vrot.slane %v453_v63, 5  ;;  %v459_v24 = vrot.slane %v457_v4, 4  ;;  %4526 = vst [vmem:[#allocation11_spill] sm:$0xff] %v3071_v55  ;;  %v3079_v63 = vld [vmem:[%s2884_s24 + $0x8c] sm:$0x1] }
  0x3a   : > { %4525 = vst [vmem:[#allocation10_spill] sm:$0xff] %v3047_v5  ;;  %988 = vrot.lane.b32.xlu0 %v3047_v5, %s2822_s25  ;;  %v954_v28 = vunpack.c.l.b16 %v480_v19  ;;  %v450_v30 = vor.u32 %v449_v6, %v446_v58  ;;  %v465_v31 = vrot.slane %v463_v7, 5  ;;  %v422_v32 = vrot.slane %v420_v17, 4  ;;  %v3082_v4 = vld [vmem:[%s2884_s24 + $0x78] sm:$0xf] }
  0x3b   : > { %v490_v35 = vsel %vm2918_vm2, %v485_v21, %v489_v57  ;;  %v460_v36 = vor.u32 %v459_v24, %v455_v22  ;;  %v423_v37 = vshll.u32 %v3040_v53, 16  ;;  %v429_v39 = vshll.u32 %v3051_v11, 16  ;;  %4528 = vst [vmem:[#allocation13_spill] sm:$0xff] %v3079_v63 }
  0x3c   : > { %v955_v43 = vunpack.c.l.b16 %v490_v35  ;;  %v451_v44 = vrot.slane %v450_v30, 4  ;;  %v433_v46 = vshrl.u32 %v3051_v11, 16  ;;  %v439_v47 = vshll.u32 %v3057_v26, 16 }
  0x3d   : > { %v461_v48 = vrot.slane %v460_v36, 4  ;;  %v425_v49 = vrot.slane %v423_v37, 5  ;;  %v431_v51 = vrot.slane %v429_v39, 5  ;;  %v540_v57 = vshrl.u32 %v3062_v34, 16 }
  0x3e   : > { %v3074_v58 = vpack.c.b16 %v955_v43, %v954_v28  ;;  %v456_v59 = vsel %vm2918_vm2, %v451_v44, %v455_v22  ;;  %v435_v61 = vrot.slane %v433_v46, 4  ;;  %v441_v62 = vrot.slane %v439_v47, 5  ;;  %v3099_v46 = vld [vmem:[%s2884_s24 + $0x80] sm:$0x1] }
  0x3f   : > { %v466_v6 = vsel %vm2918_vm2, %v461_v48, %v465_v31  ;;  %v952_v7 = vunpack.c.l.b16 %v456_v59  ;;  %v426_v17 = vor.u32 %v425_v49, %v422_v32  ;;  %v542_v19 = vrot.slane %v540_v57, 4  ;;  %v3093_v31 = vld [vmem:[%s2884_s24 + $0x7c] sm:$0xf]  ;;  %v3104_v59 = vld [vmem:[%s2884_s24 + $0x6c] sm:$0xf] }
  0x40   : > { %4527 = vst [vmem:[#allocation12_spill] sm:$0xff] %v3074_v58  ;;  %1002 = vrot.lane.b32.xlu2 %v3074_v58, %s2822_s25  ;;  %v953_v21 = vunpack.c.l.b16 %v466_v6  ;;  %v436_v24 = vor.u32 %v435_v61, %v431_v51  ;;  %v543_v22 = vshll.u32 %v3062_v34, 16  ;;  %v549_v28 = vshll.u32 %v3071_v55, 16  ;;  %v3123_v58 = vld [vmem:[%s2884_s24 + $0x74] sm:$0x1] }
  0x41   : > { %v427_v30 = vrot.slane %v426_v17, 4  ;;  %v553_v35 = vshrl.u32 %v3071_v55, 16  ;;  %v559_v36 = vshll.u32 %v3079_v63, 16  ;;  %v516_v32 = vshrl.u32 %v3082_v4, 16 }
  0x42   : > { %v3096_v37 = vpack.c.b16 %v953_v21, %v952_v7  ;;  %v437_v39 = vrot.slane %v436_v24, 4  ;;  %v545_v43 = vrot.slane %v543_v22, 5  ;;  %v551_v44 = vrot.slane %v549_v28, 5 }
  0x43   : > { %v432_v47 = vsel %vm2918_vm2, %v427_v30, %v431_v51  ;;  %v555_v48 = vrot.slane %v553_v35, 4  ;;  %v561_v49 = vrot.slane %v559_v36, 5  ;;  %v518_v57 = vrot.slane %v516_v32, 4 }
  0x44   : > { %4529 = vst [vmem:[#allocation14_spill] sm:$0xff] %v3096_v37  ;;  %1000 = vrot.lane.b32.xlu1 %v3096_v37, %s2822_s25  ;;  %v442_v61 = vsel %vm2918_vm2, %v437_v39, %v441_v62  ;;  %v950_v6 = vunpack.c.l.b16 %v432_v47  ;;  %v546_v7 = vor.u32 %v545_v43, %v542_v19  ;;  %v519_v17 = vshll.u32 %v3082_v4, 16  ;;  %v3118_v43 = vld [vmem:[%s2884_s24 + $0x70] sm:$0xf] }
  0x45   : > { %v951_v21 = vunpack.c.l.b16 %v442_v61  ;;  %v556_v24 = vor.u32 %v555_v48, %v551_v44  ;;  %v525_v51 = vshll.u32 %v3093_v31, 16  ;;  %v529_v22 = vshrl.u32 %v3093_v31, 16 }
  0x46   : > { %v547_v28 = vrot.slane %v546_v7, 4  ;;  %v521_v30 = vrot.slane %v519_v17, 5  ;;  %v535_v35 = vshll.u32 %v3099_v46, 16  ;;  %v492_v36 = vshrl.u32 %v3104_v59, 16  ;;  %v3126_v17 = vld [vmem:[%s2884_s24 + $0xa8] sm:$0xf] }
  0x47   : > { %v3115_v62 = vpack.c.b16 %v951_v21, %v950_v6  ;;  %v557_v32 = vrot.slane %v556_v24, 4  ;;  %v527_v19 = vrot.slane %v525_v51, 5  ;;  %v531_v39 = vrot.slane %v529_v22, 4  ;;  %4531 = vst [vmem:[#allocation16_spill] sm:$0xff] %v3126_v17 }
  0x48   : > { %v552_v47 = vsel %vm2918_vm2, %v547_v28, %v551_v44  ;;  %v522_v48 = vor.u32 %v521_v30, %v518_v57  ;;  %v537_v61 = vrot.slane %v535_v35, 5  ;;  %v494_v7 = vrot.slane %v492_v36, 4 }
  0x49   : > { %4530 = vst [vmem:[#allocation15_spill] sm:$0xff] %v3115_v62  ;;  %998 = vrot.lane.b32.xlu0 %v3115_v62, %s2822_s25  ;;  %v562_v6 = vsel %vm2918_vm2, %v557_v32, %v561_v49  ;;  %v960_v21 = vunpack.c.l.b16 %v552_v47  ;;  %v532_v24 = vor.u32 %v531_v39, %v527_v19  ;;  %v495_v51 = vshll.u32 %v3104_v59, 16  ;;  %v3150_v62 = vld [vmem:[%s2884_s24 + $0x9c] sm:$0xf] }
  0x4a   : > { %v961_v44 = vunpack.c.l.b16 %v562_v6  ;;  %v523_v57 = vrot.slane %v522_v48, 4  ;;  %v501_v22 = vshll.u32 %v3118_v43, 16  ;;  %v505_v28 = vshrl.u32 %v3118_v43, 16  ;;  %v3142_v6 = vld [vmem:[%s2884_s24 + $0xac] sm:$0xf] }
  0x4b   : > { %v533_v30 = vrot.slane %v532_v24, 4  ;;  %v497_v35 = vrot.slane %v495_v51, 5  ;;  %v511_v36 = vshll.u32 %v3123_v58, 16  ;;  %v612_v56 = vshrl.u32 %v3126_v17, 16  ;;  %4533 = vst [vmem:[#allocation18_spill] sm:$0xff] %v3142_v6 }
  0x4c   : > { %v3137_v49 = vpack.c.b16 %v961_v44, %v960_v21  ;;  %v528_v32 = vsel %vm2918_vm2, %v523_v57, %v527_v19  ;;  %v503_v39 = vrot.slane %v501_v22, 5  ;;  %v507_v47 = vrot.slane %v505_v28, 4  ;;  %v3145_v48 = vld [vmem:[%s2884_s24 + $0xb0] sm:$0x1] }
  0x4d   : > { %4534 = vst [vmem:[#allocation19_spill] sm:$0xff] %v3145_v48  ;;  %v538_v24 = vsel %vm2918_vm2, %v533_v30, %v537_v61  ;;  %v958_v51 = vunpack.c.l.b16 %v528_v32  ;;  %v498_v37 = vor.u32 %v497_v35, %v494_v7  ;;  %v513_v41 = vrot.slane %v511_v36, 5  ;;  %v3159_v30 = vld [vmem:[%s2884_s24 + $0xa0] sm:$0xf] }
  0x4e   : > { %4532 = vst [vmem:[#allocation17_spill] sm:$0xff] %v3137_v49  ;;  %1008 = vrot.lane.b32.xlu2 %v3137_v49, %s2822_s25  ;;  %v959_v19 = vunpack.c.l.b16 %v538_v24  ;;  %v508_v21 = vor.u32 %v507_v47, %v503_v39  ;;  %v614_v44 = vrot.slane %v612_v56, 4  ;;  %v615_v57 = vshll.u32 %v3126_v17, 16  ;;  %v3165_v47 = vld [vmem:[%s2884_s24 + $0x90] sm:$0xf] }
  0x4f   : > { %v499_v22 = vrot.slane %v498_v37, 4  ;;  %v621_v28 = vshll.u32 %v3142_v6, 16  ;;  %v625_v61 = vshrl.u32 %v3142_v6, 16  ;;  %v631_v7 = vshll.u32 %v3145_v48, 16 }
  0x50   : > { %v3161_v35 = vpack.c.b16 %v959_v19, %v958_v51  ;;  %v509_v36 = vrot.slane %v508_v21, 4  ;;  %v617_v32 = vrot.slane %v615_v57, 5  ;;  %v588_v24 = vshrl.u32 %v3150_v62, 16 }
  0x51   : > { %v504_v56 = vsel %vm2918_vm2, %v499_v22, %v503_v39  ;;  %v623_v37 = vrot.slane %v621_v28, 5  ;;  %v627_v49 = vrot.slane %v625_v61, 4  ;;  %v633_v15 = vrot.slane %v631_v7, 5 }
  0x52   : > { %4535 = vst [vmem:[#allocation20_spill] sm:$0xff] %v3161_v35  ;;  %1006 = vrot.lane.b32.xlu1 %v3161_v35, %s2822_s25  ;;  %v514_v51 = vsel %vm2918_vm2, %v509_v36, %v513_v41  ;;  %v956_v19 = vunpack.c.l.b16 %v504_v56  ;;  %v618_v21 = vor.u32 %v617_v32, %v614_v44  ;;  %v590_v57 = vrot.slane %v588_v24, 4  ;;  %v3184_v32 = vld [vmem:[%s2884_s24 + $0x94] sm:$0xf] }
  0x53   : > { %v957_v5 = vunpack.c.l.b16 %v514_v51  ;;  %v628_v48 = vor.u32 %v627_v49, %v623_v37  ;;  %v591_v39 = vshll.u32 %v3150_v62, 16  ;;  %v597_v22 = vshll.u32 %v3159_v30, 16  ;;  %v3189_v51 = vld [vmem:[%s2884_s24 + $0x98] sm:$0x1] }
  0x54   : > { %v619_v28 = vrot.slane %v618_v21, 4  ;;  %v601_v61 = vshrl.u32 %v3159_v30, 16  ;;  %v607_v7 = vshll.u32 %v3170_v10, 16  ;;  %v564_v35 = vshrl.u32 %v3165_v47, 16 }
  0x55   : > { %v3181_v6 = vpack.c.b16 %v957_v5, %v956_v19  ;;  %v629_v41 = vrot.slane %v628_v48, 4  ;;  %v593_v36 = vrot.slane %v591_v39, 5  ;;  %v599_v44 = vrot.slane %v597_v22, 5 }
  0x56   : > { %v624_v49 = vsel %vm2918_vm2, %v619_v28, %v623_v37  ;;  %v603_v24 = vrot.slane %v601_v61, 4  ;;  %v609_v56 = vrot.slane %v607_v7, 5  ;;  %v566_v21 = vrot.slane %v564_v35, 4 }
  0x57   : > { %4536 = vst [vmem:[#allocation21_spill] sm:$0xff] %v3181_v6  ;;  %1004 = vrot.lane.b32.xlu0 %v3181_v6, %s2822_s25  ;;  %v634_v5 = vsel %vm2918_vm2, %v629_v41, %v633_v15  ;;  %v966_v19 = vunpack.c.l.b16 %v624_v49  ;;  %v594_v48 = vor.u32 %v593_v36, %v590_v57  ;;  %v567_v39 = vshll.u32 %v3165_v47, 16 }
  0x58   : > { %v967_v22 = vunpack.c.l.b16 %v634_v5  ;;  %v604_v17 = vor.u32 %v603_v24, %v599_v44  ;;  %v573_v63 = vshll.u32 %v3184_v32, 16  ;;  %v577_v37 = vshrl.u32 %v3184_v32, 16 }
  0x59   : > { %v595_v28 = vrot.slane %v594_v48, 4  ;;  %v569_v61 = vrot.slane %v567_v39, 5  ;;  %v583_v35 = vshll.u32 %v3189_v51, 16  ;;  %vm707_vm3 = vcmask 1042432  }
  0x5a   : > { %v3199_v7 = vpack.c.b16 %v967_v22, %v966_v19  ;;  %v605_v6 = vrot.slane %v604_v17, 4  ;;  %v575_v55 = vrot.slane %v573_v63, 5  ;;  %v579_v15 = vrot.slane %v577_v37, 4 }
  0x5b   : > { %v600_v57 = vsel %vm2918_vm2, %v595_v28, %v599_v44  ;;  %v570_v41 = vor.u32 %v569_v61, %v566_v21  ;;  %v585_v36 = vrot.slane %v583_v35, 5  ;;  %vm708_vm4 = vcmask 1046532   ;;  %v3227_v35 = vld [vmem:[%s2884_s24 + $0xb8] sm:$0xf] }
  0x5c   : > { %1014 = vrot.lane.b32.xlu2 %v3199_v7, %s2822_s25  ;;  %v610_v49 = vsel %vm2918_vm2, %v605_v6, %v609_v56  ;;  %v964_v24 = vunpack.c.l.b16 %v600_v57  ;;  %v580_v5 = vor.u32 %v579_v15, %v575_v55  ;;  %vm3207_vm5 = vmor %vm707_vm3, %vm708_vm4  ;;  %v2571_v63 = vrot.slane %v2981_v33, 9  ;;  %v3234_v15 = vld [vmem:[%s2884_s24 + $0xbc] sm:$0x1] }
  0x5d   : > { %v965_v44 = vunpack.c.l.b16 %v610_v49  ;;  %v571_v21 = vrot.slane %v570_v41, 4  ;;  %v719_v19 = vrot.slane %v2985_v38, 5  ;;  %v722_v48 = vrot.slane %v2992_v50, 5  ;;  %v3224_v38 = vld [vmem:[%s2884_s24 + $0xb4] sm:$0xf] }
  0x5e   : > { %v581_v39 = vrot.slane %v580_v5, 4  ;;  %v2570_v6 = vrot.slane %v2911_v18, 9  ;;  %v712_v56 = vrot.slane %v2924_v27, 5  ;;  %v715_v22 = vrot.slane %v2931_v40, 5 }
  0x5f   : > { %v3217_v37 = vpack.c.b16 %v965_v44, %v964_v24  ;;  %v576_v28 = vsel %vm2918_vm2, %v571_v21, %v575_v55  ;;  %v720_v33 = vsel %vm3207_vm5, %v2571_v63, %v719_v19  ;;  %v721_v61 = vrot.slane %v719_v19, 4 }
  0x60   : > { %v586_v18 = vsel %vm2918_vm2, %v581_v39, %v585_v36  ;;  %v962_v50 = vunpack.c.l.b16 %v576_v28  ;;  %v1020_v27 = vunpack.c.l.b16 %v720_v33  ;;  %v713_v40 = vsel %vm3207_vm5, %v2570_v6, %v712_v56 }
  0x61   : > { %1012 = vrot.lane.b32.xlu1 %v3217_v37, %s2822_s25  ;;  %v963_v55 = vunpack.c.l.b16 %v586_v18  ;;  %v723_v57 = vsel %vm3207_vm5, %v721_v61, %v722_v48  ;;  %v714_v41 = vrot.slane %v712_v56, 4  ;;  %v1018_v49 = vunpack.c.l.b16 %v713_v40 }
  0x62   : > { %v1021_v24 = vunpack.c.l.b16 %v723_v57  ;;  %v636_v5 = vshrl.u32 %v3224_v38, 16  ;;  %v639_v36 = vshll.u32 %v3224_v38, 16  ;;  %v645_v63 = vshll.u32 %v3227_v35, 16 }
  0x63   : > { %v3243_v44 = vpack.c.b16 %v963_v55, %v962_v50  ;;  %v716_v21 = vsel %vm3207_vm5, %v714_v41, %v715_v22  ;;  %v649_v19 = vshrl.u32 %v3227_v35, 16  ;;  %v655_v39 = vshll.u32 %v3234_v15, 16 }
  0x64   : > { %v3249_v6 = vpack.c.b16 %v1021_v24, %v1020_v27  ;;  %v1019_v48 = vunpack.c.l.b16 %v716_v21  ;;  %v638_v56 = vrot.slane %v636_v5, 4  ;;  %v641_v28 = vrot.slane %v639_v36, 5 }
  0x65   : > { %1010 = vrot.lane.b32.xlu0 %v3243_v44, %s2822_s25  ;;  %v647_v33 = vrot.slane %v645_v63, 5  ;;  %v651_v61 = vrot.slane %v649_v19, 4  ;;  %v657_v18 = vrot.slane %v655_v39, 5  ;;  %v2574_v50 = vrot.slane %v2887_v1, 9 }
  0x66   : > { %1068 = vrot.lane.b32.xlu2 %v3249_v6, %s2823_s26  ;;  %v1050_v22 = vpack.c.b16 %v1019_v48, %v1018_v49  ;;  %v642_v40 = vor.u32 %v641_v28, %v638_v56  ;;  %v740_v27 = vrot.slane %v2890_v2, 5  ;;  %v743_v55 = vrot.slane %v2893_v3, 5 }
  0x67   : > { %v652_v57 = vor.u32 %v651_v61, %v647_v33  ;;  %v2573_v41 = vrot.slane %v2959_v8, 9  ;;  %v733_v24 = vrot.slane %v2967_v16, 5  ;;  %v736_v5 = vrot.slane %v2975_v25, 5 }
  0x68   : > { %v643_v36 = vrot.slane %v642_v40, 4  ;;  %v741_v1 = vsel %vm3207_vm5, %v2574_v50, %v740_v27  ;;  %v742_v63 = vrot.slane %v740_v27, 4  ;;  %v2572_v21 = vrot.slane %v2901_v9, 9 }
  0x69   : > { %1066 = vrot.lane.b32.xlu1 %v1050_v22, %s2823_s26  ;;  %v653_v49 = vrot.slane %v652_v57, 4  ;;  %v1026_v2 = vunpack.c.l.b16 %v741_v1  ;;  %v734_v3 = vsel %vm3207_vm5, %v2573_v41, %v733_v24  ;;  %v735_v19 = vrot.slane %v733_v24, 4 }
  0x6a   : > { %v648_v8 = vsel %vm2918_vm2, %v643_v36, %v647_v33  ;;  %v744_v16 = vsel %vm3207_vm5, %v742_v63, %v743_v55  ;;  %v1024_v25 = vunpack.c.l.b16 %v734_v3  ;;  %v726_v39 = vrot.slane %v2904_v12, 5 }
  0x6b   : > { %v658_v9 = vsel %vm2918_vm2, %v653_v49, %v657_v18  ;;  %v968_v48 = vunpack.c.l.b16 %v648_v8  ;;  %v1027_v56 = vunpack.c.l.b16 %v744_v16  ;;  %v737_v28 = vsel %vm3207_vm5, %v735_v19, %v736_v5 }
  0x6c   : > { %v969_v61 = vunpack.c.l.b16 %v658_v9  ;;  %v1025_v50 = vunpack.c.l.b16 %v737_v28  ;;  %v727_v22 = vsel %vm3207_vm5, %v2572_v21, %v726_v39  ;;  %v728_v33 = vrot.slane %v726_v39, 4 }
  0x6d   : > { %v3278_v40 = vpack.c.b16 %v1027_v56, %v1026_v2  ;;  %v729_v27 = vrot.slane %v2907_v13, 5  ;;  %v1022_v55 = vunpack.c.l.b16 %v727_v22  ;;  %v2577_v12 = vrot.slane %v3019_v29, 9 }
  0x6e   : > { %v3282_v57 = vpack.c.b16 %v969_v61, %v968_v48  ;;  %v3284_v18 = vpack.c.b16 %v1025_v50, %v1024_v25  ;;  %v761_v41 = vrot.slane %v3031_v45, 5  ;;  %v764_v24 = vrot.slane %v3037_v52, 5 }
  0x6f   : > { %1074 = vrot.lane.b32.xlu2 %v3278_v40, %s2823_s26  ;;  %v730_v5 = vsel %vm3207_vm5, %v728_v33, %v729_v27  ;;  %v2576_v36 = vrot.slane %v3040_v53, 9  ;;  %v754_v13 = vrot.slane %v3051_v11, 5  ;;  %v757_v29 = vrot.slane %v3057_v26, 5 }
  0x70   : > { %1016 = vrot.lane.b32.xlu0 %v3282_v57, %s2822_s25  ;;  %v1023_v1 = vunpack.c.l.b16 %v730_v5  ;;  %v762_v45 = vsel %vm3207_vm5, %v2577_v12, %v761_v41  ;;  %v763_v52 = vrot.slane %v761_v41, 4  ;;  %v2575_v63 = vrot.slane %v2935_v42, 9 }
  0x71   : > { %1072 = vrot.lane.b32.xlu1 %v3284_v18, %s2823_s26  ;;  %v1032_v21 = vunpack.c.l.b16 %v762_v45  ;;  %v755_v53 = vsel %vm3207_vm5, %v2576_v36, %v754_v13  ;;  %v756_v11 = vrot.slane %v754_v13, 4  ;;  %v747_v26 = vrot.slane %v2942_v54, 5 }
  0x72   : > { %v765_v49 = vsel %vm3207_vm5, %v763_v52, %v764_v24  ;;  %v1030_v2 = vunpack.c.l.b16 %v755_v53  ;;  %v750_v3 = vrot.slane %v2953_v0, 5  ;;  %v3312_v25 = vpack.c.b16 %v1023_v1, %v1022_v55 }
  0x73   : > { %v1033_v19 = vunpack.c.l.b16 %v765_v49  ;;  %v758_v42 = vsel %vm3207_vm5, %v756_v11, %v757_v29  ;;  %v748_v8 = vsel %vm3207_vm5, %v2575_v63, %v747_v26  ;;  %v749_v16 = vrot.slane %v747_v26, 4 }
  0x74   : > { %v1031_v39 = vunpack.c.l.b16 %v758_v42  ;;  %v2580_v9 = vrot.slane %v3082_v4, 9  ;;  %v782_v54 = vrot.slane %v3093_v31, 5  ;;  %v785_v56 = vrot.slane %v3099_v46, 5 }
  0x75   : > { %v3316_v48 = vpack.c.b16 %v1033_v19, %v1032_v21  ;;  %v751_v0 = vsel %vm3207_vm5, %v749_v16, %v750_v3  ;;  %v2579_v28 = vrot.slane %v3104_v59, 9  ;;  %v1028_v50 = vunpack.c.l.b16 %v748_v8  ;;  %v4539_v8 = vld [vmem:[#allocation11_spill] sm:$0xff] }
  0x76   : > { %v3322_v61 = vpack.c.b16 %v1031_v39, %v1030_v2  ;;  %v783_v22 = vsel %vm3207_vm5, %v2580_v9, %v782_v54  ;;  %v784_v33 = vrot.slane %v782_v54, 4  ;;  %v775_v31 = vrot.slane %v3118_v43, 5  ;;  %v4540_v39 = vld [vmem:[#allocation13_spill] sm:$0xff] }
  0x77   : > { %1080 = vrot.lane.b32.xlu2 %v3316_v48, %s2823_s26  ;;  %v1038_v4 = vunpack.c.l.b16 %v783_v22  ;;  %v778_v27 = vrot.slane %v3123_v58, 5  ;;  %v2578_v55 = vrot.slane %v3001_v60, 9  ;;  %v1029_v46 = vunpack.c.l.b16 %v751_v0 }
  0x78   : > { %1070 = vrot.lane.b32.xlu0 %v3312_v25, %s2823_s26  ;;  %v786_v59 = vsel %vm3207_vm5, %v784_v33, %v785_v56  ;;  %v768_v12 = vrot.slane %v3007_v14, 5  ;;  %v771_v41 = vrot.slane %v3012_v20, 5  ;;  %v776_v58 = vsel %vm3207_vm5, %v2579_v28, %v775_v31  ;;  %v4542_v56 = vld [vmem:[#allocation18_spill] sm:$0xff] }
  0x79   : > { %1078 = vrot.lane.b32.xlu1 %v3322_v61, %s2823_s26  ;;  %v1039_v24 = vunpack.c.l.b16 %v786_v59  ;;  %v777_v43 = vrot.slane %v775_v31, 4  ;;  %v2583_v60 = vrot.slane %v3150_v62, 9  ;;  %v1036_v5 = vunpack.c.l.b16 %v776_v58 }
  0x7a   : > { %v769_v36 = vsel %vm3207_vm5, %v2578_v55, %v768_v12  ;;  %v770_v13 = vrot.slane %v768_v12, 4  ;;  %v803_v29 = vrot.slane %v3159_v30, 5  ;;  %v806_v1 = vrot.slane %v3170_v10, 5 }
  0x7b   : > { %v3345_v14 = vpack.c.b16 %v1039_v24, %v1038_v4  ;;  %v779_v20 = vsel %vm3207_vm5, %v777_v43, %v778_v27  ;;  %v3350_v45 = vpack.c.b16 %v1029_v46, %v1028_v50  ;;  %v1034_v53 = vunpack.c.l.b16 %v769_v36  ;;  %v4543_v50 = vld [vmem:[#allocation19_spill] sm:$0xff] }
  0x7c   : > { %v1037_v52 = vunpack.c.l.b16 %v779_v20  ;;  %v804_v62 = vsel %vm3207_vm5, %v2583_v60, %v803_v29  ;;  %v805_v63 = vrot.slane %v803_v29, 4  ;;  %v772_v21 = vsel %vm3207_vm5, %v770_v13, %v771_v41  ;;  %v2692_v29 = vld [vmem:[%s2884_s24 + $0xc] sm:$0xff] }
  0x7d   : > { %v2582_v30 = vrot.slane %v3165_v47, 9  ;;  %v796_v11 = vrot.slane %v3184_v32, 5  ;;  %v799_v49 = vrot.slane %v3189_v51, 5  ;;  %v2581_v2 = vrot.slane %v3062_v34, 9  ;;  %v4541_v51 = vld [vmem:[#allocation16_spill] sm:$0xff] }
  0x7e   : > { %v3358_v26 = vpack.c.b16 %v1037_v52, %v1036_v5  ;;  %v807_v10 = vsel %vm3207_vm5, %v805_v63, %v806_v1  ;;  %v1044_v3 = vunpack.c.l.b16 %v804_v62  ;;  %v1035_v32 = vunpack.c.l.b16 %v772_v21  ;;  %v995_v20 = vpop.permute.xlu2 %994  ;;  %v4544_v1 = vld [vmem:[#allocation10_spill] sm:$0xff]  ;;  %v2693_v52 = vld [vmem:[%s2884_s24 + $0x18] sm:$0xff]  ;;  %v4545_v62 = vld [vmem:[#allocation7_spill] sm:$0xff] }
  0x7f   : > { %1086 = vrot.lane.b32.xlu2 %v3345_v14, %s2823_s26  ;;  %v1045_v19 = vunpack.c.l.b16 %v807_v10  ;;  %v797_v42 = vsel %vm3207_vm5, %v2582_v30, %v796_v11  ;;  %v798_v47 = vrot.slane %v796_v11, 4  ;;  %v789_v16 = vrot.slane %v4539_v8, 5  ;;  %v3421_v30 = vld [vmem:[%s2884_s24 + $0x3c] sm:$0xff]  ;;  %v4547_v8 = vld [vmem:[#allocation15_spill] sm:$0xff] }
  0x80   : > { %1076 = vrot.lane.b32.xlu0 %v3350_v45, %s2823_s26  ;;  %v792_v9 = vrot.slane %v4540_v39, 5  ;;  %v2584_v54 = vrot.slane %v4541_v51, 9  ;;  %v1042_v0 = vunpack.c.l.b16 %v797_v42  ;;  %v810_v28 = vrot.slane %v4542_v56, 5  ;;  %v3458_v51 = vld [vmem:[%s2884_s24 + $0x6c] sm:$0xff] }
  0x81   : > { %1084 = vrot.lane.b32.xlu1 %v3358_v26, %s2823_s26  ;;  %v800_v34 = vsel %vm3207_vm5, %v798_v47, %v799_v49  ;;  %v813_v22 = vrot.slane %v4543_v50, 5  ;;  %v790_v4 = vsel %vm3207_vm5, %v2581_v2, %v789_v16  ;;  %v791_v31 = vrot.slane %v789_v16, 4  ;;  %v2694_v49 = vld [vmem:[%s2884_s24 + $0x24] sm:$0xff] }
  0x82   : > { %v1043_v33 = vunpack.c.l.b16 %v800_v34  ;;  %v3381_v27 = vpack.c.b16 %v1045_v19, %v1044_v3  ;;  %v1040_v55 = vunpack.c.l.b16 %v790_v4  ;;  %v811_v46 = vsel %vm3207_vm5, %v2584_v54, %v810_v28  ;;  %v4546_v3 = vld [vmem:[#allocation8_spill] sm:$0xff]  ;;  %v2697_v19 = vld [vmem:[%s2884_s24 + $0x48] sm:$0xff]  ;;  %v4548_v54 = vld [vmem:[#allocation21_spill] sm:$0xff] }
  0x83   : > { %v812_v59 = vrot.slane %v810_v28, 4  ;;  %v3385_v12 = vpack.c.b16 %v1035_v32, %v1034_v53  ;;  %v793_v41 = vsel %vm3207_vm5, %v791_v31, %v792_v9  ;;  %v1046_v24 = vunpack.c.l.b16 %v811_v46  ;;  %v4549_v34 = vld [vmem:[#allocation9_spill] sm:$0xff]  ;;  %v4550_v4 = vld [vmem:[#allocation20_spill] sm:$0xff] }
  0x84   : > { %v3389_v58 = vpack.c.b16 %v1043_v33, %v1042_v0  ;;  %v1041_v43 = vunpack.c.l.b16 %v793_v41  ;;  %vm1308_vm6 = vcmask 31744   ;;  %vm1357_vm7 = vcmask 64512   ;;  %v2701_v28 = vld [vmem:[%s2884_s24 + $0x78] sm:$0xff] }
  0x85   : > { %v814_v60 = vsel %vm3207_vm5, %v812_v59, %v813_v22  ;;  %v3471_v22 = vld [vmem:[%s2884_s24 + $0x30] sm:$0xff]  ;;  %vm1641_vm8 = vcmask 1041408   ;;  %vm1390_vm9 = vcmask 97280   ;;  %vm1423_vm10 = vcmask 130048  }
  0x86   : > { %v1047_v5 = vunpack.c.l.b16 %v814_v60  ;;  %v3395_v36 = vpack.c.b16 %v1041_v43, %v1040_v55  ;;  %v1323_v31 = vsel %vm1308_vm6, %v3471_v22, %v995_v20  ;;  %v3485_v59 = vld [vmem:[%s2884_s24 + $0x54] sm:$0xff]  ;;  %vm1456_vm11 = vcmask 162816  }
  0x87   : > { %1092 = vrot.lane.b32.xlu2 %v3381_v27, %s2823_s26  ;;  %vm1489_vm12 = vcmask 195584   ;;  %vm1522_vm13 = vcmask 228352   ;;  %vm1555_vm14 = vcmask 261120   ;;  %vm1608_vm15 = vcmask 293888  }
  0x88   : > { %1082 = vrot.lane.b32.xlu0 %v3385_v12, %s2823_s26  ;;  %v3399_v13 = vpack.c.b16 %v1047_v5, %v1046_v24 }
  0x89   : > { %1090 = vrot.lane.b32.xlu1 %v3389_v58, %s2823_s26 }
  0x8c   : > { %v3414_v63 = vpop.permute.xlu2 %996 }
  0x8f   : > { %1136 = vrot.lane.b32.xlu2 %v4544_v1, %s2824_s27 }
  0x90   : > { %1088 = vrot.lane.b32.xlu0 %v3395_v36, %s2823_s26 }
  0x91   : > { %1101 = vrot.lane.b32.xlu1 %v2692_v29, %s2825_s28 }
  0x97   : > { %1241 = vrot.lane.b32.xlu2 %v4545_v62, %s2826_s29 }
  0x98   : > { %1094 = vrot.lane.b32.xlu0 %v3399_v13, %s2823_s26 }
  0x99   : > { %1206 = vrot.lane.b32.xlu1 %v2693_v52, %s2827_s30  ;;  %v991_v21 = vpop.permute.xlu1 %990 }
  0x9a   : > { %v3418_v53 = vsel %vm1308_vm6, %v2693_v52, %v991_v21  ;;  %v3428_v11 = vpop.permute.xlu2 %1002 }
  0x9e   : > { %v3430_v10 = vpop.permute.xlu0 %986 }
  0x9f   : > { %1109 = vrot.lane.b32.xlu2 %v3421_v30, %s2825_s28 }
  0xa0   : > { %1171 = vrot.lane.b32.xlu0 %v3249_v6, %s2828_s5 }
  0xa1   : > { %1103 = vrot.lane.b32.xlu1 %v2693_v52, %s2825_s28 }
  0xa7   : > { %1173 = vrot.lane.b32.xlu2 %v3312_v25, %s2828_s5 }
  0xa8   : > { %1276 = vrot.lane.b32.xlu0 %v3312_v25, %s2829_s6  ;;  %v993_v2 = vpop.permute.xlu1 %992  ;;  %v3441_v42 = vpop.permute.xlu2 %1008 }
  0xa9   : > { %1144 = vrot.lane.b32.xlu1 %v4546_v3, %s2824_s27  ;;  %v1320_v6 = vsel %vm1308_vm6, %v2694_v49, %v993_v2 }
  0xac   : > { %v989_v47 = vpop.permute.xlu0 %988 }
  0xad   : > { %v1314_v32 = vsel %vm1308_vm6, %v2692_v29, %v989_v47 }
  0xaf   : > { %1214 = vrot.lane.b32.xlu2 %v2697_v19, %s2827_s30 }
  0xb0   : > { %1138 = vrot.lane.b32.xlu0 %v4545_v62, %s2824_s27  ;;  %v3508_v62 = vld [vmem:[%s2884_s24 + $0x9c] sm:$0xff] }
  0xb1   : > { %1208 = vrot.lane.b32.xlu1 %v2694_v49, %s2827_s30 }
  0xb6   : > { %v3448_v25 = vpop.permute.xlu2 %1014  ;;  %v1001_v16 = vpop.permute.xlu1 %1000 }
  0xb7   : > { %1278 = vrot.lane.b32.xlu2 %v3284_v18, %s2829_s6  ;;  %v1332_v24 = vsel %vm1308_vm6, %v3485_v59, %v1001_v16 }
  0xb8   : > { %1179 = vrot.lane.b32.xlu0 %v3350_v45, %s2828_s5 }
  0xb9   : > { %1249 = vrot.lane.b32.xlu1 %v4547_v8, %s2826_s29 }
  0xbb   : > { %v999_v39 = vpop.permute.xlu0 %998 }
  0xbc   : > { %v1329_v9 = vsel %vm1308_vm6, %v2697_v19, %v999_v39 }
  0xbf   : > { %1152 = vrot.lane.b32.xlu2 %v4548_v54, %s2824_s27 }
  0xc0   : > { %1243 = vrot.lane.b32.xlu0 %v4549_v34, %s2826_s29  ;;  %v1069_v0 = vpop.permute.xlu2 %1068 }
  0xc1   : > { %1117 = vrot.lane.b32.xlu1 %v3458_v51, %s2825_s28  ;;  %v3467_v56 = vsel %vm1357_vm7, %v1314_v32, %v1069_v0  ;;  %v4551_v32 = vld [vmem:[#allocation14_spill] sm:$0xff] }
  0xc4   : > { %v1007_v50 = vpop.permute.xlu1 %1006 }
  0xc5   : > { %v1341_v33 = vsel %vm1308_vm6, %v2701_v28, %v1007_v50 }
  0xc7   : > { %1257 = vrot.lane.b32.xlu2 %v4550_v4, %s2826_s29 }
  0xc8   : > { %1284 = vrot.lane.b32.xlu0 %v3322_v61, %s2829_s6 }
  0xc9   : > { %1222 = vrot.lane.b32.xlu1 %v2701_v28, %s2827_s30  ;;  %v1075_v55 = vpop.permute.xlu2 %1074  ;;  %v1005_v41 = vpop.permute.xlu0 %1004 }
  0xca   : > { %v3482_v46 = vsel %vm1357_vm7, %v1323_v31, %v1075_v55 }
  0xcf   : > { %1111 = vrot.lane.b32.xlu2 %v2697_v19, %s2825_s28 }
  0xd0   : > { %1187 = vrot.lane.b32.xlu0 %v3358_v26, %s2828_s5 }
  0xd1   : > { %1105 = vrot.lane.b32.xlu1 %v2694_v49, %s2825_s28  ;;  %v1081_v43 = vpop.permute.xlu2 %1080 }
  0xd2   : > { %v3494_v60 = vsel %vm1357_vm7, %v1332_v24, %v1081_v43  ;;  %v1338_v24 = vsel %vm1308_vm6, %v3458_v51, %v1005_v41  ;;  %v2709_v41 = vld [vmem:[%s4463_s1] sm:$0xff] }
  0xd3   : > { %v1013_v5 = vpop.permute.xlu1 %1012 }
  0xd7   : > { %1175 = vrot.lane.b32.xlu2 %v3284_v18, %s2828_s5  ;;  %v1011_v29 = vpop.permute.xlu0 %1010  ;;  %v1350_v18 = vsel %vm1308_vm6, %v3508_v62, %v1013_v5 }
  0xd8   : > { %1292 = vrot.lane.b32.xlu0 %v3345_v14, %s2829_s6 }
  0xd9   : > { %1146 = vrot.lane.b32.xlu1 %v4547_v8, %s2824_s27  ;;  %v1087_v20 = vpop.permute.xlu2 %1086 }
  0xda   : > { %v3503_v1 = vsel %vm1357_vm7, %v1341_v33, %v1087_v20  ;;  %v4552_v33 = vld [vmem:[#allocation6_spill] sm:$0xff] }
  0xdb   : > { %v3505_v52 = vpop.permute.xlu1 %1066 }
  0xdf   : > { %1216 = vrot.lane.b32.xlu2 %v3485_v59, %s2827_s30 }
  0xe0   : > { %1140 = vrot.lane.b32.xlu0 %v4549_v34, %s2824_s27 }
  0xe1   : > { %1210 = vrot.lane.b32.xlu1 %v3471_v22, %s2827_s30  ;;  %v1093_v21 = vpop.permute.xlu2 %1092 }
  0xe2   : > { %v3518_v49 = vpop.permute.xlu0 %1016  ;;  %v3521_v2 = vsel %vm1357_vm7, %v1350_v18, %v1093_v21  ;;  %v3569_v18 = vld [vmem:[%s2884_s24 + $0x90] sm:$0xff] }
  0xe3   : > { %v1073_v19 = vpop.permute.xlu1 %1072 }
  0xe4   : > { %v3524_v47 = vsel %vm1357_vm7, %v1320_v6, %v1073_v19  ;;  %v1592_v6 = vld [vmem:[%s4463_s1 + $0x10] sm:$0x3] }
  0xe5   : > { %v1602_v50 = vunpack.c.l.b16 %v1592_v6 }
  0xe7   : > { %1280 = vrot.lane.b32.xlu2 %v3278_v40, %s2829_s6 }
  0xe8   : > { %1181 = vrot.lane.b32.xlu0 %v3322_v61, %s2828_s5  ;;  %v1605_v61 = vpack.c.b16 %v1602_v50, %v1602_v50 }
  0xe9   : > { %1251 = vrot.lane.b32.xlu1 %v4551_v32, %s2826_s29  ;;  %v3532_v8 = vpop.permute.xlu2 %1136 }
  0xea   : > { %v1071_v16 = vpop.permute.xlu0 %1070 }
  0xeb   : > { %v3536_v39 = vsel %vm1357_vm7, %v3418_v53, %v1071_v16  ;;  %v1079_v34 = vpop.permute.xlu1 %1078  ;;  %v1643_v53 = vsel %vm1641_vm8, %v1605_v61, 0  ;;  %v1347_v16 = vsel %vm1308_vm6, %v3569_v18, %v1011_v29  ;;  %v2705_v61 = vld [vmem:[%s2884_s24 + $0xa8] sm:$0xff] }
  0xec   : > { %v3542_v0 = vsel %vm1357_vm7, %v1329_v9, %v1079_v34  ;;  %1650 = vmatpush.bf16.msra.mxu0 %v1643_v53  ;;  %v1326_v9 = vsel %vm1308_vm6, %v3421_v30, %v3414_v63  ;;  %2712 = vmatpush.bf16.msra.mxu1 %v1643_v53  ;;  %v3566_v63 = vld [vmem:[%s2884_s24 + $0x60] sm:$0xff] }
  0xed   : > { %2713 = vmatpush.bf16.msra.mxu2 %v1643_v53  ;;  %2714 = vmatpush.bf16.msra.mxu3 %v1643_v53  ;;  %v3595_v53 = vld [vmem:[%s2884_s24 + $0x84] sm:$0xff] }
  0xee   : > { %v1344_v29 = vsel %vm1308_vm6, %v3595_v53, %v3441_v42  ;;  %v1353_v42 = vsel %vm1308_vm6, %v2705_v61, %v3448_v25 }
  0xef   : > { %1125 = vrot.lane.b32.xlu2 %v3508_v62, %s2825_s28 }
  0xf0   : > { %1245 = vrot.lane.b32.xlu0 %v4552_v33, %s2826_s29 }
  0xf1   : > { %1119 = vrot.lane.b32.xlu1 %v2701_v28, %s2825_s28  ;;  %v3549_v31 = vpop.permute.xlu2 %1241  ;;  %v2710_v28 = vld [vmem:[%s4463_s1 + $0x8] sm:$0xff] }
  0xf2   : > { %v1077_v55 = vpop.permute.xlu0 %1076  ;;  %1651 = vmatpush.bf16.msra.mxu0 %v2710_v28  ;;  %2715 = vmatpush.bf16.msra.mxu1 %v2710_v28 }
  0xf3   : > { %v3557_v43 = vsel %vm1357_vm7, %v1326_v9, %v1077_v55  ;;  %v1085_v5 = vpop.permute.xlu1 %1084  ;;  %2716 = vmatpush.bf16.msra.mxu2 %v2710_v28  ;;  %2717 = vmatpush.bf16.msra.mxu3 %v2710_v28 }
  0xf4   : > { %v3563_v20 = vsel %vm1357_vm7, %v1338_v24, %v1085_v5  ;;  %v2691_v5 = vld [vmem:[%s2884_s24] sm:$0xff] }
  0xf6   : > { %1652 = vmatpush.bf16.msra.mxu0 %v2709_v41  ;;  %2718 = vmatpush.bf16.msra.mxu1 %v2709_v41 }
  0xf7   : > { %1189 = vrot.lane.b32.xlu2 %v3345_v14, %s2828_s5  ;;  %v1335_v14 = vsel %vm1308_vm6, %v3566_v63, %v3428_v11  ;;  %2719 = vmatpush.bf16.msra.mxu2 %v2709_v41 }
  0xf8   : > { %1286 = vrot.lane.b32.xlu0 %v3316_v48, %s2829_s6  ;;  %2720 = vmatpush.bf16.msra.mxu3 %v2709_v41 }
  0xf9   : > { %1160 = vrot.lane.b32.xlu1 %v3217_v37, %s2824_s27  ;;  %v3580_v21 = vpop.permute.xlu2 %1109 }
  0xfa   : > { %v1083_v19 = vpop.permute.xlu0 %1082 }
  0xfb   : > { %v3588_v34 = vsel %vm1357_vm7, %v1335_v14, %v1083_v19  ;;  %v1091_v6 = vpop.permute.xlu1 %1090  ;;  %v1311_v19 = vsel %vm1308_vm6, %v2691_v5, %v3430_v10 }
  0xfc   : > { %v3591_v50 = vsel %vm1357_vm7, %v1347_v16, %v1091_v6  ;;  %v1359_v16 = vsel %vm1357_vm7, %v1311_v19, %v3505_v52 }
  0xff   : > { %1230 = vrot.lane.b32.xlu2 %v2705_v61, %s2827_s30 }
 0x100   : > { %1154 = vrot.lane.b32.xlu0 %v4550_v4, %s2824_s27 }
 0x101   : > { %1224 = vrot.lane.b32.xlu1 %v3595_v53, %s2827_s30  ;;  %v1174_v11 = vpop.permute.xlu2 %1173 }
 0x102   : > { %v1089_v9 = vpop.permute.xlu0 %1088 }
 0x103   : > { %v3606_v55 = vsel %vm1357_vm7, %v1344_v29, %v1089_v9  ;;  %v1102_v24 = vpop.permute.xlu1 %1101  ;;  %v4553_v29 = vld [vmem:[#allocation17_spill] sm:$0xff] }
 0x104   : > { %v1392_v6 = vsel %vm1390_vm9, %v1359_v16, %v1102_v24 }
 0x105   : > { %v1425_v10 = vsel %vm1423_vm10, %v1392_v6, %v3532_v8 }
 0x107   : > { %1294 = vrot.lane.b32.xlu2 %v3395_v36, %s2829_s6 }
 0x108   : > { %1195 = vrot.lane.b32.xlu0 %v3381_v27, %s2828_s5 }
 0x109   : > { %1265 = vrot.lane.b32.xlu1 %v3199_v7, %s2826_s29  ;;  %v3614_v4 = vpop.permute.xlu2 %1214 }
 0x10a   : > { %v1095_v28 = vpop.permute.xlu0 %1094 }
 0x10b   : > { %v3620_v41 = vsel %vm1357_vm7, %v1353_v42, %v1095_v28  ;;  %v1207_v14 = vpop.permute.xlu1 %1206 }
 0x10f   : > { %1113 = vrot.lane.b32.xlu2 %v3485_v59, %s2825_s28 }
 0x110   : > { %1259 = vrot.lane.b32.xlu0 %v4553_v29, %s2826_s29 }
 0x111   : > { %1107 = vrot.lane.b32.xlu1 %v3471_v22, %s2825_s28  ;;  %v1279_v25 = vpop.permute.xlu2 %1278 }
 0x112   : > { %v1172_v9 = vpop.permute.xlu0 %1171 }
 0x113   : > { %v1104_v52 = vpop.permute.xlu1 %1103  ;;  %v1458_v5 = vsel %vm1456_vm11, %v1425_v10, %v1172_v9 }
 0x114   : > { %v1491_v59 = vsel %vm1489_vm12, %v1458_v5, %v1207_v14 }
 0x115   : > { %v1524_v24 = vsel %vm1522_vm13, %v1491_v59, %v3549_v31  ;;  %v4554_v31 = vld [vmem:[#allocation12_spill] sm:$0xff] }
 0x117   : > { %1177 = vrot.lane.b32.xlu2 %v3278_v40, %s2828_s5 }
 0x118   : > { %1300 = vrot.lane.b32.xlu0 %v3399_v13, %s2829_s6 }
 0x119   : > { %1148 = vrot.lane.b32.xlu1 %v4551_v32, %s2824_s27  ;;  %v1153_v22 = vpop.permute.xlu2 %1152 }
 0x11a   : > { %v1277_v8 = vpop.permute.xlu0 %1276 }
 0x11b   : > { %v1557_v42 = vsel %vm1555_vm14, %v1524_v24, %v1277_v8  ;;  %v1145_v28 = vpop.permute.xlu1 %1144 }
 0x11c   : > { %2668 = vmatmul.msk.bf16.vlgmr.msra.gmra.mxu0 %vm1608_vm15, %v1557_v42 }
 0x11f   : > { %1218 = vrot.lane.b32.xlu2 %v3566_v63, %s2827_s30 }
 0x120   : > { %1142 = vrot.lane.b32.xlu0 %v4552_v33, %s2824_s27  ;;  %v1394_v33 = vsel %vm1390_vm9, %v3467_v56, %v1104_v52 }
 0x121   : > { %1212 = vrot.lane.b32.xlu1 %v3421_v30, %s2827_s30  ;;  %v1258_v40 = vpop.permute.xlu2 %1257 }
 0x122   : > { %v1139_v32 = vpop.permute.xlu0 %1138 }
 0x123   : > { %v1209_v14 = vpop.permute.xlu1 %1208  ;;  %v1427_v30 = vsel %vm1423_vm10, %v1394_v33, %v1139_v32 }
 0x127   : > { %1282 = vrot.lane.b32.xlu2 %v3350_v45, %s2829_s6  ;;  %v1460_v45 = vsel %vm1456_vm11, %v1427_v30, %v1174_v11 }
 0x128   : > { %1183 = vrot.lane.b32.xlu0 %v3316_v48, %s2828_s5  ;;  %v1493_v9 = vsel %vm1489_vm12, %v1460_v45, %v1209_v14  ;;  %v817_v14 = vrot.slane %v3227_v35, 5 }
 0x129   : > { %1253 = vrot.lane.b32.xlu1 %v4554_v31, %s2826_s29  ;;  %v3659_v19 = vpop.permute.xlu2 %1111 }
 0x12a   : > { %v1180_v16 = vpop.permute.xlu0 %1179 }
 0x12b   : > { %v1250_v6 = vpop.permute.xlu1 %1249 }
 0x12f   : > { %1127 = vrot.lane.b32.xlu2 %v2705_v61, %s2825_s28  ;;  %v1400_v61 = vsel %vm1390_vm9, %v3482_v46, %v3580_v21 }
 0x130   : > { %1247 = vrot.lane.b32.xlu0 %v4546_v3, %s2826_s29  ;;  %v1433_v11 = vsel %vm1423_vm10, %v1400_v61, %v1145_v28 }
 0x131   : > { %1121 = vrot.lane.b32.xlu1 %v3595_v53, %s2825_s28  ;;  %v3670_v48 = vpop.permute.xlu2 %1175  ;;  %v1466_v53 = vsel %vm1456_vm11, %v1433_v11, %v1180_v16 }
 0x132   : > { %v1244_v10 = vpop.permute.xlu0 %1243  ;;  %v1499_v52 = vsel %vm1489_vm12, %v1466_v53, %v3614_v4 }
 0x133   : > { %v1526_v5 = vsel %vm1522_vm13, %v1493_v9, %v1244_v10  ;;  %v1118_v56 = vpop.permute.xlu1 %1117  ;;  %v1532_v21 = vsel %vm1522_vm13, %v1499_v52, %v1250_v6  ;;  %v820_v6 = vrot.slane %v3234_v15, 5 }
 0x134   : > { %v1559_v3 = vsel %vm1555_vm14, %v1526_v5, %v1279_v25  ;;  %v1408_v4 = vsel %vm1390_vm9, %v3588_v34, %v1118_v56 }
 0x135   : > { %2669 = vmatmul.msk.bf16.gmra.mxu0 %vm1608_vm15, %v1559_v3  ;;  %v1441_v42 = vsel %vm1423_vm10, %v1408_v4, %v1153_v22  ;;  %v819_v22 = vrot.slane %v817_v14, 4  ;;  %v3743_v3 = vld [vmem:[%s2884_s24 + $0xc0] sm:$0xf] }
 0x137   : > { %1191 = vrot.lane.b32.xlu2 %v3395_v36, %s2828_s5  ;;  %v3695_v36 = vld [vmem:[%s2884_s24 + $0xb4] sm:$0xff]  ;;  %v821_v9 = vsel %vm3207_vm5, %v819_v22, %v820_v6 }
 0x138   : > { %1288 = vrot.lane.b32.xlu0 %v3385_v12, %s2829_s6  ;;  %v1049_v15 = vunpack.c.l.b16 %v821_v9 }
 0x139   : > { %1162 = vrot.lane.b32.xlu1 %v3199_v7, %s2824_s27  ;;  %v3689_v46 = vpop.permute.xlu2 %1216 }
 0x13a   : > { %v1285_v25 = vpop.permute.xlu0 %1284 }
 0x13b   : > { %v1565_v59 = vsel %vm1555_vm14, %v1532_v21, %v1285_v25  ;;  %v1223_v8 = vpop.permute.xlu1 %1222  ;;  %v826_v21 = vshll.u32 %v3743_v3, 16 }
 0x13c   : > { %2672 = vmatmul.msk.bf16.vlgmr.msra.gmra.mxu1 %vm1608_vm15, %v1565_v59 }
 0x13f   : > { %1232 = vrot.lane.b32.xlu2 %v3695_v36, %s2827_s30 }
 0x140   : > { %1156 = vrot.lane.b32.xlu0 %v4553_v29, %s2824_s27  ;;  %v2585_v29 = vrot.slane %v3224_v38, 9 }
 0x141   : > { %1226 = vrot.lane.b32.xlu1 %v3569_v18, %s2827_s30  ;;  %v1281_v7 = vpop.permute.xlu2 %1280 }
 0x142   : > { %v1188_v24 = vpop.permute.xlu0 %1187 }
 0x143   : > { %v1106_v28 = vpop.permute.xlu1 %1105  ;;  %v1474_v32 = vsel %vm1456_vm11, %v1441_v42, %v1188_v24  ;;  %v828_v24 = vrot.slane %v826_v21, 5 }
 0x144   : > { %v1507_v16 = vsel %vm1489_vm12, %v1474_v32, %v1223_v8  ;;  %v1396_v11 = vsel %vm1390_vm9, %v3536_v39, %v1106_v28 }
 0x145   : > { %v1540_v35 = vsel %vm1522_vm13, %v1507_v16, %v1258_v40  ;;  %v268_v16 = vld [vmem:[%s2884_s24 + $0xc8] sm:$0x1] }
 0x147   : > { %1296 = vrot.lane.b32.xlu2 %v3389_v58, %s2829_s6 }
 0x148   : > { %1197 = vrot.lane.b32.xlu0 %v3399_v13, %s2828_s5  ;;  %v818_v13 = vsel %vm3207_vm5, %v2585_v29, %v817_v14 }
 0x149   : > { %1267 = vrot.lane.b32.xlu1 %v3282_v57, %s2826_s29  ;;  %v3715_v34 = vpop.permute.xlu2 %1125  ;;  %v1048_v38 = vunpack.c.l.b16 %v818_v13 }
 0x14a   : > { %v1293_v33 = vpop.permute.xlu0 %1292 }
 0x14b   : > { %v1573_v30 = vsel %vm1555_vm14, %v1540_v35, %v1293_v33  ;;  %v1147_v45 = vpop.permute.xlu1 %1146  ;;  %v3734_v56 = vpack.c.b16 %v1049_v15, %v1048_v38  ;;  %v842_v33 = vshll.u32 %v268_v16, 16 }
 0x14c   : > { %2676 = vmatmul.msk.bf16.vlgmr.msra.gmra.mxu2 %vm1608_vm15, %v1573_v30 }
 0x14d   : > { %v844_v13 = vrot.slane %v842_v33, 5 }
 0x14f   : > { %1150 = vrot.lane.b32.xlu2 %v4554_v31, %s2824_s27 }
 0x150   : > { %1261 = vrot.lane.b32.xlu0 %v3243_v44, %s2826_s29 }
 0x151   : > { %1115 = vrot.lane.b32.xlu1 %v3566_v63, %s2825_s28  ;;  %v3732_v10 = vpop.permute.xlu2 %1189  ;;  %v3746_v63 = vld [vmem:[%s2884_s24 + $0xc4] sm:$0xf] }
 0x152   : > { %v1141_v40 = vpop.permute.xlu0 %1140  ;;  %v836_v25 = vshrl.u32 %v3746_v63, 16 }
 0x153   : > { %v1211_v5 = vpop.permute.xlu1 %1210  ;;  %v1429_v53 = vsel %vm1423_vm10, %v1396_v11, %v1141_v40  ;;  %v851_v11 = vrot.slane %v3746_v63, 5 }
 0x154   : > { %v1462_v59 = vsel %vm1456_vm11, %v1429_v53, %v3670_v48  ;;  %v838_v28 = vrot.slane %v836_v25, 4  ;;  %v1402_v48 = vsel %vm1390_vm9, %v3557_v43, %v3659_v19  ;;  %v854_v53 = vrot.slane %v268_v16, 5 }
 0x155   : > { %v1495_v39 = vsel %vm1489_vm12, %v1462_v59, %v1211_v5  ;;  %v1435_v29 = vsel %vm1423_vm10, %v1402_v48, %v1147_v45 }
 0x157   : > { %1255 = vrot.lane.b32.xlu2 %v4548_v54, %s2826_s29  ;;  %v823_v54 = vshrl.u32 %v3743_v3, 16 }
 0x158   : > { %1302 = vrot.lane.b32.xlu0 %v3734_v56, %s2829_s6 }
 0x159   : > { %1220 = vrot.lane.b32.xlu1 %v3458_v51, %s2827_s30  ;;  %v3751_v52 = vpop.permute.xlu2 %1230  ;;  %v832_v51 = vshll.u32 %v3746_v63, 16  ;;  %v825_v4 = vrot.slane %v823_v54, 4  ;;  %v269_v54 = vld [vmem:[%s2884_s24 + $0xcc] sm:$0xf] }
 0x15a   : > { %v1182_v31 = vpop.permute.xlu0 %1181 }
 0x15b   : > { %v1252_v61 = vpop.permute.xlu1 %1251  ;;  %v834_v42 = vrot.slane %v832_v51, 5  ;;  %v829_v22 = vor.u32 %v828_v24, %v825_v4  ;;  %v270_v51 = vld [vmem:[%s2884_s24 + $0xd0] sm:$0xf] }
 0x15c   : > { %v866_v24 = vshll.u32 %v270_v51, 16 }
 0x15d   : > { %v839_v6 = vor.u32 %v838_v28, %v834_v42  ;;  %v830_v30 = vrot.slane %v829_v22, 4  ;;  %v885_v28 = vrot.slane %v270_v51, 5 }
 0x15f   : > { %1129 = vrot.lane.b32.xlu2 %v3695_v36, %s2825_s28  ;;  %v840_v45 = vrot.slane %v839_v6, 4  ;;  %v887_v33 = vrot.slane %v885_v28, 4 }
 0x160   : > { %1185 = vrot.lane.b32.xlu0 %v3385_v12, %s2828_s5 }
 0x161   : > { %1123 = vrot.lane.b32.xlu1 %v3569_v18, %s2825_s28  ;;  %v1468_v18 = vsel %vm1456_vm11, %v1435_v29, %v1182_v31  ;;  %v3775_v35 = vpop.permute.xlu2 %1294 }
 0x162   : > { %v1246_v8 = vpop.permute.xlu0 %1245  ;;  %v1501_v43 = vsel %vm1489_vm12, %v1468_v18, %v3689_v46  ;;  %v2707_v46 = vld [vmem:[%s2884_s24 + $0xc0] sm:$0xff] }
 0x163   : > { %v1528_v32 = vsel %vm1522_vm13, %v1495_v39, %v1246_v8  ;;  %v1120_v14 = vpop.permute.xlu1 %1119  ;;  %v1534_v19 = vsel %vm1522_vm13, %v1501_v43, %v1252_v61  ;;  %v857_v39 = vshrl.u32 %v269_v54, 16 }
 0x164   : > { %v1561_v12 = vsel %vm1555_vm14, %v1528_v32, %v1281_v7  ;;  %v1410_v8 = vsel %vm1390_vm9, %v3563_v20, %v1120_v14  ;;  %v271_v20 = vld [vmem:[%s2884_s24 + $0xd4] sm:$0x1]  ;;  %v868_v14 = vrot.slane %v866_v24, 5 }
 0x165   : > { %2670 = vmatmul.msk.bf16.gmra.mxu0 %vm1608_vm15, %v1561_v12  ;;  %v859_v48 = vrot.slane %v857_v39, 4  ;;  %v888_v43 = vrot.slane %v271_v20, 5 }
 0x167   : > { %1193 = vrot.lane.b32.xlu2 %v3389_v58, %s2828_s5  ;;  %v845_v58 = vsel %vm2918_vm2, %v840_v45, %v844_v13  ;;  %v876_v13 = vshll.u32 %v271_v20, 16 }
 0x168   : > { %1290 = vrot.lane.b32.xlu0 %v3358_v26, %s2829_s6  ;;  %v835_v26 = vsel %vm2918_vm2, %v830_v30, %v834_v42  ;;  %v1134_v40 = vunpack.c.l.b16 %v845_v58  ;;  %v870_v42 = vshrl.u32 %v270_v51, 16 }
 0x169   : > { %1164 = vrot.lane.b32.xlu1 %v3282_v57, %s2824_s27  ;;  %v3795_v57 = vpop.permute.xlu2 %1113  ;;  %v1133_v15 = vunpack.c.l.b16 %v835_v26 }
 0x16a   : > { %v1287_v7 = vpop.permute.xlu0 %1286  ;;  %v872_v18 = vrot.slane %v870_v42, 4 }
 0x16b   : > { %v1567_v9 = vsel %vm1555_vm14, %v1534_v19, %v1287_v7  ;;  %v1161_v38 = vpop.permute.xlu1 %1160  ;;  %v3800_v61 = vpack.c.b16 %v1134_v40, %v1133_v15  ;;  %v1416_v19 = vsel %vm1390_vm9, %v3591_v50, %v3715_v34  ;;  %v889_v34 = vsel %vm3207_vm5, %v887_v33, %v888_v43 }
 0x16c   : > { %2673 = vmatmul.msk.bf16.gmra.mxu1 %vm1608_vm15, %v1567_v9  ;;  %v1449_v9 = vsel %vm1423_vm10, %v1416_v19, %v1161_v38  ;;  %v873_v58 = vor.u32 %v872_v18, %v868_v14  ;;  %v878_v40 = vrot.slane %v876_v13, 5 }
 0x16f   : > { %1234 = vrot.lane.b32.xlu2 %v2707_v46, %s2827_s30 }
 0x170   : > { %1158 = vrot.lane.b32.xlu0 %v3243_v44, %s2824_s27  ;;  %v2586_v44 = vrot.slane %v3743_v3, 9  ;;  %v860_v3 = vshll.u32 %v269_v54, 16 }
 0x171   : > { %1228 = vrot.lane.b32.xlu1 %v3508_v62, %s2827_s30  ;;  %v853_v62 = vrot.slane %v851_v11, 4  ;;  %v3812_v25 = vpop.permute.xlu2 %1177 }
 0x172   : > { %v1155_v5 = vpop.permute.xlu0 %1154  ;;  %v852_v63 = vsel %vm3207_vm5, %v2586_v44, %v851_v11  ;;  %v862_v12 = vrot.slane %v860_v3, 5  ;;  %v1274_v11 = vunpack.c.l.b16 %v889_v34 }
 0x173   : > { %v1225_v31 = vpop.permute.xlu1 %1224  ;;  %v855_v4 = vsel %vm3207_vm5, %v853_v62, %v854_v53  ;;  %v1168_v32 = vunpack.c.l.b16 %v852_v63 }
 0x174   : > { %v1169_v16 = vunpack.c.l.b16 %v855_v4  ;;  %v863_v45 = vor.u32 %v862_v12, %v859_v48 }
 0x176   : > { %v1170_v30 = vpack.c.b16 %v1169_v16, %v1168_v32 }
 0x177   : > { %1298 = vrot.lane.b32.xlu2 %v3381_v27, %s2829_s6  ;;  %v1443_v27 = vsel %vm1423_vm10, %v1410_v8, %v1155_v5  ;;  %v874_v5 = vrot.slane %v873_v58, 4 }
 0x178   : > { %1199 = vrot.lane.b32.xlu0 %v3734_v56, %s2828_s5  ;;  %v1476_v29 = vsel %vm1456_vm11, %v1443_v27, %v3732_v10 }
 0x179   : > { %1269 = vrot.lane.b32.xlu1 %v3800_v61, %s2826_s29  ;;  %v1509_v22 = vsel %vm1489_vm12, %v1476_v29, %v1225_v31  ;;  %v1219_v26 = vpop.permute.xlu2 %1218 }
 0x17a   : > { %v1196_v21 = vpop.permute.xlu0 %1195 }
 0x17b   : > { %v1266_v59 = vpop.permute.xlu1 %1265  ;;  %v1482_v15 = vsel %vm1456_vm11, %v1449_v9, %v1196_v21 }
 0x17c   : > { %v1515_v38 = vsel %vm1489_vm12, %v1482_v15, %v3751_v52  ;;  %v879_v52 = vsel %vm2918_vm2, %v874_v5, %v878_v40 }
 0x17d   : > { %v1548_v44 = vsel %vm1522_vm13, %v1515_v38, %v1266_v59  ;;  %v1239_v59 = vunpack.c.l.b16 %v879_v52 }
 0x17f   : > { %1131 = vrot.lane.b32.xlu2 %v2707_v46, %s2825_s28  ;;  %v2708_v46 = vld [vmem:[%s2884_s24 + $0xcc] sm:$0xff] }
 0x180   : > { %1263 = vrot.lane.b32.xlu0 %v3217_v37, %s2826_s29  ;;  %v2587_v37 = vrot.slane %v269_v54, 9 }
 0x181   : > { %1096 = vrot.lane.b32.xlu1 %v3734_v56, %s2823_s26  ;;  %v1283_v51 = vpop.permute.xlu2 %1282 }
 0x182   : > { %v1260_v6 = vpop.permute.xlu0 %1259  ;;  %v886_v50 = vsel %vm3207_vm5, %v2587_v37, %v885_v28 }
 0x183   : > { %v1542_v10 = vsel %vm1522_vm13, %v1509_v22, %v1260_v6  ;;  %v1108_v7 = vpop.permute.xlu1 %1107  ;;  %v1273_v31 = vunpack.c.l.b16 %v886_v50 }
 0x184   : > { %v1575_v56 = vsel %vm1555_vm14, %v1542_v10, %v3775_v35  ;;  %v864_v35 = vrot.slane %v863_v45, 4 }
 0x185   : > { %2677 = vmatmul.msk.bf16.gmra.mxu2 %vm1608_vm15, %v1575_v56  ;;  %v1275_v21 = vpack.c.b16 %v1274_v11, %v1273_v31 }
 0x186   : > { %v869_v54 = vsel %vm2918_vm2, %v864_v35, %v868_v14 }
 0x187   : > { %1236 = vrot.lane.b32.xlu2 %v2708_v46, %s2827_s30  ;;  %v1238_v63 = vunpack.c.l.b16 %v869_v54 }
 0x188   : > { %1304 = vrot.lane.b32.xlu0 %v1170_v30, %s2829_s6 }
 0x189   : > { %1201 = vrot.lane.b32.xlu1 %v1170_v30, %s2828_s5  ;;  %v1240_v8 = vpack.c.b16 %v1239_v59, %v1238_v63  ;;  %v1128_v4 = vpop.permute.xlu2 %1127 }
 0x18a   : > { %v1301_v62 = vpop.permute.xlu0 %1300  ;;  %v1418_v11 = vsel %vm1390_vm9, %v3521_v2, %v1128_v4 }
 0x18b   : > { %v1581_v17 = vsel %vm1555_vm14, %v1548_v44, %v1301_v62  ;;  %v1149_v53 = vpop.permute.xlu1 %1148 }
 0x18c   : > { %2680 = vmatmul.msk.bf16.vlgmr.msra.gmra.mxu3 %vm1608_vm15, %v1581_v17 }
 0x190   : > { %1166 = vrot.lane.b32.xlu0 %v3800_v61, %s2824_s27  ;;  %v1398_v61 = vsel %vm1390_vm9, %v3524_v47, %v1108_v7  ;;  %v1404_v47 = vsel %vm1390_vm9, %v3542_v0, %v3795_v57 }
 0x191   : > { %1306 = vrot.lane.b32.xlu1 %v1275_v21, %s2829_s6  ;;  %v1192_v29 = vpop.permute.xlu2 %1191  ;;  %v1437_v22 = vsel %vm1423_vm10, %v1404_v47, %v1149_v53 }
 0x192   : > { %v1143_v39 = vpop.permute.xlu0 %1142 }
 0x193   : > { %v1213_v3 = vpop.permute.xlu1 %1212  ;;  %v1431_v27 = vsel %vm1423_vm10, %v1398_v61, %v1143_v39 }
 0x194   : > { %v1464_v28 = vsel %vm1456_vm11, %v1431_v27, %v3812_v25 }
 0x195   : > { %v1497_v16 = vsel %vm1489_vm12, %v1464_v28, %v1213_v3 }
 0x198   : > { %1271 = vrot.lane.b32.xlu0 %v1240_v8, %s2826_s29 }
 0x199   : > { %v1654_v24 = vpop.f32.mrf.mxu0  ;;  %v1233_v0 = vpop.permute.xlu2 %1232 }
 0x19a   : > { %1741 = vst [vmem:[%s3861_s14] sm:$0xff] %v1654_v24  ;;  %v1184_v23 = vpop.permute.xlu0 %1183 }
 0x19b   : > { %v1254_v42 = vpop.permute.xlu1 %1253  ;;  %v1470_v25 = vsel %vm1456_vm11, %v1437_v22, %v1184_v23 }
 0x19c   : > { %v1503_v6 = vsel %vm1489_vm12, %v1470_v25, %v1219_v26 }
 0x19d   : > { %v1536_v37 = vsel %vm1522_vm13, %v1503_v6, %v1254_v42 }
 0x1a1   : > { %v1656_v32 = vpop.f32.mrf.mxu0  ;;  %v1297_v30 = vpop.permute.xlu2 %1296 }
 0x1a2   : > { %1742 = vst [vmem:[%s3861_s14 + $0x8] sm:$0xff] %v1656_v32  ;;  %v1774_v48 = vadd.f32 %v1656_v32, %v1654_v24  ;;  %v1248_v12 = vpop.permute.xlu0 %1247 }
 0x1a3   : > { %v1530_v20 = vsel %vm1522_vm13, %v1497_v16, %v1248_v12  ;;  %v1122_v14 = vpop.permute.xlu1 %1121 }
 0x1a4   : > { %v1563_v18 = vsel %vm1555_vm14, %v1530_v20, %v1283_v51  ;;  %v1412_v46 = vsel %vm1390_vm9, %v3503_v1, %v1122_v14 }
 0x1a5   : > { %2671 = vmatmul.msk.bf16.gmra.mxu0 %vm1608_vm15, %v1563_v18 }
 0x1a9   : > { %v1151_v50 = vpop.permute.xlu2 %1150 }
 0x1aa   : > { %v1289_v33 = vpop.permute.xlu0 %1288 }
 0x1ab   : > { %v1569_v43 = vsel %vm1555_vm14, %v1536_v37, %v1289_v33  ;;  %v1163_v19 = vpop.permute.xlu1 %1162 }
 0x1ac   : > { %2674 = vmatmul.msk.bf16.gmra.mxu1 %vm1608_vm15, %v1569_v43  ;;  %v1451_v44 = vsel %vm1423_vm10, %v1418_v11, %v1163_v19 }
 0x1b1   : > { %v1256_v52 = vpop.permute.xlu2 %1255 }
 0x1b2   : > { %v1659_v57 = vpop.f32.mrf.mxu0  ;;  %v1157_v10 = vpop.permute.xlu0 %1156 }
 0x1b3   : > { %1743 = vst [vmem:[%s3861_s14 + $0x10] sm:$0xff] %v1659_v57  ;;  %v1775_v7 = vadd.f32 %v1774_v48, %v1659_v57  ;;  %v1227_v56 = vpop.permute.xlu1 %1226  ;;  %v1445_v15 = vsel %vm1423_vm10, %v1412_v46, %v1157_v10  ;;  %v1356_v46 = vsel %vm1308_vm6, %v3695_v36, %v3518_v49 }
 0x1b4   : > { %v1478_v34 = vsel %vm1456_vm11, %v1445_v15, %v1192_v29 }
 0x1b5   : > { %v1511_v40 = vsel %vm1489_vm12, %v1478_v34, %v1227_v56 }
 0x1b9   : > { %v3884_v45 = vpop.f32.mrf.mxu1  ;;  %v1130_v4 = vpop.permute.xlu2 %1129 }
 0x1ba   : > { %1749 = vst [vmem:[%s3861_s14 + $0x40] sm:$0xff] %v3884_v45  ;;  %v1661_v13 = vpop.f32.mrf.mxu0  ;;  %v1198_v9 = vpop.permute.xlu0 %1197  ;;  %v1420_v10 = vsel %vm1390_vm9, %v3620_v41, %v1130_v4 }
 0x1bb   : > { %1744 = vst [vmem:[%s3861_s14 + $0x18] sm:$0xff] %v1661_v13  ;;  %v1776_v26 = vadd.f32 %v1775_v7, %v1661_v13  ;;  %v1268_v58 = vpop.permute.xlu1 %1267  ;;  %v1484_v62 = vsel %vm1456_vm11, %v1451_v44, %v1198_v9 }
 0x1bc   : > { %v1517_v17 = vsel %vm1489_vm12, %v1484_v62, %v1233_v0 }
 0x1bd   : > { %v1550_v53 = vsel %vm1522_vm13, %v1517_v17, %v1268_v58 }
 0x1c1   : > { %v3893_v35 = vpop.f32.mrf.mxu1  ;;  %v1194_v28 = vpop.permute.xlu2 %1193 }
 0x1c2   : > { %1750 = vst [vmem:[%s3861_s14 + $0x48] sm:$0xff] %v3893_v35  ;;  %v1262_v38 = vpop.permute.xlu0 %1261 }
 0x1c3   : > { %v1544_v5 = vsel %vm1522_vm13, %v1511_v40, %v1262_v38  ;;  %v1116_v31 = vpop.permute.xlu1 %1115 }
 0x1c4   : > { %v1577_v1 = vsel %vm1555_vm14, %v1544_v5, %v1297_v30  ;;  %v1406_v63 = vsel %vm1390_vm9, %v3494_v60, %v1116_v31 }
 0x1c5   : > { %2678 = vmatmul.msk.bf16.gmra.mxu2 %vm1608_vm15, %v1577_v1  ;;  %v1439_v39 = vsel %vm1423_vm10, %v1406_v63, %v1151_v50 }
 0x1c9   : > { %v1235_v29 = vpop.permute.xlu2 %1234 }
 0x1ca   : > { %v1303_v54 = vpop.permute.xlu0 %1302 }
 0x1cb   : > { %v1583_v21 = vsel %vm1555_vm14, %v1550_v53, %v1303_v54  ;;  %v1221_v51 = vpop.permute.xlu1 %1220 }
 0x1cc   : > { %2681 = vmatmul.msk.bf16.gmra.mxu3 %vm1608_vm15, %v1583_v21 }
 0x1cf   : > { %v3909_v2 = vpop.f32.mrf.mxu2 }
 0x1d0   : > { %1757 = vst [vmem:[%s3861_s14 + $0x80] sm:$0xff] %v3909_v2 }
 0x1d1   : > { %v1299_v43 = vpop.permute.xlu2 %1298 }
 0x1d2   : > { %v1186_v59 = vpop.permute.xlu0 %1185 }
 0x1d3   : > { %v1124_v3 = vpop.permute.xlu1 %1123  ;;  %v1472_v8 = vsel %vm1456_vm11, %v1439_v39, %v1186_v59 }
 0x1d4   : > { %v1505_v24 = vsel %vm1489_vm12, %v1472_v8, %v1221_v51  ;;  %v1414_v25 = vsel %vm1390_vm9, %v3606_v55, %v1124_v3 }
 0x1d5   : > { %v1538_v60 = vsel %vm1522_vm13, %v1505_v24, %v1256_v52 }
 0x1d7   : > { %v3918_v23 = vpop.f32.mrf.mxu2 }
 0x1d8   : > { %1758 = vst [vmem:[%s3861_s14 + $0x88] sm:$0xff] %v3918_v23 }
 0x1d9   : > { %v1132_v41 = vpop.permute.xlu2 %1131 }
 0x1da   : > { %v1291_v42 = vpop.permute.xlu0 %1290 }
 0x1db   : > { %v1571_v61 = vsel %vm1555_vm14, %v1538_v60, %v1291_v42  ;;  %v1165_v27 = vpop.permute.xlu1 %1164 }
 0x1dc   : > { %2675 = vmatmul.msk.bf16.gmra.mxu1 %vm1608_vm15, %v1571_v61  ;;  %v1453_v56 = vsel %vm1423_vm10, %v1420_v10, %v1165_v27 }
 0x1e1   : > { %v1237_v31 = vpop.permute.xlu2 %1236 }
 0x1e2   : > { %v1664_v32 = vpop.f32.mrf.mxu0  ;;  %v1159_v16 = vpop.permute.xlu0 %1158 }
 0x1e3   : > { %1745 = vst [vmem:[%s3861_s14 + $0x20] sm:$0xff] %v1664_v32  ;;  %v1777_v48 = vadd.f32 %v1776_v26, %v1664_v32  ;;  %v1229_v12 = vpop.permute.xlu1 %1228  ;;  %v1447_v6 = vsel %vm1423_vm10, %v1414_v25, %v1159_v16 }
 0x1e4   : > { %v1480_v37 = vsel %vm1456_vm11, %v1447_v6, %v1194_v28 }
 0x1e5   : > { %v1513_v19 = vsel %vm1489_vm12, %v1480_v37, %v1229_v12 }
 0x1e9   : > { %v1679_v20 = vpop.f32.mrf.mxu1 }
 0x1ea   : > { %1751 = vst [vmem:[%s3861_s14 + $0x50] sm:$0xff] %v1679_v20  ;;  %v1666_v14 = vpop.f32.mrf.mxu0  ;;  %v1200_v47 = vpop.permute.xlu0 %1199 }
 0x1eb   : > { %1746 = vst [vmem:[%s3861_s14 + $0x28] sm:$0xff] %v1666_v14  ;;  %v1778_v18 = vadd.f32 %v1777_v48, %v1666_v14  ;;  %v1270_v22 = vpop.permute.xlu1 %1269  ;;  %v1486_v30 = vsel %vm1456_vm11, %v1453_v56, %v1200_v47 }
 0x1ec   : > { %v1519_v13 = vsel %vm1489_vm12, %v1486_v30, %v1235_v29 }
 0x1ed   : > { %v1552_v9 = vsel %vm1522_vm13, %v1519_v13, %v1270_v22 }
 0x1f1   : > { %v1681_v33 = vpop.f32.mrf.mxu1 }
 0x1f2   : > { %1752 = vst [vmem:[%s3861_s14 + $0x58] sm:$0xff] %v1681_v33  ;;  %v1264_v0 = vpop.permute.xlu0 %1263 }
 0x1f3   : > { %v1546_v57 = vsel %vm1522_vm13, %v1513_v19, %v1264_v0  ;;  %v1097_v55 = vpop.permute.xlu1 %1096 }
 0x1f4   : > { %v1579_v7 = vsel %vm1555_vm14, %v1546_v57, %v1299_v43  ;;  %v1389_v50 = vsel %vm1357_vm7, %v1356_v46, %v1097_v55  ;;  %v1773_v46 = vld [vmem:[#allocation2] sm:$0x1] }
 0x1f5   : > { %2679 = vmatmul.msk.bf16.gmra.mxu2 %vm1608_vm15, %v1579_v7  ;;  %v1422_v40 = vsel %vm1390_vm9, %v1389_v50, %v1132_v41 }
 0x1fa   : > { %v1305_v26 = vpop.permute.xlu0 %1304 }
 0x1fb   : > { %v1585_v58 = vsel %vm1555_vm14, %v1552_v9, %v1305_v26  ;;  %v1202_v15 = vpop.permute.xlu1 %1201 }
 0x1fc   : > { %2682 = vmatmul.msk.bf16.gmra.mxu3 %vm1608_vm15, %v1585_v58 }
 0x202   : > { %v1167_v34 = vpop.permute.xlu0 %1166 }
 0x203   : > { %v1455_v38 = vsel %vm1423_vm10, %v1422_v40, %v1167_v34  ;;  %v1307_v1 = vpop.permute.xlu1 %1306 }
 0x204   : > { %v1488_v5 = vsel %vm1456_vm11, %v1455_v38, %v1202_v15 }
 0x205   : > { %v1521_v49 = vsel %vm1489_vm12, %v1488_v5, %v1237_v31 }
 0x208   : > { %v1699_v11 = vpop.f32.mrf.mxu2 }
 0x209   : > { %1759 = vst [vmem:[%s3861_s14 + $0x90] sm:$0xff] %v1699_v11 }
 0x20a   : > { %v1272_v36 = vpop.permute.xlu0 %1271 }
 0x20b   : > { %v1554_v44 = vsel %vm1522_vm13, %v1521_v49, %v1272_v36 }
 0x20c   : > { %v1587_v62 = vsel %vm1555_vm14, %v1554_v44, %v1307_v1 }
 0x20d   : > { %2683 = vmatmul.msk.bf16.gmra.mxu3 %vm1608_vm15, %v1587_v62 }
 0x20f   : > { %v1714_v17 = vpop.f32.mrf.mxu3 }
 0x210   : > { %1765 = vst [vmem:[%s3861_s14 + $0xc0] sm:$0xff] %v1714_v17  ;;  %v1701_v53 = vpop.f32.mrf.mxu2 }
 0x211   : > { %1760 = vst [vmem:[%s3861_s14 + $0x98] sm:$0xff] %v1701_v53 }
 0x217   : > { %v1716_v54 = vpop.f32.mrf.mxu3 }
 0x218   : > { %1766 = vst [vmem:[%s3861_s14 + $0xc8] sm:$0xff] %v1716_v54 }
 0x222   : > { %v1669_v52 = vpop.f32.mrf.mxu0 }
 0x223   : > { %1747 = vst [vmem:[%s3861_s14 + $0x30] sm:$0xff] %v1669_v52  ;;  %v1779_v21 = vadd.f32 %v1778_v18, %v1669_v52 }
 0x229   : > { %v1684_v51 = vpop.f32.mrf.mxu1 }
 0x22a   : > { %1753 = vst [vmem:[%s3861_s14 + $0x60] sm:$0xff] %v1684_v51  ;;  %v1671_v63 = vpop.f32.mrf.mxu0 }
 0x22b   : > { %1748 = vst [vmem:[%s3861_s14 + $0x38] sm:$0xff] %v1671_v63  ;;  %v1780_v59 = vadd.f32 %v1779_v21, %v1671_v63 }
 0x22d   : > { %v1781_v39 = vadd.f32 %v1780_v59, %v3884_v45 }
 0x22f   : > { %v1782_v3 = vadd.f32 %v1781_v39, %v3893_v35 }
 0x231   : > { %v1783_v8 = vadd.f32 %v1782_v3, %v1679_v20  ;;  %v1686_v4 = vpop.f32.mrf.mxu1 }
 0x232   : > { %1754 = vst [vmem:[%s3861_s14 + $0x68] sm:$0xff] %v1686_v4 }
 0x233   : > { %v1784_v24 = vadd.f32 %v1783_v8, %v1681_v33 }
 0x235   : > { %v1785_v42 = vadd.f32 %v1784_v24, %v1684_v51 }
 0x237   : > { %v1786_v60 = vadd.f32 %v1785_v42, %v1686_v4 }
 0x248   : > { %v1704_v61 = vpop.f32.mrf.mxu2 }
 0x249   : > { %1761 = vst [vmem:[%s3861_s14 + $0xa0] sm:$0xff] %v1704_v61 }
 0x24f   : > { %v1719_v27 = vpop.f32.mrf.mxu3 }
 0x250   : > { %1767 = vst [vmem:[%s3861_s14 + $0xd0] sm:$0xff] %v1719_v27  ;;  %v1706_v28 = vpop.f32.mrf.mxu2 }
 0x251   : > { %1762 = vst [vmem:[%s3861_s14 + $0xa8] sm:$0xff] %v1706_v28 }
 0x257   : > { %v1721_v32 = vpop.f32.mrf.mxu3 }
 0x258   : > { %1768 = vst [vmem:[%s3861_s14 + $0xd8] sm:$0xff] %v1721_v32 }
 0x259   : > { %v1689_v45 = vpop.f32.mrf.mxu1 }
 0x25a   : > { %1755 = vst [vmem:[%s3861_s14 + $0x70] sm:$0xff] %v1689_v45  ;;  %v1787_v16 = vadd.f32 %v1786_v60, %v1689_v45 }
 0x261   : > { %v1691_v35 = vpop.f32.mrf.mxu1 }
 0x262   : > { %1756 = vst [vmem:[%s3861_s14 + $0x78] sm:$0xff] %v1691_v35  ;;  %v1788_v48 = vadd.f32 %v1787_v16, %v1691_v35 }
 0x264   : > { %v1789_v12 = vadd.f32 %v1788_v48, %v3909_v2 }
 0x266   : > { %v1790_v29 = vadd.f32 %v1789_v12, %v3918_v23 }
 0x268   : > { %v1791_v20 = vadd.f32 %v1790_v29, %v1699_v11 }
 0x26a   : > { %v1792_v14 = vadd.f32 %v1791_v20, %v1701_v53 }
 0x26c   : > { %v1793_v18 = vadd.f32 %v1792_v14, %v1704_v61 }
 0x26e   : > { %v1794_v22 = vadd.f32 %v1793_v18, %v1706_v28 }
 0x278   : > { %v1709_v47 = vpop.f32.mrf.mxu2 }
 0x279   : > { %1763 = vst [vmem:[%s3861_s14 + $0xb0] sm:$0xff] %v1709_v47  ;;  %v1795_v25 = vadd.f32 %v1794_v22, %v1709_v47 }
 0x27f   : > { %v1724_v6 = vpop.f32.mrf.mxu3 }
 0x280   : > { %1769 = vst [vmem:[%s3861_s14 + $0xe0] sm:$0xff] %v1724_v6  ;;  %v1711_v37 = vpop.f32.mrf.mxu2 }
 0x281   : > { %1764 = vst [vmem:[%s3861_s14 + $0xb8] sm:$0xff] %v1711_v37  ;;  %v1796_v33 = vadd.f32 %v1795_v25, %v1711_v37 }
 0x283   : > { %v1797_v43 = vadd.f32 %v1796_v33, %v1714_v17 }
 0x285   : > { %v1798_v19 = vadd.f32 %v1797_v43, %v1716_v54 }
 0x287   : > { %v1726_v2 = vpop.f32.mrf.mxu3  ;;  %v1799_v23 = vadd.f32 %v1798_v19, %v1719_v27 }
 0x288   : > { %1770 = vst [vmem:[%s3861_s14 + $0xe8] sm:$0xff] %v1726_v2 }
 0x289   : > { %v1800_v0 = vadd.f32 %v1799_v23, %v1721_v32 }
 0x28b   : > { %v1801_v10 = vadd.f32 %v1800_v0, %v1724_v6 }
 0x28d   : > { %v1802_v7 = vadd.f32 %v1801_v10, %v1726_v2 }
 0x290   : > { %v1729_v57 = vpop.f32.mrf.mxu3 }
 0x291   : > { %1771 = vst [vmem:[%s3861_s14 + $0xf0] sm:$0xff] %v1729_v57  ;;  %v1803_v56 = vadd.f32 %v1802_v7, %v1729_v57 }
 0x298   : > { %v1731_v55 = vpop.f32.mrf.mxu3 }
 0x299   : > { %1772 = vst [vmem:[%s3861_s14 + $0xf8] sm:$0xff] %v1731_v55  ;;  %v1804_v30 = vadd.f32 %v1803_v56, %v1731_v55 }
 0x29b   : > { %v1805_v13 = vrot.slane %v1804_v30, 4 }
 0x29d   : > { %v1806_v9 = vadd.f32 %v1805_v13, %v1804_v30 }
 0x29f   : > { %v1807_v26 = vrot.slane %v1806_v9, 2 }
 0x2a1   : > { %v1808_v58 = vadd.f32 %v1807_v26, %v1806_v9 }
 0x2a3   : > { %v1809_v41 = vrot.slane %v1808_v58, 1 }
 0x2a5   : > { %v1810_v15 = vadd.f32 %v1809_v41, %v1808_v58  ;;  %1817 = sbr.rel (!%p1813_p6) target bundleno = 947 (0x3b3), region = 44 }
 0x2a7   : > { %v1811_v50 = vadd.f32 %v1810_v15, %v1773_v46 }
 0x2a9   : > { %1812 = vst [vmem:[#allocation2] sm:$0x1] %v1811_v50 }
 0x2aa   : > { %v3988_v5 = vld [vmem:[#allocation3] sm:$0xff]  ;;  %v3990_v31 = vld [vmem:[#allocation3 + $0x8] sm:$0xff]  ;;  %v3992_v11 = vld [vmem:[#allocation3 + $0x10] sm:$0xff] }
 0x2ab   : > { %v3998_v36 = vld [vmem:[#allocation3 + $0x18] sm:$0xff]  ;;  %v4002_v62 = vld [vmem:[#allocation3 + $0x20] sm:$0xff]  ;;  %v4006_v52 = vld [vmem:[#allocation3 + $0x28] sm:$0xff] }
 0x2ac   : > { %v4010_v63 = vld [vmem:[#allocation3 + $0x30] sm:$0xff]  ;;  %v4014_v8 = vld [vmem:[#allocation3 + $0x38] sm:$0xff]  ;;  %v4018_v60 = vld [vmem:[#allocation3 + $0x40] sm:$0xff] }
 0x2ad   : > { %v4022_v32 = vld [vmem:[#allocation3 + $0x48] sm:$0xff]  ;;  %v4026_v48 = vld [vmem:[#allocation3 + $0x50] sm:$0xff]  ;;  %v4030_v14 = vld [vmem:[#allocation3 + $0x58] sm:$0xff] }
 0x2ae   : > { %v4034_v25 = vld [vmem:[#allocation3 + $0x60] sm:$0xff]  ;;  %v4038_v43 = vld [vmem:[#allocation3 + $0x68] sm:$0xff]  ;;  %v4042_v0 = vld [vmem:[#allocation3 + $0x70] sm:$0xff] }
 0x2af   : > { %v4046_v56 = vld [vmem:[#allocation3 + $0x78] sm:$0xff]  ;;  %v4050_v9 = vld [vmem:[#allocation3 + $0x80] sm:$0xff]  ;;  %v4054_v46 = vld [vmem:[#allocation3 + $0x88] sm:$0xff] }
 0x2b0   : > { %v1818_v34 = vld [vmem:[#allocation2] sm:$0x1] }
 0x2b1   : > { %v3983_v40 = vmul.f32 0.001953125, %v1818_v34 }
 0x2b3   : > { %v3986_v38 = vperm.slane %v3983_v40, 0 }
 0x2b5   : > { %v1887_v1 = vsub.f32 %v3988_v5, %v3986_v38  ;;  %v1888_v49 = vsub.f32 %v3990_v31, %v3986_v38  ;;  %v1889_v44 = vsub.f32 %v3992_v11, %v3986_v38  ;;  %v1890_v17 = vsub.f32 %v3998_v36, %v3986_v38 }
 0x2b6   : > { %v1891_v21 = vsub.f32 %v4002_v62, %v3986_v38  ;;  %v1892_v59 = vsub.f32 %v4006_v52, %v3986_v38  ;;  %v1893_v4 = vsub.f32 %v4010_v63, %v3986_v38  ;;  %v1894_v61 = vsub.f32 %v4014_v8, %v3986_v38 }
 0x2b7   : > { %v1951_v53 = vmul.f32 %v1887_v1, %v1887_v1  ;;  %v1952_v54 = vmul.f32 %v1888_v49, %v1888_v49  ;;  %v1953_v51 = vmul.f32 %v1889_v44, %v1889_v44  ;;  %v1954_v39 = vmul.f32 %v1890_v17, %v1890_v17  ;;  %v4058_v1 = vld [vmem:[#allocation3 + $0x90] sm:$0xff] }
 0x2b8   : > { %v1955_v24 = vmul.f32 %v1891_v21, %v1891_v21  ;;  %v1956_v27 = vmul.f32 %v1892_v59, %v1892_v59  ;;  %v1895_v45 = vsub.f32 %v4018_v60, %v3986_v38  ;;  %v1957_v35 = vmul.f32 %v1893_v4, %v1893_v4  ;;  %v4066_v59 = vld [vmem:[#allocation3 + $0xa0] sm:$0xff] }
 0x2b9   : > { %v2015_v3 = vadd.f32 %v1952_v54, %v1951_v53  ;;  %v1896_v12 = vsub.f32 %v4022_v32, %v3986_v38  ;;  %v1958_v29 = vmul.f32 %v1894_v61, %v1894_v61  ;;  %v1897_v47 = vsub.f32 %v4026_v48, %v3986_v38  ;;  %v4062_v53 = vld [vmem:[#allocation3 + $0x98] sm:$0xff] }
 0x2ba   : > { %v1959_v18 = vmul.f32 %v1895_v45, %v1895_v45  ;;  %v1898_v6 = vsub.f32 %v4030_v14, %v3986_v38  ;;  %v1899_v19 = vsub.f32 %v4034_v25, %v3986_v38  ;;  %v1900_v57 = vsub.f32 %v4038_v43, %v3986_v38 }
 0x2bb   : > { %v2016_v42 = vadd.f32 %v2015_v3, %v1953_v51  ;;  %v1960_v37 = vmul.f32 %v1896_v12, %v1896_v12  ;;  %v1961_v2 = vmul.f32 %v1897_v47, %v1897_v47  ;;  %v1901_v55 = vsub.f32 %v4042_v0, %v3986_v38  ;;  %v4078_v12 = vld [vmem:[#allocation3 + $0xb8] sm:$0xff] }
 0x2bc   : > { %v1962_v10 = vmul.f32 %v1898_v6, %v1898_v6  ;;  %v1963_v30 = vmul.f32 %v1899_v19, %v1899_v19  ;;  %v1902_v26 = vsub.f32 %v4046_v56, %v3986_v38  ;;  %v1964_v58 = vmul.f32 %v1900_v57, %v1900_v57  ;;  %v4090_v57 = vld [vmem:[#allocation3 + $0xd0] sm:$0xff] }
 0x2bd   : > { %v2017_v28 = vadd.f32 %v2016_v42, %v1954_v39  ;;  %v1903_v15 = vsub.f32 %v4050_v9, %v3986_v38  ;;  %v1965_v50 = vmul.f32 %v1901_v55, %v1901_v55  ;;  %v1904_v49 = vsub.f32 %v4054_v46, %v3986_v38 }
 0x2be   : > { %v1966_v44 = vmul.f32 %v1902_v26, %v1902_v26  ;;  %v1905_v54 = vsub.f32 %v4058_v1, %v3986_v38  ;;  %v1906_v39 = vsub.f32 %v4062_v53, %v3986_v38  ;;  %v1907_v42 = vsub.f32 %v4066_v59, %v3986_v38 }
 0x2bf   : > { %v2018_v16 = vadd.f32 %v2017_v28, %v1955_v24  ;;  %v1967_v21 = vmul.f32 %v1903_v15, %v1903_v15  ;;  %v1968_v3 = vmul.f32 %v1904_v49, %v1904_v49  ;;  %v4070_v24 = vld [vmem:[#allocation3 + $0xa8] sm:$0xff]  ;;  %v4074_v28 = vld [vmem:[#allocation3 + $0xb0] sm:$0xff] }
 0x2c0   : > { %v1969_v61 = vmul.f32 %v1905_v54, %v1905_v54  ;;  %v1908_v45 = vsub.f32 %v4070_v24, %v3986_v38  ;;  %v4102_v49 = vld [vmem:[#allocation3 + $0xe8] sm:$0xff] }
 0x2c1   : > { %v2019_v20 = vadd.f32 %v2018_v16, %v1956_v27 }
 0x2c2   : > { %v1972_v6 = vmul.f32 %v1908_v45, %v1908_v45  ;;  %v4114_v45 = vld [vmem:[#allocation3 + $0x100] sm:$0xff] }
 0x2c3   : > { %v2020_v22 = vadd.f32 %v2019_v20, %v1957_v35  ;;  %v1970_v35 = vmul.f32 %v1906_v39, %v1906_v39  ;;  %v1971_v20 = vmul.f32 %v1907_v42, %v1907_v42 }
 0x2c5   : > { %v2021_v33 = vadd.f32 %v2020_v22, %v1958_v29  ;;  %v1909_v29 = vsub.f32 %v4074_v28, %v3986_v38  ;;  %v1910_v22 = vsub.f32 %v4078_v12, %v3986_v38 }
 0x2c7   : > { %v2022_v23 = vadd.f32 %v2021_v33, %v1959_v18  ;;  %v4082_v18 = vld [vmem:[#allocation3 + $0xc0] sm:$0xff]  ;;  %v4086_v33 = vld [vmem:[#allocation3 + $0xc8] sm:$0xff] }
 0x2c8   : > { %v1911_v19 = vsub.f32 %v4082_v18, %v3986_v38 }
 0x2c9   : > { %v2023_v7 = vadd.f32 %v2022_v23, %v1960_v37 }
 0x2ca   : > { %v1975_v26 = vmul.f32 %v1911_v19, %v1911_v19 }
 0x2cb   : > { %v2024_v13 = vadd.f32 %v2023_v7, %v1961_v2  ;;  %v1973_v2 = vmul.f32 %v1909_v29, %v1909_v29  ;;  %v1974_v7 = vmul.f32 %v1910_v22, %v1910_v22 }
 0x2cd   : > { %v2025_v41 = vadd.f32 %v2024_v13, %v1962_v10  ;;  %v1912_v10 = vsub.f32 %v4086_v33, %v3986_v38  ;;  %v1913_v13 = vsub.f32 %v4090_v57, %v3986_v38 }
 0x2cf   : > { %v2026_v34 = vadd.f32 %v2025_v41, %v1963_v30  ;;  %v4094_v30 = vld [vmem:[#allocation3 + $0xd8] sm:$0xff]  ;;  %v4098_v41 = vld [vmem:[#allocation3 + $0xe0] sm:$0xff] }
 0x2d0   : > { %v1914_v15 = vsub.f32 %v4094_v30, %v3986_v38 }
 0x2d1   : > { %v2027_v17 = vadd.f32 %v2026_v34, %v1964_v58 }
 0x2d2   : > { %v1978_v39 = vmul.f32 %v1914_v15, %v1914_v15 }
 0x2d3   : > { %v2028_v51 = vadd.f32 %v2027_v17, %v1965_v50  ;;  %v1976_v50 = vmul.f32 %v1912_v10, %v1912_v10  ;;  %v1977_v17 = vmul.f32 %v1913_v13, %v1913_v13  ;;  %v4126_v10 = vld [vmem:[#allocation3 + $0x118] sm:$0xff] }
 0x2d5   : > { %v2029_v4 = vadd.f32 %v2028_v51, %v1966_v44  ;;  %v1915_v44 = vsub.f32 %v4098_v41, %v3986_v38  ;;  %v1916_v51 = vsub.f32 %v4102_v49, %v3986_v38 }
 0x2d7   : > { %v2030_v27 = vadd.f32 %v2029_v4, %v1967_v21  ;;  %v4106_v21 = vld [vmem:[#allocation3 + $0xf0] sm:$0xff]  ;;  %v4110_v4 = vld [vmem:[#allocation3 + $0xf8] sm:$0xff] }
 0x2d8   : > { %v1917_v42 = vsub.f32 %v4106_v21, %v3986_v38 }
 0x2d9   : > { %v2031_v16 = vadd.f32 %v2030_v27, %v1968_v3 }
 0x2da   : > { %v1981_v22 = vmul.f32 %v1917_v42, %v1917_v42 }
 0x2db   : > { %v2032_v47 = vadd.f32 %v2031_v16, %v1969_v61  ;;  %v1979_v61 = vmul.f32 %v1915_v44, %v1915_v44  ;;  %v1980_v16 = vmul.f32 %v1916_v51, %v1916_v51  ;;  %v4138_v51 = vld [vmem:[#allocation3 + $0x130] sm:$0xff] }
 0x2dc   : > { %4556 = vst [vmem:[#allocation23_spill] sm:$0xff] %v4138_v51 }
 0x2dd   : > { %v2033_v37 = vadd.f32 %v2032_v47, %v1970_v35  ;;  %v1918_v35 = vsub.f32 %v4110_v4, %v3986_v38  ;;  %v1919_v47 = vsub.f32 %v4114_v45, %v3986_v38 }
 0x2df   : > { %v2034_v23 = vadd.f32 %v2033_v37, %v1971_v20  ;;  %v4118_v20 = vld [vmem:[#allocation3 + $0x108] sm:$0xff]  ;;  %v4122_v37 = vld [vmem:[#allocation3 + $0x110] sm:$0xff] }
 0x2e0   : > { %v1920_v19 = vsub.f32 %v4118_v20, %v3986_v38 }
 0x2e1   : > { %v2035_v55 = vadd.f32 %v2034_v23, %v1972_v6 }
 0x2e2   : > { %v1984_v15 = vmul.f32 %v1920_v19, %v1920_v19  ;;  %v4150_v19 = vld [vmem:[#allocation3 + $0x148] sm:$0xff] }
 0x2e3   : > { %v2036_v58 = vadd.f32 %v2035_v55, %v1973_v2  ;;  %v1982_v2 = vmul.f32 %v1918_v35, %v1918_v35  ;;  %v1983_v55 = vmul.f32 %v1919_v47, %v1919_v47  ;;  %4559 = vst [vmem:[#allocation26_spill] sm:$0xff] %v4150_v19 }
 0x2e5   : > { %v2037_v34 = vadd.f32 %v2036_v58, %v1974_v7  ;;  %v1921_v7 = vsub.f32 %v4122_v37, %v3986_v38  ;;  %v1922_v58 = vsub.f32 %v4126_v10, %v3986_v38 }
 0x2e7   : > { %v2038_v54 = vadd.f32 %v2037_v34, %v1975_v26  ;;  %v4130_v26 = vld [vmem:[#allocation3 + $0x120] sm:$0xff]  ;;  %v4134_v34 = vld [vmem:[#allocation3 + $0x128] sm:$0xff] }
 0x2e8   : > { %4555 = vst [vmem:[#allocation22_spill] sm:$0xff] %v4134_v34  ;;  %v1923_v44 = vsub.f32 %v4130_v26, %v3986_v38 }
 0x2e9   : > { %v2039_v3 = vadd.f32 %v2038_v54, %v1976_v50 }
 0x2ea   : > { %v1987_v35 = vmul.f32 %v1923_v44, %v1923_v44 }
 0x2eb   : > { %v2040_v27 = vadd.f32 %v2039_v3, %v1977_v17  ;;  %v1985_v17 = vmul.f32 %v1921_v7, %v1921_v7  ;;  %v1986_v3 = vmul.f32 %v1922_v58, %v1922_v58 }
 0x2ed   : > { %v2041_v29 = vadd.f32 %v2040_v27, %v1978_v39  ;;  %v1924_v39 = vsub.f32 %v4134_v34, %v3986_v38  ;;  %v1925_v27 = vsub.f32 %v4138_v51, %v3986_v38 }
 0x2ef   : > { %v2042_v6 = vadd.f32 %v2041_v29, %v1979_v61  ;;  %v4142_v61 = vld [vmem:[#allocation3 + $0x138] sm:$0xff]  ;;  %v4146_v29 = vld [vmem:[#allocation3 + $0x140] sm:$0xff] }
 0x2f0   : > { %4557 = vst [vmem:[#allocation24_spill] sm:$0xff] %v4142_v61  ;;  %v1926_v47 = vsub.f32 %v4142_v61, %v3986_v38 }
 0x2f1   : > { %v2043_v23 = vadd.f32 %v2042_v6, %v1980_v16  ;;  %4558 = vst [vmem:[#allocation25_spill] sm:$0xff] %v4146_v29 }
 0x2f2   : > { %v1990_v58 = vmul.f32 %v1926_v47, %v1926_v47 }
 0x2f3   : > { %v2044_v13 = vadd.f32 %v2043_v23, %v1981_v22  ;;  %v1988_v22 = vmul.f32 %v1924_v39, %v1924_v39  ;;  %v1989_v23 = vmul.f32 %v1925_v27, %v1925_v27  ;;  %v4162_v39 = vld [vmem:[#allocation3 + $0x160] sm:$0xff] }
 0x2f4   : > { %4562 = vst [vmem:[#allocation29_spill] sm:$0xff] %v4162_v39 }
 0x2f5   : > { %v2045_v50 = vadd.f32 %v2044_v13, %v1982_v2  ;;  %v1927_v2 = vsub.f32 %v4146_v29, %v3986_v38  ;;  %v1928_v13 = vsub.f32 %v4150_v19, %v3986_v38 }
 0x2f7   : > { %v2046_v54 = vadd.f32 %v2045_v50, %v1983_v55  ;;  %v4154_v55 = vld [vmem:[#allocation3 + $0x150] sm:$0xff]  ;;  %v4158_v50 = vld [vmem:[#allocation3 + $0x158] sm:$0xff] }
 0x2f8   : > { %4560 = vst [vmem:[#allocation27_spill] sm:$0xff] %v4154_v55  ;;  %v1929_v44 = vsub.f32 %v4154_v55, %v3986_v38 }
 0x2f9   : > { %v2047_v42 = vadd.f32 %v2046_v54, %v1984_v15  ;;  %4561 = vst [vmem:[#allocation28_spill] sm:$0xff] %v4158_v50 }
 0x2fa   : > { %v1993_v47 = vmul.f32 %v1929_v44, %v1929_v44 }
 0x2fb   : > { %v2048_v16 = vadd.f32 %v2047_v42, %v1985_v17  ;;  %v1991_v17 = vmul.f32 %v1927_v2, %v1927_v2  ;;  %v1992_v42 = vmul.f32 %v1928_v13, %v1928_v13 }
 0x2fd   : > { %v2049_v6 = vadd.f32 %v2048_v16, %v1986_v3  ;;  %v1930_v3 = vsub.f32 %v4158_v50, %v3986_v38  ;;  %v1931_v16 = vsub.f32 %v4162_v39, %v3986_v38  ;;  %v4178_v50 = vld [vmem:[#allocation3 + $0x180] sm:$0xff]  ;;  %v4182_v39 = vld [vmem:[#allocation3 + $0x188] sm:$0xff] }
 0x2fe   : > { %4566 = vst [vmem:[#allocation33_spill] sm:$0xff] %v4178_v50 }
 0x2ff   : > { %v2050_v7 = vadd.f32 %v2049_v6, %v1987_v35  ;;  %v4166_v35 = vld [vmem:[#allocation3 + $0x168] sm:$0xff]  ;;  %v4170_v6 = vld [vmem:[#allocation3 + $0x170] sm:$0xff]  ;;  %4567 = vst [vmem:[#allocation34_spill] sm:$0xff] %v4182_v39 }
 0x300   : > { %4563 = vst [vmem:[#allocation30_spill] sm:$0xff] %v4166_v35  ;;  %v1932_v2 = vsub.f32 %v4166_v35, %v3986_v38  ;;  %v1933_v13 = vsub.f32 %v4170_v6, %v3986_v38  ;;  %v4186_v35 = vld [vmem:[#allocation3 + $0x190] sm:$0xff] }
 0x301   : > { %v2051_v15 = vadd.f32 %v2050_v7, %v1988_v22  ;;  %4564 = vst [vmem:[#allocation31_spill] sm:$0xff] %v4170_v6  ;;  %v4190_v6 = vld [vmem:[#allocation3 + $0x198] sm:$0xff] }
 0x302   : > { %4568 = vst [vmem:[#allocation35_spill] sm:$0xff] %v4186_v35 }
 0x303   : > { %v2052_v54 = vadd.f32 %v2051_v15, %v1989_v23  ;;  %v1994_v23 = vmul.f32 %v1930_v3, %v1930_v3  ;;  %v4174_v15 = vld [vmem:[#allocation3 + $0x178] sm:$0xff]  ;;  %v1935_v3 = vsub.f32 %v4178_v50, %v3986_v38  ;;  %4569 = vst [vmem:[#allocation36_spill] sm:$0xff] %v4190_v6  ;;  %v4198_v50 = vld [vmem:[#allocation3 + $0x1a8] sm:$0xff] }
 0x304   : > { %4565 = vst [vmem:[#allocation32_spill] sm:$0xff] %v4174_v15  ;;  %v1934_v44 = vsub.f32 %v4174_v15, %v3986_v38  ;;  %v4194_v15 = vld [vmem:[#allocation3 + $0x1a0] sm:$0xff] }
 0x305   : > { %v2053_v27 = vadd.f32 %v2052_v54, %v1990_v58  ;;  %v1995_v58 = vmul.f32 %v1931_v16, %v1931_v16  ;;  %v1936_v16 = vsub.f32 %v4182_v39, %v3986_v38  ;;  %4570 = vst [vmem:[#allocation37_spill] sm:$0xff] %v4194_v15  ;;  %v4202_v39 = vld [vmem:[#allocation3 + $0x1b0] sm:$0xff] }
 0x306   : > { %4571 = vst [vmem:[#allocation38_spill] sm:$0xff] %v4198_v50 }
 0x307   : > { %v2054_v22 = vadd.f32 %v2053_v27, %v1991_v17  ;;  %v1996_v17 = vmul.f32 %v1932_v2, %v1932_v2  ;;  %v1937_v2 = vsub.f32 %v4186_v35, %v3986_v38  ;;  %4572 = vst [vmem:[#allocation39_spill] sm:$0xff] %v4202_v39  ;;  %v4206_v35 = vld [vmem:[#allocation3 + $0x1b8] sm:$0xff] }
 0x308   : > { %4573 = vst [vmem:[#allocation40_spill] sm:$0xff] %v4206_v35 }
 0x309   : > { %v2055_v7 = vadd.f32 %v2054_v22, %v1992_v42  ;;  %v1997_v42 = vmul.f32 %v1933_v13, %v1933_v13  ;;  %v1938_v13 = vsub.f32 %v4190_v6, %v3986_v38  ;;  %v4210_v6 = vld [vmem:[#allocation3 + $0x1c0] sm:$0xff] }
 0x30a   : > { %4574 = vst [vmem:[#allocation41_spill] sm:$0xff] %v4210_v6 }
 0x30b   : > { %v2056_v54 = vadd.f32 %v2055_v7, %v1993_v47  ;;  %v1998_v47 = vmul.f32 %v1934_v44, %v1934_v44  ;;  %v1939_v44 = vsub.f32 %v4194_v15, %v3986_v38  ;;  %v4214_v15 = vld [vmem:[#allocation3 + $0x1c8] sm:$0xff] }
 0x30c   : > { %4575 = vst [vmem:[#allocation42_spill] sm:$0xff] %v4214_v15 }
 0x30d   : > { %v2057_v27 = vadd.f32 %v2056_v54, %v1994_v23  ;;  %v1999_v23 = vmul.f32 %v1935_v3, %v1935_v3  ;;  %v1940_v3 = vsub.f32 %v4198_v50, %v3986_v38  ;;  %v4218_v50 = vld [vmem:[#allocation3 + $0x1d0] sm:$0xff] }
 0x30e   : > { %4576 = vst [vmem:[#allocation43_spill] sm:$0xff] %v4218_v50 }
 0x30f   : > { %v2058_v22 = vadd.f32 %v2057_v27, %v1995_v58  ;;  %v2000_v58 = vmul.f32 %v1936_v16, %v1936_v16  ;;  %v1941_v16 = vsub.f32 %v4202_v39, %v3986_v38  ;;  %v4222_v39 = vld [vmem:[#allocation3 + $0x1d8] sm:$0xff] }
 0x310   : > { %4577 = vst [vmem:[#allocation44_spill] sm:$0xff] %v4222_v39 }
 0x311   : > { %v2059_v7 = vadd.f32 %v2058_v22, %v1996_v17  ;;  %v2001_v17 = vmul.f32 %v1937_v2, %v1937_v2  ;;  %v1942_v2 = vsub.f32 %v4206_v35, %v3986_v38  ;;  %v4226_v35 = vld [vmem:[#allocation3 + $0x1e0] sm:$0xff] }
 0x312   : > { %4578 = vst [vmem:[#allocation45_spill] sm:$0xff] %v4226_v35 }
 0x313   : > { %v2060_v54 = vadd.f32 %v2059_v7, %v1997_v42  ;;  %v2002_v42 = vmul.f32 %v1938_v13, %v1938_v13  ;;  %v1943_v13 = vsub.f32 %v4210_v6, %v3986_v38  ;;  %v4230_v6 = vld [vmem:[#allocation3 + $0x1e8] sm:$0xff] }
 0x314   : > { %4579 = vst [vmem:[#allocation46_spill] sm:$0xff] %v4230_v6 }
 0x315   : > { %v2061_v27 = vadd.f32 %v2060_v54, %v1998_v47  ;;  %v2003_v47 = vmul.f32 %v1939_v44, %v1939_v44  ;;  %v1944_v44 = vsub.f32 %v4214_v15, %v3986_v38  ;;  %v4234_v15 = vld [vmem:[#allocation3 + $0x1f0] sm:$0xff] }
 0x316   : > { %4580 = vst [vmem:[#allocation47_spill] sm:$0xff] %v4234_v15 }
 0x317   : > { %v2062_v22 = vadd.f32 %v2061_v27, %v1999_v23  ;;  %v2004_v23 = vmul.f32 %v1940_v3, %v1940_v3  ;;  %v1945_v3 = vsub.f32 %v4218_v50, %v3986_v38  ;;  %v4238_v50 = vld [vmem:[#allocation3 + $0x1f8] sm:$0xff] }
 0x319   : > { %v2063_v7 = vadd.f32 %v2062_v22, %v2000_v58  ;;  %v2005_v58 = vmul.f32 %v1941_v16, %v1941_v16  ;;  %v1946_v16 = vsub.f32 %v4222_v39, %v3986_v38  ;;  %v1950_v39 = vsub.f32 %v4238_v50, %v3986_v38 }
 0x31b   : > { %v2064_v54 = vadd.f32 %v2063_v7, %v2001_v17  ;;  %v2006_v17 = vmul.f32 %v1942_v2, %v1942_v2  ;;  %v1947_v2 = vsub.f32 %v4226_v35, %v3986_v38  ;;  %v2014_v55 = vmul.f32 %v1950_v39, %v1950_v39 }
 0x31d   : > { %v2065_v27 = vadd.f32 %v2064_v54, %v2002_v42  ;;  %v2007_v42 = vmul.f32 %v1943_v13, %v1943_v13  ;;  %v1948_v13 = vsub.f32 %v4230_v6, %v3986_v38 }
 0x31f   : > { %v2066_v22 = vadd.f32 %v2065_v27, %v2003_v47  ;;  %v2008_v47 = vmul.f32 %v1944_v44, %v1944_v44  ;;  %v1949_v44 = vsub.f32 %v4234_v15, %v3986_v38  ;;  %v2012_v35 = vmul.f32 %v1948_v13, %v1948_v13 }
 0x321   : > { %v2067_v7 = vadd.f32 %v2066_v22, %v2004_v23  ;;  %v2009_v23 = vmul.f32 %v1945_v3, %v1945_v3 }
 0x323   : > { %v2068_v54 = vadd.f32 %v2067_v7, %v2005_v58  ;;  %v2010_v58 = vmul.f32 %v1946_v16, %v1946_v16 }
 0x325   : > { %v2069_v27 = vadd.f32 %v2068_v54, %v2006_v17  ;;  %v2011_v17 = vmul.f32 %v1947_v2, %v1947_v2 }
 0x327   : > { %v2070_v22 = vadd.f32 %v2069_v27, %v2007_v42  ;;  %v2013_v42 = vmul.f32 %v1949_v44, %v1949_v44 }
 0x329   : > { %v2071_v7 = vadd.f32 %v2070_v22, %v2008_v47 }
 0x32b   : > { %v2072_v54 = vadd.f32 %v2071_v7, %v2009_v23 }
 0x32d   : > { %v2073_v3 = vadd.f32 %v2072_v54, %v2010_v58 }
 0x32f   : > { %v2074_v27 = vadd.f32 %v2073_v3, %v2011_v17 }
 0x331   : > { %v2075_v19 = vadd.f32 %v2074_v27, %v2012_v35 }
 0x333   : > { %v2076_v29 = vadd.f32 %v2075_v19, %v2013_v42 }
 0x335   : > { %v2077_v6 = vadd.f32 %v2076_v29, %v2014_v55  ;;  %v2086_v29 = vld [vmem:[%s4464_s2] sm:$0x1] }
 0x337   : > { %v2078_v16 = vrot.slane %v2077_v6, 4 }
 0x339   : > { %v2079_v47 = vadd.f32 %v2078_v16, %v2077_v6 }
 0x33b   : > { %v2080_v22 = vrot.slane %v2079_v47, 2 }
 0x33d   : > { %v2081_v61 = vadd.f32 %v2080_v22, %v2079_v47 }
 0x33f   : > { %v2082_v51 = vrot.slane %v2081_v61, 1 }
 0x341   : > { %v2083_v34 = vadd.f32 %v2082_v51, %v2081_v61 }
 0x343   : > { %v2085_v15 = vmul.f32 0.001953125, %v2083_v34  ;;  %v2099_v34 = vld [vmem:[%s4465_s3] sm:$0x1] }
 0x345   : > { %v2087_v2 = vadd.f32 1e-05, %v2085_v15 }
 0x347   : > { %2763 = vrsqrt.f32 %v2087_v2  ;;  %vm2094_vm0 = vweird.f32 %v2087_v2 }
 0x34d   : > { %v2764_v23 = vpop.eup %2763 }
 0x34e   : > { %v2089_v7 = vmul.f32 %v2764_v23, %v2087_v2  ;;  %vm2095_vm1 = vweird.f32 %v2764_v23 }
 0x34f   : > { %vm2096_vm2 = vmor %vm2094_vm0, %vm2095_vm1 }
 0x350   : > { %v2090_v38 = vmul.f32 %v2764_v23, %v2089_v7 }
 0x352   : > { %v2091_v13 = vmul.f32 0.5, %v2090_v38 }
 0x354   : > { %v2092_v58 = vsub.f32 1.5, %v2091_v13 }
 0x356   : > { %v2093_v19 = vmul.f32 %v2764_v23, %v2092_v58 }
 0x358   : > { %v2097_v55 = vsel %vm2096_vm2, %v2764_v23, %v2093_v19 }
 0x359   : > { %v2098_v39 = vmul.f32 %v2097_v55, %v2086_v29 }
 0x35b   : > { %v2100_v51 = vmul.f32 %v2098_v39, %v3983_v40  ;;  %v4251_v61 = vperm.slane %v2098_v39, 0 }
 0x35d   : > { %v2101_v35 = vsub.f32 %v2099_v34, %v2100_v51  ;;  %v2105_v6 = vmul.f32 %v4251_v61, %v3988_v5  ;;  %v2106_v15 = vmul.f32 %v4251_v61, %v3990_v31  ;;  %v2107_v44 = vmul.f32 %v4251_v61, %v3992_v11 }
 0x35e   : > { %v2108_v17 = vmul.f32 %v4251_v61, %v3998_v36  ;;  %v2109_v54 = vmul.f32 %v4251_v61, %v4002_v62  ;;  %v2110_v40 = vmul.f32 %v4251_v61, %v4006_v52  ;;  %v2111_v3 = vmul.f32 %v4251_v61, %v4010_v63 }
 0x35f   : > { %v4267_v42 = vperm.slane %v2101_v35, 0  ;;  %v2112_v5 = vmul.f32 %v4251_v61, %v4014_v8  ;;  %v2113_v31 = vmul.f32 %v4251_v61, %v4018_v60  ;;  %v2114_v11 = vmul.f32 %v4251_v61, %v4022_v32 }
 0x360   : > { %v2115_v36 = vmul.f32 %v4251_v61, %v4026_v48  ;;  %v2116_v62 = vmul.f32 %v4251_v61, %v4030_v14  ;;  %v2117_v52 = vmul.f32 %v4251_v61, %v4034_v25  ;;  %v2118_v63 = vmul.f32 %v4251_v61, %v4038_v43 }
 0x361   : > { %v2172_v8 = vadd.f32 %v4267_v42, %v2105_v6  ;;  %v2173_v27 = vadd.f32 %v4267_v42, %v2106_v15  ;;  %v2174_v60 = vadd.f32 %v4267_v42, %v2107_v44  ;;  %v2175_v32 = vadd.f32 %v4267_v42, %v2108_v17 }
 0x362   : > { %v2176_v16 = vadd.f32 %v4267_v42, %v2109_v54  ;;  %v2177_v48 = vadd.f32 %v4267_v42, %v2110_v40  ;;  %v2178_v14 = vadd.f32 %v4267_v42, %v2111_v3  ;;  %v2179_v47 = vadd.f32 %v4267_v42, %v2112_v5 }
 0x363   : > { %vm2236_vm3 = vcmp.ge.f32.partialorder %v2172_v8, 0.0  ;;  %v2300_v25 = vmul.f32 0.01, %v2172_v8  ;;  %vm2237_vm4 = vcmp.ge.f32.partialorder %v2173_v27, 0.0  ;;  %v2301_v43 = vmul.f32 0.01, %v2173_v27 }
 0x364   : > { %vm2238_vm5 = vcmp.ge.f32.partialorder %v2174_v60, 0.0  ;;  %v2302_v22 = vmul.f32 0.01, %v2174_v60  ;;  %vm2239_vm6 = vcmp.ge.f32.partialorder %v2175_v32, 0.0  ;;  %v2303_v2 = vmul.f32 0.01, %v2175_v32 }
 0x365   : > { %v2364_v23 = vsel %vm2236_vm3, %v2172_v8, %v2300_v25  ;;  %v2365_v7 = vsel %vm2237_vm4, %v2173_v27, %v2301_v43  ;;  %vm2240_vm7 = vcmp.ge.f32.partialorder %v2176_v16, 0.0  ;;  %v2304_v38 = vmul.f32 0.01, %v2176_v16 }
 0x366   : > { %2428 = vst [vmem:[#allocation3] sm:$0xff] %v2364_v23  ;;  %v2366_v13 = vsel %vm2238_vm5, %v2174_v60, %v2302_v22  ;;  %v2367_v58 = vsel %vm2239_vm6, %v2175_v32, %v2303_v2  ;;  %vm2241_vm8 = vcmp.ge.f32.partialorder %v2177_v48, 0.0  ;;  %v2305_v29 = vmul.f32 0.01, %v2177_v48 }
 0x367   : > { %2429 = vst [vmem:[#allocation3 + $0x8] sm:$0xff] %v2365_v7  ;;  %v2368_v19 = vsel %vm2240_vm7, %v2176_v16, %v2304_v38  ;;  %vm2242_vm9 = vcmp.ge.f32.partialorder %v2178_v14, 0.0  ;;  %v2306_v55 = vmul.f32 0.01, %v2178_v14  ;;  %vm2243_vm10 = vcmp.ge.f32.partialorder %v2179_v47, 0.0 }
 0x368   : > { %2430 = vst [vmem:[#allocation3 + $0x10] sm:$0xff] %v2366_v13  ;;  %v2369_v39 = vsel %vm2241_vm8, %v2177_v48, %v2305_v29  ;;  %v2307_v34 = vmul.f32 0.01, %v2179_v47  ;;  %v2180_v51 = vadd.f32 %v4267_v42, %v2113_v31  ;;  %v2181_v35 = vadd.f32 %v4267_v42, %v2114_v11 }
 0x369   : > { %2431 = vst [vmem:[#allocation3 + $0x18] sm:$0xff] %v2367_v58  ;;  %v2370_v6 = vsel %vm2242_vm9, %v2178_v14, %v2306_v55  ;;  %v2182_v15 = vadd.f32 %v4267_v42, %v2115_v36  ;;  %v2183_v44 = vadd.f32 %v4267_v42, %v2116_v62  ;;  %v2184_v17 = vadd.f32 %v4267_v42, %v2117_v52 }
 0x36a   : > { %2432 = vst [vmem:[#allocation3 + $0x20] sm:$0xff] %v2368_v19  ;;  %v2371_v54 = vsel %vm2243_vm10, %v2179_v47, %v2307_v34  ;;  %vm2244_vm11 = vcmp.ge.f32.partialorder %v2180_v51, 0.0  ;;  %v2308_v40 = vmul.f32 0.01, %v2180_v51  ;;  %vm2245_vm12 = vcmp.ge.f32.partialorder %v2181_v35, 0.0 }
 0x36b   : > { %2433 = vst [vmem:[#allocation3 + $0x28] sm:$0xff] %v2369_v39  ;;  %v2309_v3 = vmul.f32 0.01, %v2181_v35  ;;  %vm2246_vm13 = vcmp.ge.f32.partialorder %v2182_v15, 0.0  ;;  %v2310_v5 = vmul.f32 0.01, %v2182_v15  ;;  %v2185_v31 = vadd.f32 %v4267_v42, %v2118_v63 }
 0x36c   : > { %2434 = vst [vmem:[#allocation3 + $0x30] sm:$0xff] %v2370_v6  ;;  %v2372_v11 = vsel %vm2244_vm11, %v2180_v51, %v2308_v40  ;;  %vm2247_vm14 = vcmp.ge.f32.partialorder %v2183_v44, 0.0  ;;  %v2311_v8 = vmul.f32 0.01, %v2183_v44  ;;  %vm2248_vm15 = vcmp.ge.f32.partialorder %v2184_v17, 0.0 }
 0x36d   : > { %2435 = vst [vmem:[#allocation3 + $0x38] sm:$0xff] %v2371_v54  ;;  %v2373_v36 = vsel %vm2245_vm12, %v2181_v35, %v2309_v3  ;;  %v2374_v62 = vsel %vm2246_vm13, %v2182_v15, %v2310_v5  ;;  %v2312_v52 = vmul.f32 0.01, %v2184_v17  ;;  %vm2249_vm0 = vcmp.ge.f32.partialorder %v2185_v31, 0.0 }
 0x36e   : > { %2436 = vst [vmem:[#allocation3 + $0x40] sm:$0xff] %v2372_v11  ;;  %v2375_v27 = vsel %vm2247_vm14, %v2183_v44, %v2311_v8  ;;  %v2313_v60 = vmul.f32 0.01, %v2185_v31  ;;  %v2119_v32 = vmul.f32 %v4251_v61, %v4042_v0  ;;  %v2120_v16 = vmul.f32 %v4251_v61, %v4046_v56 }
 0x36f   : > { %2437 = vst [vmem:[#allocation3 + $0x48] sm:$0xff] %v2373_v36  ;;  %v2376_v63 = vsel %vm2248_vm15, %v2184_v17, %v2312_v52  ;;  %v2121_v48 = vmul.f32 %v4251_v61, %v4050_v9  ;;  %v2122_v14 = vmul.f32 %v4251_v61, %v4054_v46  ;;  %v2123_v47 = vmul.f32 %v4251_v61, %v4058_v1 }
 0x370   : > { %2438 = vst [vmem:[#allocation3 + $0x50] sm:$0xff] %v2374_v62  ;;  %v2377_v25 = vsel %vm2249_vm0, %v2185_v31, %v2313_v60  ;;  %v2186_v43 = vadd.f32 %v4267_v42, %v2119_v32  ;;  %v2187_v0 = vadd.f32 %v4267_v42, %v2120_v16  ;;  %v2124_v56 = vmul.f32 %v4251_v61, %v4062_v53 }
 0x371   : > { %2439 = vst [vmem:[#allocation3 + $0x58] sm:$0xff] %v2375_v27  ;;  %v2188_v22 = vadd.f32 %v4267_v42, %v2121_v48  ;;  %v2189_v9 = vadd.f32 %v4267_v42, %v2122_v14  ;;  %v2190_v2 = vadd.f32 %v4267_v42, %v2123_v47  ;;  %v2125_v46 = vmul.f32 %v4251_v61, %v4066_v59 }
 0x372   : > { %2440 = vst [vmem:[#allocation3 + $0x60] sm:$0xff] %v2376_v63  ;;  %vm2250_vm1 = vcmp.ge.f32.partialorder %v2186_v43, 0.0  ;;  %v2314_v1 = vmul.f32 0.01, %v2186_v43  ;;  %vm2251_vm2 = vcmp.ge.f32.partialorder %v2187_v0, 0.0  ;;  %v2191_v23 = vadd.f32 %v4267_v42, %v2124_v56 }
 0x373   : > { %2441 = vst [vmem:[#allocation3 + $0x68] sm:$0xff] %v2377_v25  ;;  %v2315_v7 = vmul.f32 0.01, %v2187_v0  ;;  %vm2252_vm3 = vcmp.ge.f32.partialorder %v2188_v22, 0.0  ;;  %v2316_v53 = vmul.f32 0.01, %v2188_v22  ;;  %v2192_v38 = vadd.f32 %v4267_v42, %v2125_v46 }
 0x374   : > { %v2378_v13 = vsel %vm2250_vm1, %v2186_v43, %v2314_v1  ;;  %vm2253_vm4 = vcmp.ge.f32.partialorder %v2189_v9, 0.0  ;;  %v2317_v58 = vmul.f32 0.01, %v2189_v9  ;;  %vm2254_vm5 = vcmp.ge.f32.partialorder %v2190_v2, 0.0 }
 0x375   : > { %2442 = vst [vmem:[#allocation3 + $0x70] sm:$0xff] %v2378_v13  ;;  %v2379_v29 = vsel %vm2251_vm2, %v2187_v0, %v2315_v7  ;;  %v2380_v19 = vsel %vm2252_vm3, %v2188_v22, %v2316_v53  ;;  %v2318_v59 = vmul.f32 0.01, %v2190_v2  ;;  %vm2255_vm6 = vcmp.ge.f32.partialorder %v2191_v23, 0.0 }
 0x376   : > { %2443 = vst [vmem:[#allocation3 + $0x78] sm:$0xff] %v2379_v29  ;;  %v2381_v55 = vsel %vm2253_vm4, %v2189_v9, %v2317_v58  ;;  %v2319_v39 = vmul.f32 0.01, %v2191_v23  ;;  %vm2256_vm7 = vcmp.ge.f32.partialorder %v2192_v38, 0.0  ;;  %v2320_v34 = vmul.f32 0.01, %v2192_v38 }
 0x377   : > { %2444 = vst [vmem:[#allocation3 + $0x80] sm:$0xff] %v2380_v19  ;;  %v2382_v51 = vsel %vm2254_vm5, %v2190_v2, %v2318_v59  ;;  %v2126_v35 = vmul.f32 %v4251_v61, %v4070_v24  ;;  %v2127_v6 = vmul.f32 %v4251_v61, %v4074_v28  ;;  %v2128_v15 = vmul.f32 %v4251_v61, %v4078_v12 }
 0x378   : > { %2445 = vst [vmem:[#allocation3 + $0x88] sm:$0xff] %v2381_v55  ;;  %v2383_v44 = vsel %vm2255_vm6, %v2191_v23, %v2319_v39  ;;  %v2384_v17 = vsel %vm2256_vm7, %v2192_v38, %v2320_v34  ;;  %v2129_v54 = vmul.f32 %v4251_v61, %v4082_v18  ;;  %v2130_v40 = vmul.f32 %v4251_v61, %v4086_v33 }
 0x379   : > { %2446 = vst [vmem:[#allocation3 + $0x90] sm:$0xff] %v2382_v51  ;;  %v2193_v3 = vadd.f32 %v4267_v42, %v2126_v35  ;;  %v2194_v24 = vadd.f32 %v4267_v42, %v2127_v6  ;;  %v2195_v5 = vadd.f32 %v4267_v42, %v2128_v15  ;;  %v2131_v28 = vmul.f32 %v4251_v61, %v4090_v57  ;;  %v4581_v35 = vld [vmem:[#allocation22_spill] sm:$0xff]  ;;  %v4582_v15 = vld [vmem:[#allocation23_spill] sm:$0xff] }
 0x37a   : > { %2447 = vst [vmem:[#allocation3 + $0x98] sm:$0xff] %v2383_v44  ;;  %v2196_v12 = vadd.f32 %v4267_v42, %v2129_v54  ;;  %v2197_v31 = vadd.f32 %v4267_v42, %v2130_v40  ;;  %v2132_v18 = vmul.f32 %v4251_v61, %v4094_v30  ;;  %v2133_v33 = vmul.f32 %v4251_v61, %v4098_v41  ;;  %v4583_v40 = vld [vmem:[#allocation24_spill] sm:$0xff] }
 0x37b   : > { %2448 = vst [vmem:[#allocation3 + $0xa0] sm:$0xff] %v2384_v17  ;;  %vm2257_vm8 = vcmp.ge.f32.partialorder %v2193_v3, 0.0  ;;  %v2321_v11 = vmul.f32 0.01, %v2193_v3  ;;  %vm2258_vm9 = vcmp.ge.f32.partialorder %v2194_v24, 0.0  ;;  %vm2259_vm10 = vcmp.ge.f32.partialorder %v2195_v5, 0.0 }
 0x37c   : > { %v2322_v8 = vmul.f32 0.01, %v2194_v24  ;;  %v2323_v36 = vmul.f32 0.01, %v2195_v5  ;;  %vm2260_vm11 = vcmp.ge.f32.partialorder %v2196_v12, 0.0  ;;  %vm2261_vm12 = vcmp.ge.f32.partialorder %v2197_v31, 0.0 }
 0x37d   : > { %v2385_v57 = vsel %vm2257_vm8, %v2193_v3, %v2321_v11  ;;  %v2324_v62 = vmul.f32 0.01, %v2196_v12  ;;  %v2325_v52 = vmul.f32 0.01, %v2197_v31  ;;  %v2198_v27 = vadd.f32 %v4267_v42, %v2131_v28 }
 0x37e   : > { %2449 = vst [vmem:[#allocation3 + $0xa8] sm:$0xff] %v2385_v57  ;;  %v2386_v60 = vsel %vm2258_vm9, %v2194_v24, %v2322_v8  ;;  %v2387_v30 = vsel %vm2259_vm10, %v2195_v5, %v2323_v36  ;;  %v2199_v32 = vadd.f32 %v4267_v42, %v2132_v18  ;;  %v2200_v41 = vadd.f32 %v4267_v42, %v2133_v33  ;;  %v4584_v24 = vld [vmem:[#allocation25_spill] sm:$0xff] }
 0x37f   : > { %2450 = vst [vmem:[#allocation3 + $0xb0] sm:$0xff] %v2386_v60  ;;  %v2388_v16 = vsel %vm2260_vm11, %v2196_v12, %v2324_v62  ;;  %v2389_v63 = vsel %vm2261_vm12, %v2197_v31, %v2325_v52  ;;  %vm2262_vm13 = vcmp.ge.f32.partialorder %v2198_v27, 0.0  ;;  %v2326_v48 = vmul.f32 0.01, %v2198_v27  ;;  %v4585_v12 = vld [vmem:[#allocation26_spill] sm:$0xff] }
 0x380   : > { %2451 = vst [vmem:[#allocation3 + $0xb8] sm:$0xff] %v2387_v30  ;;  %vm2263_vm14 = vcmp.ge.f32.partialorder %v2199_v32, 0.0  ;;  %v2327_v14 = vmul.f32 0.01, %v2199_v32  ;;  %vm2264_vm15 = vcmp.ge.f32.partialorder %v2200_v41, 0.0  ;;  %v2134_v47 = vmul.f32 %v4251_v61, %v4102_v49 }
 0x381   : > { %2452 = vst [vmem:[#allocation3 + $0xc0] sm:$0xff] %v2388_v16  ;;  %v2390_v25 = vsel %vm2262_vm13, %v2198_v27, %v2326_v48  ;;  %v2328_v43 = vmul.f32 0.01, %v2200_v41  ;;  %v2135_v0 = vmul.f32 %v4251_v61, %v4106_v21  ;;  %v2136_v56 = vmul.f32 %v4251_v61, %v4110_v4  ;;  %v4586_v16 = vld [vmem:[#allocation27_spill] sm:$0xff] }
 0x382   : > { %2453 = vst [vmem:[#allocation3 + $0xc8] sm:$0xff] %v2389_v63  ;;  %v2391_v22 = vsel %vm2263_vm14, %v2199_v32, %v2327_v14  ;;  %v2201_v9 = vadd.f32 %v4267_v42, %v2134_v47  ;;  %v2137_v2 = vmul.f32 %v4251_v61, %v4114_v45  ;;  %v2138_v46 = vmul.f32 %v4251_v61, %v4118_v20  ;;  %v4587_v14 = vld [vmem:[#allocation28_spill] sm:$0xff] }
 0x383   : > { %2454 = vst [vmem:[#allocation3 + $0xd0] sm:$0xff] %v2390_v25  ;;  %v2392_v49 = vsel %vm2264_vm15, %v2200_v41, %v2328_v43  ;;  %v2202_v1 = vadd.f32 %v4267_v42, %v2135_v0  ;;  %v2203_v23 = vadd.f32 %v4267_v42, %v2136_v56  ;;  %v2139_v21 = vmul.f32 %v4251_v61, %v4122_v37  ;;  %v4588_v25 = vld [vmem:[#allocation29_spill] sm:$0xff]  ;;  %v4589_v0 = vld [vmem:[#allocation30_spill] sm:$0xff] }
 0x384   : > { %2455 = vst [vmem:[#allocation3 + $0xd8] sm:$0xff] %v2391_v22  ;;  %vm2265_vm0 = vcmp.ge.f32.partialorder %v2201_v9, 0.0  ;;  %v2329_v4 = vmul.f32 0.01, %v2201_v9  ;;  %v2204_v7 = vadd.f32 %v4267_v42, %v2137_v2  ;;  %v2205_v53 = vadd.f32 %v4267_v42, %v2138_v46 }
 0x385   : > { %2456 = vst [vmem:[#allocation3 + $0xe0] sm:$0xff] %v2392_v49  ;;  %vm2266_vm1 = vcmp.ge.f32.partialorder %v2202_v1, 0.0  ;;  %v2330_v45 = vmul.f32 0.01, %v2202_v1  ;;  %vm2267_vm2 = vcmp.ge.f32.partialorder %v2203_v23, 0.0  ;;  %v2206_v20 = vadd.f32 %v4267_v42, %v2139_v21 }
 0x386   : > { %v2393_v38 = vsel %vm2265_vm0, %v2201_v9, %v2329_v4  ;;  %v2331_v13 = vmul.f32 0.01, %v2203_v23  ;;  %vm2268_vm3 = vcmp.ge.f32.partialorder %v2204_v7, 0.0  ;;  %v2332_v58 = vmul.f32 0.01, %v2204_v7 }
 0x387   : > { %2457 = vst [vmem:[#allocation3 + $0xe8] sm:$0xff] %v2393_v38  ;;  %v2394_v29 = vsel %vm2266_vm1, %v2202_v1, %v2330_v45  ;;  %vm2269_vm4 = vcmp.ge.f32.partialorder %v2205_v53, 0.0  ;;  %v2333_v37 = vmul.f32 0.01, %v2205_v53  ;;  %vm2270_vm5 = vcmp.ge.f32.partialorder %v2206_v20, 0.0 }
 0x388   : > { %2458 = vst [vmem:[#allocation3 + $0xf0] sm:$0xff] %v2394_v29  ;;  %v2395_v19 = vsel %vm2267_vm2, %v2203_v23, %v2331_v13  ;;  %v2396_v59 = vsel %vm2268_vm3, %v2204_v7, %v2332_v58  ;;  %v2334_v55 = vmul.f32 0.01, %v2206_v20  ;;  %v2140_v39 = vmul.f32 %v4251_v61, %v4126_v10  ;;  %v4590_v23 = vld [vmem:[#allocation31_spill] sm:$0xff] }
 0x389   : > { %2459 = vst [vmem:[#allocation3 + $0xf8] sm:$0xff] %v2395_v19  ;;  %v2397_v34 = vsel %vm2269_vm4, %v2205_v53, %v2333_v37  ;;  %v2141_v51 = vmul.f32 %v4251_v61, %v4130_v26  ;;  %v2142_v6 = vmul.f32 %v4251_v61, %v4581_v35  ;;  %v2143_v44 = vmul.f32 %v4251_v61, %v4582_v15  ;;  %v4591_v53 = vld [vmem:[#allocation32_spill] sm:$0xff] }
 0x38a   : > { %2460 = vst [vmem:[#allocation3 + $0x100] sm:$0xff] %v2396_v59  ;;  %v2398_v17 = vsel %vm2270_vm5, %v2206_v20, %v2334_v55  ;;  %v2207_v54 = vadd.f32 %v4267_v42, %v2140_v39  ;;  %v2144_v3 = vmul.f32 %v4251_v61, %v4583_v40  ;;  %v2145_v10 = vmul.f32 %v4251_v61, %v4584_v24  ;;  %v4592_v59 = vld [vmem:[#allocation33_spill] sm:$0xff]  ;;  %v4593_v39 = vld [vmem:[#allocation34_spill] sm:$0xff]  ;;  %v4594_v40 = vld [vmem:[#allocation35_spill] sm:$0xff] }
 0x38b   : > { %2461 = vst [vmem:[#allocation3 + $0x108] sm:$0xff] %v2397_v34  ;;  %v2208_v5 = vadd.f32 %v4267_v42, %v2141_v51  ;;  %v2209_v26 = vadd.f32 %v4267_v42, %v2142_v6  ;;  %v2210_v28 = vadd.f32 %v4267_v42, %v2143_v44  ;;  %v2146_v31 = vmul.f32 %v4251_v61, %v4585_v12  ;;  %v4595_v24 = vld [vmem:[#allocation36_spill] sm:$0xff] }
 0x38c   : > { %2462 = vst [vmem:[#allocation3 + $0x110] sm:$0xff] %v2398_v17  ;;  %vm2271_vm6 = vcmp.ge.f32.partialorder %v2207_v54, 0.0  ;;  %v2335_v18 = vmul.f32 0.01, %v2207_v54  ;;  %v2211_v33 = vadd.f32 %v4267_v42, %v2144_v3  ;;  %v2212_v11 = vadd.f32 %v4267_v42, %v2145_v10 }
 0x38d   : > { %vm2272_vm7 = vcmp.ge.f32.partialorder %v2208_v5, 0.0  ;;  %v2336_v8 = vmul.f32 0.01, %v2208_v5  ;;  %vm2273_vm8 = vcmp.ge.f32.partialorder %v2209_v26, 0.0  ;;  %v2337_v36 = vmul.f32 0.01, %v2209_v26 }
 0x38e   : > { %v2399_v57 = vsel %vm2271_vm6, %v2207_v54, %v2335_v18  ;;  %vm2274_vm9 = vcmp.ge.f32.partialorder %v2210_v28, 0.0  ;;  %v2338_v62 = vmul.f32 0.01, %v2210_v28  ;;  %vm2275_vm10 = vcmp.ge.f32.partialorder %v2211_v33, 0.0 }
 0x38f   : > { %2463 = vst [vmem:[#allocation3 + $0x118] sm:$0xff] %v2399_v57  ;;  %v2400_v52 = vsel %vm2272_vm7, %v2208_v5, %v2336_v8  ;;  %v2401_v27 = vsel %vm2273_vm8, %v2209_v26, %v2337_v36  ;;  %v2339_v60 = vmul.f32 0.01, %v2211_v33  ;;  %vm2276_vm11 = vcmp.ge.f32.partialorder %v2212_v11, 0.0  ;;  %v4596_v5 = vld [vmem:[#allocation37_spill] sm:$0xff]  ;;  %v4597_v36 = vld [vmem:[#allocation38_spill] sm:$0xff] }
 0x390   : > { %2464 = vst [vmem:[#allocation3 + $0x120] sm:$0xff] %v2400_v52  ;;  %v2402_v30 = vsel %vm2274_vm9, %v2210_v28, %v2338_v62  ;;  %v2340_v32 = vmul.f32 0.01, %v2212_v11  ;;  %v2213_v41 = vadd.f32 %v4267_v42, %v2146_v31  ;;  %v2147_v63 = vmul.f32 %v4251_v61, %v4586_v16  ;;  %v4598_v62 = vld [vmem:[#allocation39_spill] sm:$0xff] }
 0x391   : > { %2465 = vst [vmem:[#allocation3 + $0x128] sm:$0xff] %v2401_v27  ;;  %v2403_v48 = vsel %vm2275_vm10, %v2211_v33, %v2339_v60  ;;  %v2148_v47 = vmul.f32 %v4251_v61, %v4587_v14  ;;  %v2149_v43 = vmul.f32 %v4251_v61, %v4588_v25  ;;  %v2150_v56 = vmul.f32 %v4251_v61, %v4589_v0  ;;  %v4599_v27 = vld [vmem:[#allocation40_spill] sm:$0xff]  ;;  %v4600_v25 = vld [vmem:[#allocation41_spill] sm:$0xff] }
 0x392   : > { %2466 = vst [vmem:[#allocation3 + $0x130] sm:$0xff] %v2402_v30  ;;  %v2404_v22 = vsel %vm2276_vm11, %v2212_v11, %v2340_v32  ;;  %vm2277_vm12 = vcmp.ge.f32.partialorder %v2213_v41, 0.0  ;;  %v2341_v9 = vmul.f32 0.01, %v2213_v41  ;;  %v2214_v2 = vadd.f32 %v4267_v42, %v2147_v63 }
 0x393   : > { %2467 = vst [vmem:[#allocation3 + $0x138] sm:$0xff] %v2403_v48  ;;  %v2215_v46 = vadd.f32 %v4267_v42, %v2148_v47  ;;  %v2216_v49 = vadd.f32 %v4267_v42, %v2149_v43  ;;  %v2217_v1 = vadd.f32 %v4267_v42, %v2150_v56  ;;  %v2151_v21 = vmul.f32 %v4251_v61, %v4590_v23 }
 0x394   : > { %2468 = vst [vmem:[#allocation3 + $0x140] sm:$0xff] %v2404_v22  ;;  %v2405_v4 = vsel %vm2277_vm12, %v2213_v41, %v2341_v9  ;;  %vm2278_vm13 = vcmp.ge.f32.partialorder %v2214_v2, 0.0  ;;  %v2342_v7 = vmul.f32 0.01, %v2214_v2  ;;  %v2152_v45 = vmul.f32 %v4251_v61, %v4591_v53 }
 0x395   : > { %2469 = vst [vmem:[#allocation3 + $0x148] sm:$0xff] %v2405_v4  ;;  %vm2279_vm14 = vcmp.ge.f32.partialorder %v2215_v46, 0.0  ;;  %v2343_v20 = vmul.f32 0.01, %v2215_v46  ;;  %vm2280_vm15 = vcmp.ge.f32.partialorder %v2216_v49, 0.0  ;;  %vm2281_vm0 = vcmp.ge.f32.partialorder %v2217_v1, 0.0 }
 0x396   : > { %v2406_v38 = vsel %vm2278_vm13, %v2214_v2, %v2342_v7  ;;  %v2344_v13 = vmul.f32 0.01, %v2216_v49  ;;  %v2345_v58 = vmul.f32 0.01, %v2217_v1  ;;  %v2218_v29 = vadd.f32 %v4267_v42, %v2151_v21  ;;  %v4602_v21 = vld [vmem:[#allocation43_spill] sm:$0xff] }
 0x397   : > { %2470 = vst [vmem:[#allocation3 + $0x150] sm:$0xff] %v2406_v38  ;;  %v2407_v37 = vsel %vm2279_vm14, %v2215_v46, %v2343_v20  ;;  %v2219_v19 = vadd.f32 %v4267_v42, %v2152_v45  ;;  %v2153_v55 = vmul.f32 %v4251_v61, %v4592_v59  ;;  %v2154_v34 = vmul.f32 %v4251_v61, %v4593_v39  ;;  %v4603_v45 = vld [vmem:[#allocation44_spill] sm:$0xff] }
 0x398   : > { %2471 = vst [vmem:[#allocation3 + $0x158] sm:$0xff] %v2407_v37  ;;  %v2408_v51 = vsel %vm2280_vm15, %v2216_v49, %v2344_v13  ;;  %v2409_v35 = vsel %vm2281_vm0, %v2217_v1, %v2345_v58  ;;  %vm2282_vm1 = vcmp.ge.f32.partialorder %v2218_v29, 0.0  ;;  %v2346_v6 = vmul.f32 0.01, %v2218_v29  ;;  %v4601_v1 = vld [vmem:[#allocation42_spill] sm:$0xff] }
 0x399   : > { %2472 = vst [vmem:[#allocation3 + $0x160] sm:$0xff] %v2408_v51  ;;  %vm2283_vm2 = vcmp.ge.f32.partialorder %v2219_v19, 0.0  ;;  %v2347_v15 = vmul.f32 0.01, %v2219_v19  ;;  %v2220_v44 = vadd.f32 %v4267_v42, %v2153_v55  ;;  %v2221_v17 = vadd.f32 %v4267_v42, %v2154_v34  ;;  %v4605_v55 = vld [vmem:[#allocation46_spill] sm:$0xff]  ;;  %v4606_v34 = vld [vmem:[#allocation47_spill] sm:$0xff] }
 0x39a   : > { %2473 = vst [vmem:[#allocation3 + $0x168] sm:$0xff] %v2409_v35  ;;  %v2410_v54 = vsel %vm2282_vm1, %v2218_v29, %v2346_v6  ;;  %v2155_v3 = vmul.f32 %v4251_v61, %v4594_v40  ;;  %v2156_v10 = vmul.f32 %v4251_v61, %v4595_v24  ;;  %v2157_v26 = vmul.f32 %v4251_v61, %v4596_v5  ;;  %v4604_v29 = vld [vmem:[#allocation45_spill] sm:$0xff] }
 0x39b   : > { %2474 = vst [vmem:[#allocation3 + $0x170] sm:$0xff] %v2410_v54  ;;  %v2411_v28 = vsel %vm2283_vm2, %v2219_v19, %v2347_v15  ;;  %vm2284_vm3 = vcmp.ge.f32.partialorder %v2220_v44, 0.0  ;;  %v2348_v12 = vmul.f32 0.01, %v2220_v44  ;;  %vm2285_vm4 = vcmp.ge.f32.partialorder %v2221_v17, 0.0 }
 0x39c   : > { %2475 = vst [vmem:[#allocation3 + $0x178] sm:$0xff] %v2411_v28  ;;  %v2349_v31 = vmul.f32 0.01, %v2221_v17  ;;  %v2222_v18 = vadd.f32 %v4267_v42, %v2155_v3  ;;  %v2223_v33 = vadd.f32 %v4267_v42, %v2156_v10  ;;  %v2224_v11 = vadd.f32 %v4267_v42, %v2157_v26 }
 0x39d   : > { %v2412_v8 = vsel %vm2284_vm3, %v2220_v44, %v2348_v12  ;;  %v2158_v57 = vmul.f32 %v4251_v61, %v4597_v36  ;;  %v2159_v52 = vmul.f32 %v4251_v61, %v4598_v62  ;;  %v2160_v60 = vmul.f32 %v4251_v61, %v4599_v27 }
 0x39e   : > { %2476 = vst [vmem:[#allocation3 + $0x180] sm:$0xff] %v2412_v8  ;;  %v2413_v30 = vsel %vm2285_vm4, %v2221_v17, %v2349_v31  ;;  %vm2286_vm5 = vcmp.ge.f32.partialorder %v2222_v18, 0.0  ;;  %v2350_v32 = vmul.f32 0.01, %v2222_v18  ;;  %vm2287_vm6 = vcmp.ge.f32.partialorder %v2223_v33, 0.0 }
 0x39f   : > { %2477 = vst [vmem:[#allocation3 + $0x188] sm:$0xff] %v2413_v30  ;;  %v2351_v41 = vmul.f32 0.01, %v2223_v33  ;;  %vm2288_vm7 = vcmp.ge.f32.partialorder %v2224_v11, 0.0  ;;  %v2352_v16 = vmul.f32 0.01, %v2224_v11  ;;  %v2225_v63 = vadd.f32 %v4267_v42, %v2158_v57 }
 0x3a0   : > { %v2414_v48 = vsel %vm2286_vm5, %v2222_v18, %v2350_v32  ;;  %v2226_v14 = vadd.f32 %v4267_v42, %v2159_v52  ;;  %v2227_v47 = vadd.f32 %v4267_v42, %v2160_v60  ;;  %v2161_v43 = vmul.f32 %v4251_v61, %v4600_v25 }
 0x3a1   : > { %2478 = vst [vmem:[#allocation3 + $0x190] sm:$0xff] %v2414_v48  ;;  %v2415_v0 = vsel %vm2287_vm6, %v2223_v33, %v2351_v41  ;;  %v2416_v56 = vsel %vm2288_vm7, %v2224_v11, %v2352_v16  ;;  %vm2289_vm8 = vcmp.ge.f32.partialorder %v2225_v63, 0.0  ;;  %v2353_v22 = vmul.f32 0.01, %v2225_v63 }
 0x3a2   : > { %2479 = vst [vmem:[#allocation3 + $0x198] sm:$0xff] %v2415_v0  ;;  %vm2290_vm9 = vcmp.ge.f32.partialorder %v2226_v14, 0.0  ;;  %v2354_v9 = vmul.f32 0.01, %v2226_v14  ;;  %vm2291_vm10 = vcmp.ge.f32.partialorder %v2227_v47, 0.0  ;;  %v2228_v2 = vadd.f32 %v4267_v42, %v2161_v43 }
 0x3a3   : > { %2480 = vst [vmem:[#allocation3 + $0x1a0] sm:$0xff] %v2416_v56  ;;  %v2417_v46 = vsel %vm2289_vm8, %v2225_v63, %v2353_v22  ;;  %v2355_v49 = vmul.f32 0.01, %v2227_v47  ;;  %v2162_v23 = vmul.f32 %v4251_v61, %v4601_v1  ;;  %v2163_v4 = vmul.f32 %v4251_v61, %v4602_v21 }
 0x3a4   : > { %2481 = vst [vmem:[#allocation3 + $0x1a8] sm:$0xff] %v2417_v46  ;;  %v2418_v7 = vsel %vm2290_vm9, %v2226_v14, %v2354_v9  ;;  %vm2292_vm11 = vcmp.ge.f32.partialorder %v2228_v2, 0.0  ;;  %v2356_v53 = vmul.f32 0.01, %v2228_v2  ;;  %v2164_v20 = vmul.f32 %v4251_v61, %v4603_v45 }
 0x3a5   : > { %2482 = vst [vmem:[#allocation3 + $0x1b0] sm:$0xff] %v2418_v7  ;;  %v2419_v38 = vsel %vm2291_vm10, %v2227_v47, %v2355_v49  ;;  %v2229_v13 = vadd.f32 %v4267_v42, %v2162_v23  ;;  %v2230_v58 = vadd.f32 %v4267_v42, %v2163_v4  ;;  %v2165_v37 = vmul.f32 %v4251_v61, %v4604_v29 }
 0x3a6   : > { %2483 = vst [vmem:[#allocation3 + $0x1b8] sm:$0xff] %v2419_v38  ;;  %v2420_v19 = vsel %vm2292_vm11, %v2228_v2, %v2356_v53  ;;  %v2231_v59 = vadd.f32 %v4267_v42, %v2164_v20  ;;  %v2166_v39 = vmul.f32 %v4251_v61, %v4605_v55  ;;  %v2167_v51 = vmul.f32 %v4251_v61, %v4606_v34 }
 0x3a7   : > { %2484 = vst [vmem:[#allocation3 + $0x1c0] sm:$0xff] %v2420_v19  ;;  %vm2293_vm12 = vcmp.ge.f32.partialorder %v2229_v13, 0.0  ;;  %v2357_v35 = vmul.f32 0.01, %v2229_v13  ;;  %vm2294_vm13 = vcmp.ge.f32.partialorder %v2230_v58, 0.0  ;;  %v2232_v6 = vadd.f32 %v4267_v42, %v2165_v37 }
 0x3a8   : > { %v2358_v15 = vmul.f32 0.01, %v2230_v58  ;;  %vm2295_vm14 = vcmp.ge.f32.partialorder %v2231_v59, 0.0  ;;  %v2359_v44 = vmul.f32 0.01, %v2231_v59  ;;  %v2233_v17 = vadd.f32 %v4267_v42, %v2166_v39 }
 0x3a9   : > { %v2421_v54 = vsel %vm2293_vm12, %v2229_v13, %v2357_v35  ;;  %vm2296_vm15 = vcmp.ge.f32.partialorder %v2232_v6, 0.0  ;;  %v2360_v40 = vmul.f32 0.01, %v2232_v6  ;;  %v2234_v3 = vadd.f32 %v4267_v42, %v2167_v51 }
 0x3aa   : > { %2485 = vst [vmem:[#allocation3 + $0x1c8] sm:$0xff] %v2421_v54  ;;  %v2422_v24 = vsel %vm2294_vm13, %v2230_v58, %v2358_v15  ;;  %v2423_v10 = vsel %vm2295_vm14, %v2231_v59, %v2359_v44  ;;  %vm2297_vm0 = vcmp.ge.f32.partialorder %v2233_v17, 0.0  ;;  %v2361_v5 = vmul.f32 0.01, %v2233_v17 }
 0x3ab   : > { %2486 = vst [vmem:[#allocation3 + $0x1d0] sm:$0xff] %v2422_v24  ;;  %v2424_v26 = vsel %vm2296_vm15, %v2232_v6, %v2360_v40  ;;  %vm2298_vm1 = vcmp.ge.f32.partialorder %v2234_v3, 0.0  ;;  %v2362_v28 = vmul.f32 0.01, %v2234_v3  ;;  %v2168_v12 = vmul.f32 %v4251_v61, %v4238_v50 }
 0x3ac   : > { %2487 = vst [vmem:[#allocation3 + $0x1d8] sm:$0xff] %v2423_v10  ;;  %v2425_v31 = vsel %vm2297_vm0, %v2233_v17, %v2361_v5 }
 0x3ad   : > { %2488 = vst [vmem:[#allocation3 + $0x1e0] sm:$0xff] %v2424_v26  ;;  %v2426_v18 = vsel %vm2298_vm1, %v2234_v3, %v2362_v28  ;;  %v2235_v33 = vadd.f32 %v4267_v42, %v2168_v12 }
 0x3ae   : > { %2489 = vst [vmem:[#allocation3 + $0x1e8] sm:$0xff] %v2425_v31 }
 0x3af   : > { %2490 = vst [vmem:[#allocation3 + $0x1f0] sm:$0xff] %v2426_v18  ;;  %vm2299_vm2 = vcmp.ge.f32.partialorder %v2235_v33, 0.0  ;;  %v2363_v11 = vmul.f32 0.01, %v2235_v33 }
 0x3b1   : > { %v2427_v8 = vsel %vm2299_vm2, %v2235_v33, %v2363_v11 }
 0x3b2   : > { %2491 = vst [vmem:[#allocation3 + $0x1f8] sm:$0xff] %v2427_v8 }
 0x3b3 PF: > { %p2726_p7 = scmp.eq.s32.totalorder %s2564_s18, 1  ;;  %s2499_s25 = sshll.u32 %s4466_s4, 4  ;;  %s2500_s25 = int_to_ptr.hbm [resolvable:$true] %s2499_s25 }
 0x3b4   : > { %s2830_s27 = smov [#allocation3]   ;;  %s2831_s29 = smov 128  }
 0x3b5   : > { %s2497_s28 = sshll.u32 %s2830_s27, 4  ;;  %s2498_s28 = int_to_ptr.vmem [resolvable:$true] %s2497_s28 }
 0x3b6   : > { %2723 = dma.vmem_to_hbm [thread:$0]  (%p2726_p7), %s2498_s28, 8192, %s2500_s25, [#allocation4], %s2831_s29, %s2831_s29, %s2823_s26  }
 0x3b7   : > { %2806 = dma.done.wait (%p2726_p7), [#allocation4], 8192  }
 0x3b8   : > { %2808 = vsyncadd (%p2726_p7), [#allocation4], 4294959104 }
 0x3b9 PF: > { %s15_s17 = sadd.s32 1, %s2819_s17   ;;  %s4607_s15 = smov %s2815_s16 }
 0x3ba   : > { %p12_p8 = scmp.ge.s32.totalorder %s15_s17, 4   ;;  %s4608_s16 = smov %s4610_s19 }
 0x3bc   :  { %14 = sbr.rel (!%p12_p8) target bundleno = 2 (0x2), region = 72 }
 0x3c1   :  { %2516 = vsyncpa [#allocation4], 1 }
 0x3c2   :  { %2518 = vsyncpa [#allocation4 + $0x1], 1 }

</bundles_post_ra>
